<compile_context>
chip_gen: v7x
topology: tpu7x:2x2x1
jax: 0.10.0
libtpu: 0.0.40
codegen_flags: <defaults>
</compile_context>

<pallas_src>
import functools
import math

import jax
import jax.numpy as jnp
from jax import lax
from jax.experimental import pallas as pl
from jax.experimental.pallas import tpu as pltpu


_SCALE_CLAMP = math.log(1000.0 / 16.0)  # detectron2 Box2BoxTransform scale clamp


def _round_up(x, m):
    return (x + m - 1) // m * m


def _vmem_limit_bytes():
    """~75% of physical VMEM (128 MiB v5e/v6e, 64 MiB v7x); safe fallback."""
    try:
        cap = pltpu.get_tpu_info().vmem_capacity_bytes
    except Exception:
        cap = 64 * 1024 * 1024
    return int(cap * 3 // 4)


def _choose_tile_h(H, Wp, Cp, Cmp, P, budget):
    """Largest tile_h (multiple of 8) whose *real* per-step footprint fits."""
    h_cap = _round_up(max(H, 8), 8)
    best = 8
    th = 8
    while th <= h_cap:
        rows_out = th * Wp
        rows_in = (th + 3) * Wp
        need = (2 * rows_in * Cp * 2            # manual double-buffered input window (bf16)
                + 2 * rows_out * P * 4          # pallas-double-buffered f32 output block
                + rows_out * Cmp * 4            # f32 conv accumulator scratch
                + rows_out * Cmp * 2            # bf16 hidden activation value
                + (rows_out + 2 * Wp) * Cp * 2  # one dx-shifted input span value
                + 5 * rows_out * P * 4          # head output + epilogue temporaries
                + 2 * (9 * Cp * Cmp + Cmp * P) * 2)   # resident weight blocks
        if need > budget:
            break
        best = th
        th += 8
    return best


# -----------------------------------------------------------------------------
# Fused RPN head + proposal decode
# -----------------------------------------------------------------------------
@functools.partial(jax.jit, static_argnames=("anchor_stride", "anchor_sizes", "tile_h"))
def rpn_forward_pallas(x_nchw, w_conv, b_conv, w_obj, b_obj, w_del, b_del,
                       *, anchor_stride, anchor_sizes, tile_h=None):
    """Fused RPN head (3x3 conv + ReLU + objectness/deltas 1x1 convs) and
    proposal decoding (Box2BoxTransform.apply_deltas, weights (1,1,1,1)).

    Returns:
      obj_flat:  (N, H*W, A)    objectness logits, (h, w, a) ordering
      del_flat:  (N, H*W, 4*A)  anchor deltas, channel = a*4 + coord
      proposals: (N, H*W*A, 4)  decoded proposal boxes (x1, y1, x2, y2)
    """
    N, C, H, W = x_nchw.shape
    Cm = w_conv.shape[0]                 # hidden channels (== C for StandardRPNHead)
    A = w_obj.shape[0]                   # anchors per location
    stride = float(anchor_stride)

    Cp = _round_up(C, 128)               # lane-dense channel pads (no-op for C=256)
    Cmp = _round_up(Cm, 128)
    P = _round_up(9 * A, 128)            # slab: A obj | 4A deltas | 4A boxes | pad
    Wp = _round_up(W + 2, 16)            # conv-padded width, bf16-sublane aligned

    vmem_limit = _vmem_limit_bytes()
    if tile_h is None:
        tile_h = _choose_tile_h(H, Wp, Cp, Cmp, P, int(vmem_limit * 0.9))
    tile_h = max(8, _round_up(int(tile_h), 8))
    tile_h = min(tile_h, _round_up(max(H, 8), 8))

    nT = pl.cdiv(H, tile_h)
    # Megacore (v7x): a second "parallel" axis over tile groups gives both
    # TensorCores work even when N == 1; the innermost tile axis is "arbitrary"
    # so the manual prefetch chain runs sequentially per core.
    n_groups = 2 if nT >= 4 else 1
    TPG = pl.cdiv(nT, n_groups)
    nTr = n_groups * TPG
    Hr = nTr * tile_h
    Hp_total = Hr + 3                    # 1 top halo + Hr rows + 2 bottom halo/guard
    HpWp = Hp_total * Wp

    rows_in = (tile_h + 3) * Wp          # window rows per tile (incl. halos/guard)
    rows_out = tile_h * Wp
    span = rows_out + 2 * Wp             # rows used by the 3 dy taps of one dx shift

    # ---- input: ONE padded NHWC bf16 copy in HBM, flattened to (rows, Cp) ----
    x_nhwc = jnp.transpose(x_nchw, (0, 2, 3, 1))
    x_pad = jnp.pad(x_nhwc, ((0, 0), (1, Hp_total - 1 - H),
                             (1, Wp - 1 - W), (0, Cp - C)))
    x_flat = x_pad.astype(jnp.bfloat16).reshape(N * HpWp, Cp)

    # ---- weights: per-tap (Cp, Cmp) conv weights; fused lane-padded 1x1 head ----
    wc = jnp.transpose(w_conv, (2, 3, 1, 0))                      # (3,3,C,Cm)
    wc = jnp.pad(wc, ((0, 0), (0, 0), (0, Cp - C), (0, Cmp - Cm)))
    wc = wc.reshape(9, Cp, Cmp).astype(jnp.bfloat16)
    bc = jnp.pad(b_conv.astype(jnp.float32), (0, Cmp - Cm)).reshape(1, Cmp)

    wo2 = jnp.transpose(w_obj.reshape(A, Cm), (1, 0))             # (Cm, A)
    wd2 = jnp.transpose(w_del.reshape(4 * A, Cm), (1, 0))         # (Cm, 4A)
    whead = jnp.zeros((Cmp, P), jnp.float32)
    whead = whead.at[:Cm, :A].set(wo2).at[:Cm, A:5 * A].set(wd2).astype(jnp.bfloat16)
    bhead = jnp.zeros((1, P), jnp.float32)
    bhead = bhead.at[0, :A].set(b_obj.astype(jnp.float32))
    bhead = bhead.at[0, A:5 * A].set(b_del.astype(jnp.float32))

    # Per-lane anchor size (w == h == size for single-aspect-ratio anchors).
    # Anchor centers are generated in-kernel from iota * stride.
    sz = jnp.asarray(anchor_sizes, jnp.float32)
    size_lane = jnp.zeros((1, P), jnp.float32).at[0, A:5 * A].set(jnp.repeat(sz, 4))

    def kernel(x_hbm, wc_ref, bc_ref, wh_ref, bh_ref, size_ref,
               out_ref, xbuf, sem, acc_ref):
        n = pl.program_id(0)
        g = pl.program_id(1)
        tt = pl.program_id(2)
        tile_idx = g * TPG + tt
        slot = lax.rem(tt, 2)

        # ---- manual double-buffered fetch of the overlapping halo window ----
        def window_copy(idx, s):
            start = pl.multiple_of(n * HpWp + idx * rows_out, Wp)
            return pltpu.make_async_copy(
                x_hbm.at[pl.ds(start, rows_in)], xbuf.at[s], sem.at[s])

        @pl.when(tt == 0)
        def _prime():
            window_copy(tile_idx, slot).start()

        window_copy(tile_idx, slot).wait()

        @pl.when(tt + 1 < TPG)
        def _prefetch():
            window_copy(tile_idx + 1, 1 - slot).start()

        # ---- 3x3 conv: 3 dx-shifted spans x 3 aligned dy slices -> 9 MXU matmuls
        # (flattened (rows, C) layout: a (dy, dx) tap == flat row shift dy*Wp+dx)
        for dx in range(3):
            xs = xbuf[slot, pl.ds(dx, span), :]            # one load per dx shift
            for dy in range(3):
                k = dy * 3 + dx
                part = jnp.dot(xs[dy * Wp:dy * Wp + rows_out, :], wc_ref[k],
                               preferred_element_type=jnp.float32)
                if k == 0:
                    acc_ref[...] = part                    # dx == 0, dy == 0 first
                else:
                    acc_ref[...] += part

        t_hid = jnp.maximum(acc_ref[...] + bc_ref[...], 0.0).astype(jnp.bfloat16)

        # ---- fused objectness + delta 1x1 heads: one lane-dense matmul ----
        y = jnp.dot(t_hid, wh_ref[...], preferred_element_type=jnp.float32) + bh_ref[...]
        y3 = y.reshape(tile_h, Wp, P)                      # free: Wp % 8 == 0

        # ---- in-kernel anchors + Box2BoxTransform.apply_deltas ----
        lane = lax.broadcasted_iota(jnp.int32, (1, 1, P), 2)
        c = lane - A                                       # offset inside delta block
        in_del = (c >= 0) & (c < 4 * A)
        lo_m = in_del & ((c & 3) < 2)                      # dx/dy lanes -> hold x1/y1
        is_x = (c & 1) == 0                                # even -> x-coord lane

        size_l = size_ref[...].reshape(1, 1, P)            # anchor w == h per lane
        xg = lax.broadcasted_iota(jnp.int32, (1, Wp, P), 1).astype(jnp.float32) * stride
        yg = (lax.broadcasted_iota(jnp.int32, (tile_h, Wp, P), 0)
              + tile_idx * tile_h).astype(jnp.float32) * stride
        ctr = jnp.where(is_x, xg, yg)                      # anchor center per lane

        d2 = pltpu.roll(y3, P - 2, 2)                      # dw/dh onto the dx/dy lanes
        pwh = jnp.exp(jnp.minimum(d2, _SCALE_CLAMP)) * size_l   # clamp -> no overflow
        pctr = y3 * size_l + ctr
        lo = pctr - 0.5 * pwh                              # x1', y1'
        hi = pctr + 0.5 * pwh                              # x2', y2'
        boxes = jnp.where(lo_m, lo, pltpu.roll(hi, 2, 2))  # packed at lanes [A, 5A)
        boxes = pltpu.roll(boxes, 4 * A, 2)                # move to lanes [5A, 9A)

        keep_y = lane < 5 * A
        box_z = (lane >= 5 * A) & (lane < 9 * A)
        out = jnp.where(keep_y, y3, jnp.where(box_z, boxes, 0.0))
        out_ref[0, 0] = out.astype(out_ref.dtype)

    out = pl.pallas_call(
        kernel,
        out_shape=jax.ShapeDtypeStruct((N, nTr, tile_h, Wp, P), jnp.float32),
        grid=(N, n_groups, TPG),
        in_specs=[
            pl.BlockSpec(memory_space=pl.ANY),                       # padded image, HBM
            pl.BlockSpec((9, Cp, Cmp), lambda n, g, t: (0, 0, 0)),
            pl.BlockSpec((1, Cmp),     lambda n, g, t: (0, 0)),
            pl.BlockSpec((Cmp, P),     lambda n, g, t: (0, 0)),
            pl.BlockSpec((1, P),       lambda n, g, t: (0, 0)),
            pl.BlockSpec((1, P),       lambda n, g, t: (0, 0)),
        ],
        out_specs=pl.BlockSpec((1, 1, tile_h, Wp, P),
                               lambda n, g, t: (n, g * TPG + t, 0, 0, 0)),
        scratch_shapes=[
            pltpu.VMEM((2, rows_in, Cp), jnp.bfloat16),   # double-buffered halo window
            pltpu.SemaphoreType.DMA((2,)),
            pltpu.VMEM((rows_out, Cmp), jnp.float32),     # conv accumulator
        ],
        compiler_params=pltpu.CompilerParams(
            dimension_semantics=("parallel", "parallel", "arbitrary"),
            vmem_limit_bytes=vmem_limit),
    )(x_flat, wc, bc, whead, bhead, size_lane)

    # ---- unpack the lane-dense slab.  Rows >= H / cols >= W are padding-derived
    # garbage and must be discarded here (see layout invariant in the header).
    slab = out.reshape(N, Hr, Wp, P)[:, :H, :W, :]
    obj_flat = slab[..., :A].reshape(N, H * W, A)
    del_flat = slab[..., A:5 * A].reshape(N, H * W, 4 * A)
    proposals = slab[..., 5 * A:9 * A].reshape(N, H * W * A, 4)
    return obj_flat, del_flat, proposals


# -----------------------------------------------------------------------------
# Pure-JAX references (for correctness checks)
# -----------------------------------------------------------------------------
def _bf16(x):
    return x.astype(jnp.bfloat16).astype(jnp.float32)


def _head_reference(x, w_conv, b_conv, w_obj, b_obj, w_del, b_del):
    """Conv reference with the same bf16 operand quantization as the kernel."""
    dn = ("NCHW", "OIHW", "NCHW")
    hp = lax.Precision.HIGHEST
    t = lax.conv_general_dilated(_bf16(x), _bf16(w_conv), (1, 1), "SAME",
                                 dimension_numbers=dn, precision=hp)
    t = jax.nn.relu(t + b_conv[None, :, None, None])
    t = _bf16(t)  # kernel casts the hidden activation to bf16 for the 1x1 matmul
    obj = lax.conv_general_dilated(t, _bf16(w_obj), (1, 1), "SAME",
                                   dimension_numbers=dn, precision=hp)
    obj = obj + b_obj[None, :, None, None]
    dlt = lax.conv_general_dilated(t, _bf16(w_del), (1, 1), "SAME",
                                   dimension_numbers=dn, precision=hp)
    dlt = dlt + b_del[None, :, None, None]
    return obj, dlt


def _decode_reference(anchors, deltas):
    wa = anchors[:, 2] - anchors[:, 0]
    ha = anchors[:, 3] - anchors[:, 1]
    cxa = anchors[:, 0] + 0.5 * wa
    cya = anchors[:, 1] + 0.5 * ha
    dx, dy, dw, dh = deltas[..., 0], deltas[..., 1], deltas[..., 2], deltas[..., 3]
    dw = jnp.minimum(dw, _SCALE_CLAMP)
    dh = jnp.minimum(dh, _SCALE_CLAMP)
    pcx = dx * wa + cxa
    pcy = dy * ha + cya
    pw = jnp.exp(dw) * wa
    ph = jnp.exp(dh) * ha
    return jnp.stack([pcx - 0.5 * pw, pcy - 0.5 * ph,
                      pcx + 0.5 * pw, pcy + 0.5 * ph], axis=-1)


def generate_anchors(H, W, stride, sizes):
    """Simplified single-aspect-ratio anchor grid, (h, w, a) ordering."""
    cell = jnp.stack([jnp.array([-s / 2.0, -s / 2.0, s / 2.0, s / 2.0], jnp.float32)
                      for s in sizes])
    sx = jnp.arange(W, dtype=jnp.float32) * stride
    sy = jnp.arange(H, dtype=jnp.float32) * stride
    gy, gx = jnp.meshgrid(sy, sx, indexing="ij")
    shifts = jnp.stack([gx.ravel(), gy.ravel(), gx.ravel(), gy.ravel()], axis=1)
    return (shifts[:, None, :] + cell[None, :, :]).reshape(-1, 4)


if __name__ == "__main__":
    key = jax.random.PRNGKey(0)
    N, C, H, W = 2, 4, 16, 16          # single feature level, NCHW like PyTorch
    A = 3                              # anchors per spatial location
    Cm = C                             # StandardRPNHead keeps channel count
    stride, sizes = 8, (16.0, 32.0, 64.0)

    k = jax.random.split(key, 8)
    x = jax.random.normal(k[0], (N, C, H, W), jnp.float32)
    w_conv = jax.random.normal(k[1], (Cm, C, 3, 3), jnp.float32) * 0.1
    b_conv = jax.random.normal(k[2], (Cm,), jnp.float32) * 0.1
    w_obj = jax.random.normal(k[3], (A, Cm, 1, 1), jnp.float32) * 0.1
    b_obj = jax.random.normal(k[4], (A,), jnp.float32) * 0.1
    w_del = jax.random.normal(k[5], (4 * A, Cm, 1, 1), jnp.float32) * 0.1
    b_del = jax.random.normal(k[6], (4 * A,), jnp.float32) * 0.1

    # references (conv with identical bf16 quantization, detectron2 box decode)
    ref_obj, ref_del = _head_reference(x, w_conv, b_conv, w_obj, b_obj, w_del, b_del)
    ref_obj_flat = jnp.transpose(ref_obj, (0, 2, 3, 1)).reshape(N, H * W, A)
    ref_del_flat = jnp.transpose(ref_del, (0, 2, 3, 1)).reshape(N, H * W, 4 * A)
    anchors = generate_anchors(H, W, stride, sizes)        # (H*W*A, 4)

    # Run with the auto tile size (single tile) and with tile_h=8 (exercises
    # the manual double-buffered halo-window prefetch across two H tiles).
    for th in (None, 8):
        obj_flat, del_flat, proposals = rpn_forward_pallas(
            x, w_conv, b_conv, w_obj, b_obj, w_del, b_del,
            anchor_stride=stride, anchor_sizes=sizes, tile_h=th)
        jax.block_until_ready((obj_flat, del_flat, proposals))

        assert obj_flat.shape == (N, H * W, A)
        assert del_flat.shape == (N, H * W, 4 * A)
        assert proposals.shape == (N, H * W * A, 4)
        assert jnp.allclose(obj_flat, ref_obj_flat, atol=2e-3, rtol=2e-3)
        assert jnp.allclose(del_flat, ref_del_flat, atol=2e-3, rtol=2e-3)
        ref_prop = _decode_reference(anchors, del_flat.reshape(N, H * W * A, 4))
        assert jnp.allclose(proposals, ref_prop, atol=5e-2, rtol=1e-3)

    # TODO(synk): top-k + NMS + clipping + min-size filtering + descending sort
    # (find_top_rpn_proposals), anchor matching and losses are not ported.
    print("KERNEL_OK")
</pallas_src>

<mosaic_0001>
module attributes {stable_mosaic.version = 11 : i64} {
  func.func @kernel(%arg0: i32, %arg1: i32, %arg2: i32, %arg3: memref<1216x128xbf16, #tpu.memory_space<any>>, %arg4: memref<9x128x128xbf16, #tpu.memory_space<vmem>>, %arg5: memref<1x128xf32, #tpu.memory_space<vmem>>, %arg6: memref<128x128xbf16, #tpu.memory_space<vmem>>, %arg7: memref<1x128xf32, #tpu.memory_space<vmem>>, %arg8: memref<1x128xf32, #tpu.memory_space<vmem>>, %arg9: memref<1x1x16x32x128xf32, #tpu.memory_space<vmem>>, %arg10: memref<2x608x128xbf16, #tpu.memory_space<vmem>>, %arg11: memref<2x!tpu.dma_semaphore, #tpu.memory_space<semaphore_mem>>, %arg12: memref<512x128xf32, #tpu.memory_space<vmem>>) attributes {dimension_semantics = [#tpu.dimension_semantics<parallel>, #tpu.dimension_semantics<parallel>, #tpu.dimension_semantics<arbitrary>], iteration_bounds = array<i64: 2, 1, 1>, scalar_prefetch = 0 : i64, scratch_operands = 3 : i64, tpu.core_type = #tpu.core_type<tc>, window_params = [{}, {pipeline_mode = #tpu.pipeline_mode<synchronous>, transform_indices = @transform_1, window_bounds = array<i64: 9, 128, 128>}, {pipeline_mode = #tpu.pipeline_mode<synchronous>, transform_indices = @transform_2, window_bounds = array<i64: 1, 128>}, {pipeline_mode = #tpu.pipeline_mode<synchronous>, transform_indices = @transform_3, window_bounds = array<i64: 128, 128>}, {pipeline_mode = #tpu.pipeline_mode<synchronous>, transform_indices = @transform_4, window_bounds = array<i64: 1, 128>}, {pipeline_mode = #tpu.pipeline_mode<synchronous>, transform_indices = @transform_5, window_bounds = array<i64: 1, 128>}, {transform_indices = @transform_6, window_bounds = array<i64: 1, 1, 16, 32, 128>}]} {
    %c1_i32 = arith.constant 1 : i32
    %0 = arith.muli %arg1, %c1_i32 : i32
    %1 = arith.addi %0, %arg2 : i32
    %c2_i32 = arith.constant 2 : i32
    %2 = arith.remsi %arg2, %c2_i32 : i32
    %c0_i32 = arith.constant 0 : i32
    %3 = arith.cmpi eq, %arg2, %c0_i32 : i32
    %4 = arith.extui %3 : i1 to i32
    %c0_i32_0 = arith.constant 0 : i32
    %5 = arith.cmpi ne, %4, %c0_i32_0 : i32
    scf.if %5 {
      %c608_i32_104 = arith.constant 608 : i32
      %174 = arith.muli %arg0, %c608_i32_104 : i32
      %c512_i32_105 = arith.constant 512 : i32
      %175 = arith.muli %1, %c512_i32_105 : i32
      %176 = arith.addi %174, %175 : i32
      %177 = tpu.assume_multiple %176, 32 : i32
      %c0_i32_106 = arith.constant 0 : i32
      %178 = tpu.memref_slice %arg3[%177, %c0_i32_106] : memref<1216x128xbf16, #tpu.memory_space<any>> -> memref<608x128xbf16, #tpu.memory_space<any>>
      %c0_i32_107 = arith.constant 0 : i32
      %c0_i32_108 = arith.constant 0 : i32
      %179 = tpu.memref_slice %arg10[%2, %c0_i32_107, %c0_i32_108] : memref<2x608x128xbf16, #tpu.memory_space<vmem>> -> memref<1x608x128xbf16, #tpu.memory_space<vmem>>
      %180 = tpu.memref_squeeze %179 : memref<1x608x128xbf16, #tpu.memory_space<vmem>> -> memref<608x128xbf16, #tpu.memory_space<vmem>>
      %181 = tpu.memref_slice %arg11[%2] : memref<2x!tpu.dma_semaphore, #tpu.memory_space<semaphore_mem>> -> memref<1x!tpu.dma_semaphore, #tpu.memory_space<semaphore_mem>>
      %182 = tpu.memref_squeeze %181 : memref<1x!tpu.dma_semaphore, #tpu.memory_space<semaphore_mem>> -> memref<!tpu.dma_semaphore, #tpu.memory_space<semaphore_mem>>
      tpu.enqueue_dma source(%178 : memref<608x128xbf16, #tpu.memory_space<any>>) target(%180 : memref<608x128xbf16, #tpu.memory_space<vmem>>) target_semaphore(%182 : memref<!tpu.dma_semaphore, #tpu.memory_space<semaphore_mem>>)
    } else {
    }
    %c608_i32 = arith.constant 608 : i32
    %6 = arith.muli %arg0, %c608_i32 : i32
    %c512_i32 = arith.constant 512 : i32
    %7 = arith.muli %1, %c512_i32 : i32
    %8 = arith.addi %6, %7 : i32
    %9 = tpu.assume_multiple %8, 32 : i32
    %c0_i32_1 = arith.constant 0 : i32
    %10 = tpu.memref_slice %arg3[%9, %c0_i32_1] : memref<1216x128xbf16, #tpu.memory_space<any>> -> memref<608x128xbf16, #tpu.memory_space<any>>
    %c0_i32_2 = arith.constant 0 : i32
    %c0_i32_3 = arith.constant 0 : i32
    %11 = tpu.memref_slice %arg10[%2, %c0_i32_2, %c0_i32_3] : memref<2x608x128xbf16, #tpu.memory_space<vmem>> -> memref<1x608x128xbf16, #tpu.memory_space<vmem>>
    %12 = tpu.memref_squeeze %11 : memref<1x608x128xbf16, #tpu.memory_space<vmem>> -> memref<608x128xbf16, #tpu.memory_space<vmem>>
    %13 = tpu.memref_slice %arg11[%2] : memref<2x!tpu.dma_semaphore, #tpu.memory_space<semaphore_mem>> -> memref<1x!tpu.dma_semaphore, #tpu.memory_space<semaphore_mem>>
    %14 = tpu.memref_squeeze %13 : memref<1x!tpu.dma_semaphore, #tpu.memory_space<semaphore_mem>> -> memref<!tpu.dma_semaphore, #tpu.memory_space<semaphore_mem>>
    tpu.wait_dma2 semaphore(%14 : memref<!tpu.dma_semaphore, #tpu.memory_space<semaphore_mem>>) src(%10 : memref<608x128xbf16, #tpu.memory_space<any>>) dst(%12 : memref<608x128xbf16, #tpu.memory_space<vmem>>)
    %c1_i32_4 = arith.constant 1 : i32
    %15 = arith.addi %arg2, %c1_i32_4 : i32
    %c1_i32_5 = arith.constant 1 : i32
    %16 = arith.cmpi slt, %15, %c1_i32_5 : i32
    %17 = arith.extui %16 : i1 to i32
    %c0_i32_6 = arith.constant 0 : i32
    %18 = arith.cmpi ne, %17, %c0_i32_6 : i32
    scf.if %18 {
      %c1_i32_104 = arith.constant 1 : i32
      %174 = arith.addi %1, %c1_i32_104 : i32
      %c1_i32_105 = arith.constant 1 : i32
      %175 = arith.subi %c1_i32_105, %2 : i32
      %c608_i32_106 = arith.constant 608 : i32
      %176 = arith.muli %arg0, %c608_i32_106 : i32
      %c512_i32_107 = arith.constant 512 : i32
      %177 = arith.muli %174, %c512_i32_107 : i32
      %178 = arith.addi %176, %177 : i32
      %179 = tpu.assume_multiple %178, 32 : i32
      %c0_i32_108 = arith.constant 0 : i32
      %180 = tpu.memref_slice %arg3[%179, %c0_i32_108] : memref<1216x128xbf16, #tpu.memory_space<any>> -> memref<608x128xbf16, #tpu.memory_space<any>>
      %c0_i32_109 = arith.constant 0 : i32
      %c0_i32_110 = arith.constant 0 : i32
      %181 = tpu.memref_slice %arg10[%175, %c0_i32_109, %c0_i32_110] : memref<2x608x128xbf16, #tpu.memory_space<vmem>> -> memref<1x608x128xbf16, #tpu.memory_space<vmem>>
      %182 = tpu.memref_squeeze %181 : memref<1x608x128xbf16, #tpu.memory_space<vmem>> -> memref<608x128xbf16, #tpu.memory_space<vmem>>
      %183 = tpu.memref_slice %arg11[%175] : memref<2x!tpu.dma_semaphore, #tpu.memory_space<semaphore_mem>> -> memref<1x!tpu.dma_semaphore, #tpu.memory_space<semaphore_mem>>
      %184 = tpu.memref_squeeze %183 : memref<1x!tpu.dma_semaphore, #tpu.memory_space<semaphore_mem>> -> memref<!tpu.dma_semaphore, #tpu.memory_space<semaphore_mem>>
      tpu.enqueue_dma source(%180 : memref<608x128xbf16, #tpu.memory_space<any>>) target(%182 : memref<608x128xbf16, #tpu.memory_space<vmem>>) target_semaphore(%184 : memref<!tpu.dma_semaphore, #tpu.memory_space<semaphore_mem>>)
    } else {
    }
    %19 = arith.index_cast %2 : i32 to index
    %c0 = arith.constant 0 : index
    %c0_7 = arith.constant 0 : index
    %20 = vector.load %arg10[%19, %c0, %c0_7] : memref<2x608x128xbf16, #tpu.memory_space<vmem>>, vector<1x576x128xbf16>
    %21 = vector.shape_cast %20 : vector<1x576x128xbf16> to vector<576x128xbf16>
    %22 = vector.extract_strided_slice %21 {offsets = [0, 0], sizes = [512, 128], strides = [1, 1]} : vector<576x128xbf16> to vector<512x128xbf16>
    %c0_8 = arith.constant 0 : index
    %c0_9 = arith.constant 0 : index
    %c0_10 = arith.constant 0 : index
    %23 = vector.load %arg4[%c0_8, %c0_9, %c0_10] : memref<9x128x128xbf16, #tpu.memory_space<vmem>>, vector<1x128x128xbf16>
    %24 = vector.shape_cast %23 : vector<1x128x128xbf16> to vector<128x128xbf16>
    %cst = arith.constant dense<0.000000e+00> : vector<512x128xf32>
    %25 = tpu.matmul %22, %24, %cst {dimension_numbers = #tpu.dot_dimension_numbers<[1], [0], [0], [1], [0, 0, 1, 1], [], []>} : vector<512x128xbf16>, vector<128x128xbf16>, vector<512x128xf32> -> vector<512x128xf32>
    %c0_11 = arith.constant 0 : index
    %c0_12 = arith.constant 0 : index
    %26 = vector.load %arg12[%c0_11, %c0_12] : memref<512x128xf32, #tpu.memory_space<vmem>>, vector<512x128xf32>
    tpu.vector_store %arg12[%c0_11, %c0_12], %25 {strides = array<i32>} : memref<512x128xf32, #tpu.memory_space<vmem>>, vector<512x128xf32>,
    %27 = vector.extract_strided_slice %21 {offsets = [32, 0], sizes = [512, 128], strides = [1, 1]} : vector<576x128xbf16> to vector<512x128xbf16>
    %c3 = arith.constant 3 : index
    %c0_13 = arith.constant 0 : index
    %c0_14 = arith.constant 0 : index
    %28 = vector.load %arg4[%c3, %c0_13, %c0_14] : memref<9x128x128xbf16, #tpu.memory_space<vmem>>, vector<1x128x128xbf16>
    %29 = vector.shape_cast %28 : vector<1x128x128xbf16> to vector<128x128xbf16>
    %cst_15 = arith.constant dense<0.000000e+00> : vector<512x128xf32>
    %30 = tpu.matmul %27, %29, %cst_15 {dimension_numbers = #tpu.dot_dimension_numbers<[1], [0], [0], [1], [0, 0, 1, 1], [], []>} : vector<512x128xbf16>, vector<128x128xbf16>, vector<512x128xf32> -> vector<512x128xf32>
    %c0_16 = arith.constant 0 : index
    %c0_17 = arith.constant 0 : index
    %31 = vector.load %arg12[%c0_16, %c0_17] : memref<512x128xf32, #tpu.memory_space<vmem>>, vector<512x128xf32>
    %32 = arith.addf %31, %30 : vector<512x128xf32>
    %c0_18 = arith.constant 0 : index
    %c0_19 = arith.constant 0 : index
    %33 = vector.load %arg12[%c0_18, %c0_19] : memref<512x128xf32, #tpu.memory_space<vmem>>, vector<512x128xf32>
    tpu.vector_store %arg12[%c0_18, %c0_19], %32 {strides = array<i32>} : memref<512x128xf32, #tpu.memory_space<vmem>>, vector<512x128xf32>,
    %34 = vector.extract_strided_slice %21 {offsets = [64, 0], sizes = [512, 128], strides = [1, 1]} : vector<576x128xbf16> to vector<512x128xbf16>
    %c6 = arith.constant 6 : index
    %c0_20 = arith.constant 0 : index
    %c0_21 = arith.constant 0 : index
    %35 = vector.load %arg4[%c6, %c0_20, %c0_21] : memref<9x128x128xbf16, #tpu.memory_space<vmem>>, vector<1x128x128xbf16>
    %36 = vector.shape_cast %35 : vector<1x128x128xbf16> to vector<128x128xbf16>
    %cst_22 = arith.constant dense<0.000000e+00> : vector<512x128xf32>
    %37 = tpu.matmul %34, %36, %cst_22 {dimension_numbers = #tpu.dot_dimension_numbers<[1], [0], [0], [1], [0, 0, 1, 1], [], []>} : vector<512x128xbf16>, vector<128x128xbf16>, vector<512x128xf32> -> vector<512x128xf32>
    %c0_23 = arith.constant 0 : index
    %c0_24 = arith.constant 0 : index
    %38 = vector.load %arg12[%c0_23, %c0_24] : memref<512x128xf32, #tpu.memory_space<vmem>>, vector<512x128xf32>
    %39 = arith.addf %38, %37 : vector<512x128xf32>
    %c0_25 = arith.constant 0 : index
    %c0_26 = arith.constant 0 : index
    %40 = vector.load %arg12[%c0_25, %c0_26] : memref<512x128xf32, #tpu.memory_space<vmem>>, vector<512x128xf32>
    tpu.vector_store %arg12[%c0_25, %c0_26], %39 {strides = array<i32>} : memref<512x128xf32, #tpu.memory_space<vmem>>, vector<512x128xf32>,
    %41 = arith.index_cast %2 : i32 to index
    %c1 = arith.constant 1 : index
    %c0_27 = arith.constant 0 : index
    %42 = vector.load %arg10[%41, %c1, %c0_27] : memref<2x608x128xbf16, #tpu.memory_space<vmem>>, vector<1x576x128xbf16>
    %43 = vector.shape_cast %42 : vector<1x576x128xbf16> to vector<576x128xbf16>
    %44 = vector.extract_strided_slice %43 {offsets = [0, 0], sizes = [512, 128], strides = [1, 1]} : vector<576x128xbf16> to vector<512x128xbf16>
    %c1_28 = arith.constant 1 : index
    %c0_29 = arith.constant 0 : index
    %c0_30 = arith.constant 0 : index
    %45 = vector.load %arg4[%c1_28, %c0_29, %c0_30] : memref<9x128x128xbf16, #tpu.memory_space<vmem>>, vector<1x128x128xbf16>
    %46 = vector.shape_cast %45 : vector<1x128x128xbf16> to vector<128x128xbf16>
    %cst_31 = arith.constant dense<0.000000e+00> : vector<512x128xf32>
    %47 = tpu.matmul %44, %46, %cst_31 {dimension_numbers = #tpu.dot_dimension_numbers<[1], [0], [0], [1], [0, 0, 1, 1], [], []>} : vector<512x128xbf16>, vector<128x128xbf16>, vector<512x128xf32> -> vector<512x128xf32>
    %c0_32 = arith.constant 0 : index
    %c0_33 = arith.constant 0 : index
    %48 = vector.load %arg12[%c0_32, %c0_33] : memref<512x128xf32, #tpu.memory_space<vmem>>, vector<512x128xf32>
    %49 = arith.addf %48, %47 : vector<512x128xf32>
    %c0_34 = arith.constant 0 : index
    %c0_35 = arith.constant 0 : index
    %50 = vector.load %arg12[%c0_34, %c0_35] : memref<512x128xf32, #tpu.memory_space<vmem>>, vector<512x128xf32>
    tpu.vector_store %arg12[%c0_34, %c0_35], %49 {strides = array<i32>} : memref<512x128xf32, #tpu.memory_space<vmem>>, vector<512x128xf32>,
    %51 = vector.extract_strided_slice %43 {offsets = [32, 0], sizes = [512, 128], strides = [1, 1]} : vector<576x128xbf16> to vector<512x128xbf16>
    %c4 = arith.constant 4 : index
    %c0_36 = arith.constant 0 : index
    %c0_37 = arith.constant 0 : index
    %52 = vector.load %arg4[%c4, %c0_36, %c0_37] : memref<9x128x128xbf16, #tpu.memory_space<vmem>>, vector<1x128x128xbf16>
    %53 = vector.shape_cast %52 : vector<1x128x128xbf16> to vector<128x128xbf16>
    %cst_38 = arith.constant dense<0.000000e+00> : vector<512x128xf32>
    %54 = tpu.matmul %51, %53, %cst_38 {dimension_numbers = #tpu.dot_dimension_numbers<[1], [0], [0], [1], [0, 0, 1, 1], [], []>} : vector<512x128xbf16>, vector<128x128xbf16>, vector<512x128xf32> -> vector<512x128xf32>
    %c0_39 = arith.constant 0 : index
    %c0_40 = arith.constant 0 : index
    %55 = vector.load %arg12[%c0_39, %c0_40] : memref<512x128xf32, #tpu.memory_space<vmem>>, vector<512x128xf32>
    %56 = arith.addf %55, %54 : vector<512x128xf32>
    %c0_41 = arith.constant 0 : index
    %c0_42 = arith.constant 0 : index
    %57 = vector.load %arg12[%c0_41, %c0_42] : memref<512x128xf32, #tpu.memory_space<vmem>>, vector<512x128xf32>
    tpu.vector_store %arg12[%c0_41, %c0_42], %56 {strides = array<i32>} : memref<512x128xf32, #tpu.memory_space<vmem>>, vector<512x128xf32>,
    %58 = vector.extract_strided_slice %43 {offsets = [64, 0], sizes = [512, 128], strides = [1, 1]} : vector<576x128xbf16> to vector<512x128xbf16>
    %c7 = arith.constant 7 : index
    %c0_43 = arith.constant 0 : index
    %c0_44 = arith.constant 0 : index
    %59 = vector.load %arg4[%c7, %c0_43, %c0_44] : memref<9x128x128xbf16, #tpu.memory_space<vmem>>, vector<1x128x128xbf16>
    %60 = vector.shape_cast %59 : vector<1x128x128xbf16> to vector<128x128xbf16>
    %cst_45 = arith.constant dense<0.000000e+00> : vector<512x128xf32>
    %61 = tpu.matmul %58, %60, %cst_45 {dimension_numbers = #tpu.dot_dimension_numbers<[1], [0], [0], [1], [0, 0, 1, 1], [], []>} : vector<512x128xbf16>, vector<128x128xbf16>, vector<512x128xf32> -> vector<512x128xf32>
    %c0_46 = arith.constant 0 : index
    %c0_47 = arith.constant 0 : index
    %62 = vector.load %arg12[%c0_46, %c0_47] : memref<512x128xf32, #tpu.memory_space<vmem>>, vector<512x128xf32>
    %63 = arith.addf %62, %61 : vector<512x128xf32>
    %c0_48 = arith.constant 0 : index
    %c0_49 = arith.constant 0 : index
    %64 = vector.load %arg12[%c0_48, %c0_49] : memref<512x128xf32, #tpu.memory_space<vmem>>, vector<512x128xf32>
    tpu.vector_store %arg12[%c0_48, %c0_49], %63 {strides = array<i32>} : memref<512x128xf32, #tpu.memory_space<vmem>>, vector<512x128xf32>,
    %65 = arith.index_cast %2 : i32 to index
    %c2 = arith.constant 2 : index
    %c0_50 = arith.constant 0 : index
    %66 = vector.load %arg10[%65, %c2, %c0_50] : memref<2x608x128xbf16, #tpu.memory_space<vmem>>, vector<1x576x128xbf16>
    %67 = vector.shape_cast %66 : vector<1x576x128xbf16> to vector<576x128xbf16>
    %68 = vector.extract_strided_slice %67 {offsets = [0, 0], sizes = [512, 128], strides = [1, 1]} : vector<576x128xbf16> to vector<512x128xbf16>
    %c2_51 = arith.constant 2 : index
    %c0_52 = arith.constant 0 : index
    %c0_53 = arith.constant 0 : index
    %69 = vector.load %arg4[%c2_51, %c0_52, %c0_53] : memref<9x128x128xbf16, #tpu.memory_space<vmem>>, vector<1x128x128xbf16>
    %70 = vector.shape_cast %69 : vector<1x128x128xbf16> to vector<128x128xbf16>
    %cst_54 = arith.constant dense<0.000000e+00> : vector<512x128xf32>
    %71 = tpu.matmul %68, %70, %cst_54 {dimension_numbers = #tpu.dot_dimension_numbers<[1], [0], [0], [1], [0, 0, 1, 1], [], []>} : vector<512x128xbf16>, vector<128x128xbf16>, vector<512x128xf32> -> vector<512x128xf32>
    %c0_55 = arith.constant 0 : index
    %c0_56 = arith.constant 0 : index
    %72 = vector.load %arg12[%c0_55, %c0_56] : memref<512x128xf32, #tpu.memory_space<vmem>>, vector<512x128xf32>
    %73 = arith.addf %72, %71 : vector<512x128xf32>
    %c0_57 = arith.constant 0 : index
    %c0_58 = arith.constant 0 : index
    %74 = vector.load %arg12[%c0_57, %c0_58] : memref<512x128xf32, #tpu.memory_space<vmem>>, vector<512x128xf32>
    tpu.vector_store %arg12[%c0_57, %c0_58], %73 {strides = array<i32>} : memref<512x128xf32, #tpu.memory_space<vmem>>, vector<512x128xf32>,
    %75 = vector.extract_strided_slice %67 {offsets = [32, 0], sizes = [512, 128], strides = [1, 1]} : vector<576x128xbf16> to vector<512x128xbf16>
    %c5 = arith.constant 5 : index
    %c0_59 = arith.constant 0 : index
    %c0_60 = arith.constant 0 : index
    %76 = vector.load %arg4[%c5, %c0_59, %c0_60] : memref<9x128x128xbf16, #tpu.memory_space<vmem>>, vector<1x128x128xbf16>
    %77 = vector.shape_cast %76 : vector<1x128x128xbf16> to vector<128x128xbf16>
    %cst_61 = arith.constant dense<0.000000e+00> : vector<512x128xf32>
    %78 = tpu.matmul %75, %77, %cst_61 {dimension_numbers = #tpu.dot_dimension_numbers<[1], [0], [0], [1], [0, 0, 1, 1], [], []>} : vector<512x128xbf16>, vector<128x128xbf16>, vector<512x128xf32> -> vector<512x128xf32>
    %c0_62 = arith.constant 0 : index
    %c0_63 = arith.constant 0 : index
    %79 = vector.load %arg12[%c0_62, %c0_63] : memref<512x128xf32, #tpu.memory_space<vmem>>, vector<512x128xf32>
    %80 = arith.addf %79, %78 : vector<512x128xf32>
    %c0_64 = arith.constant 0 : index
    %c0_65 = arith.constant 0 : index
    %81 = vector.load %arg12[%c0_64, %c0_65] : memref<512x128xf32, #tpu.memory_space<vmem>>, vector<512x128xf32>
    tpu.vector_store %arg12[%c0_64, %c0_65], %80 {strides = array<i32>} : memref<512x128xf32, #tpu.memory_space<vmem>>, vector<512x128xf32>,
    %82 = vector.extract_strided_slice %67 {offsets = [64, 0], sizes = [512, 128], strides = [1, 1]} : vector<576x128xbf16> to vector<512x128xbf16>
    %c8 = arith.constant 8 : index
    %c0_66 = arith.constant 0 : index
    %c0_67 = arith.constant 0 : index
    %83 = vector.load %arg4[%c8, %c0_66, %c0_67] : memref<9x128x128xbf16, #tpu.memory_space<vmem>>, vector<1x128x128xbf16>
    %84 = vector.shape_cast %83 : vector<1x128x128xbf16> to vector<128x128xbf16>
    %cst_68 = arith.constant dense<0.000000e+00> : vector<512x128xf32>
    %85 = tpu.matmul %82, %84, %cst_68 {dimension_numbers = #tpu.dot_dimension_numbers<[1], [0], [0], [1], [0, 0, 1, 1], [], []>} : vector<512x128xbf16>, vector<128x128xbf16>, vector<512x128xf32> -> vector<512x128xf32>
    %c0_69 = arith.constant 0 : index
    %c0_70 = arith.constant 0 : index
    %86 = vector.load %arg12[%c0_69, %c0_70] : memref<512x128xf32, #tpu.memory_space<vmem>>, vector<512x128xf32>
    %87 = arith.addf %86, %85 : vector<512x128xf32>
    %c0_71 = arith.constant 0 : index
    %c0_72 = arith.constant 0 : index
    %88 = vector.load %arg12[%c0_71, %c0_72] : memref<512x128xf32, #tpu.memory_space<vmem>>, vector<512x128xf32>
    tpu.vector_store %arg12[%c0_71, %c0_72], %87 {strides = array<i32>} : memref<512x128xf32, #tpu.memory_space<vmem>>, vector<512x128xf32>,
    %c0_73 = arith.constant 0 : index
    %c0_74 = arith.constant 0 : index
    %89 = vector.load %arg12[%c0_73, %c0_74] : memref<512x128xf32, #tpu.memory_space<vmem>>, vector<512x128xf32>
    %c0_75 = arith.constant 0 : index
    %c0_76 = arith.constant 0 : index
    %90 = vector.load %arg5[%c0_75, %c0_76] : memref<1x128xf32, #tpu.memory_space<vmem>>, vector<1x128xf32>
    %91 = vector.broadcast %90 : vector<1x128xf32> to vector<512x128xf32>
    %92 = arith.addf %89, %91 : vector<512x128xf32>
    %cst_77 = arith.constant 0.000000e+00 : f32
    %93 = vector.broadcast %cst_77 : f32 to vector<512x128xf32>
    %94 = arith.maximumf %92, %93 : vector<512x128xf32>
    %95 = arith.truncf %94 : vector<512x128xf32> to vector<512x128xbf16>
    %c0_78 = arith.constant 0 : index
    %c0_79 = arith.constant 0 : index
    %96 = vector.load %arg6[%c0_78, %c0_79] : memref<128x128xbf16, #tpu.memory_space<vmem>>, vector<128x128xbf16>
    %cst_80 = arith.constant dense<0.000000e+00> : vector<512x128xf32>
    %97 = tpu.matmul %95, %96, %cst_80 {dimension_numbers = #tpu.dot_dimension_numbers<[1], [0], [0], [1], [0, 0, 1, 1], [], []>} : vector<512x128xbf16>, vector<128x128xbf16>, vector<512x128xf32> -> vector<512x128xf32>
    %c0_81 = arith.constant 0 : index
    %c0_82 = arith.constant 0 : index
    %98 = vector.load %arg7[%c0_81, %c0_82] : memref<1x128xf32, #tpu.memory_space<vmem>>, vector<1x128xf32>
    %99 = vector.broadcast %98 : vector<1x128xf32> to vector<512x128xf32>
    %100 = arith.addf %97, %99 : vector<512x128xf32>
    %101 = vector.shape_cast %100 : vector<512x128xf32> to vector<16x32x128xf32>
    %102 = tpu.iota {dimensions = array<i32: 2>} : vector<1x1x128xi32>
    %c3_i32 = arith.constant 3 : i32
    %103 = vector.broadcast %c3_i32 : i32 to vector<1x1x128xi32>
    %104 = arith.subi %102, %103 : vector<1x1x128xi32>
    %c0_i32_83 = arith.constant 0 : i32
    %105 = vector.broadcast %c0_i32_83 : i32 to vector<1x1x128xi32>
    %106 = arith.cmpi sge, %104, %105 : vector<1x1x128xi32>
    %c12_i32 = arith.constant 12 : i32
    %107 = vector.broadcast %c12_i32 : i32 to vector<1x1x128xi32>
    %108 = arith.cmpi slt, %104, %107 : vector<1x1x128xi32>
    %109 = arith.andi %106, %108 : vector<1x1x128xi1>
    %c3_i32_84 = arith.constant 3 : i32
    %110 = vector.broadcast %c3_i32_84 : i32 to vector<1x1x128xi32>
    %111 = arith.andi %104, %110 : vector<1x1x128xi32>
    %c2_i32_85 = arith.constant 2 : i32
    %112 = vector.broadcast %c2_i32_85 : i32 to vector<1x1x128xi32>
    %113 = arith.cmpi slt, %111, %112 : vector<1x1x128xi32>
    %114 = arith.andi %109, %113 : vector<1x1x128xi1>
    %c1_i32_86 = arith.constant 1 : i32
    %115 = vector.broadcast %c1_i32_86 : i32 to vector<1x1x128xi32>
    %116 = arith.andi %104, %115 : vector<1x1x128xi32>
    %c0_i32_87 = arith.constant 0 : i32
    %117 = vector.broadcast %c0_i32_87 : i32 to vector<1x1x128xi32>
    %118 = arith.cmpi eq, %116, %117 : vector<1x1x128xi32>
    %c0_88 = arith.constant 0 : index
    %c0_89 = arith.constant 0 : index
    %119 = vector.load %arg8[%c0_88, %c0_89] : memref<1x128xf32, #tpu.memory_space<vmem>>, vector<1x128xf32>
    %120 = vector.shape_cast %119 : vector<1x128xf32> to vector<1x1x128xf32>
    %121 = tpu.iota {dimensions = array<i32: 1>} : vector<1x32x128xi32>
    %122 = arith.sitofp %121 : vector<1x32x128xi32> to vector<1x32x128xf32>
    %cst_90 = arith.constant 8.000000e+00 : f32
    %123 = vector.broadcast %cst_90 : f32 to vector<1x32x128xf32>
    %124 = arith.mulf %122, %123 : vector<1x32x128xf32>
    %125 = tpu.iota {dimensions = array<i32: 0>} : vector<16x32x128xi32>
    %c16_i32 = arith.constant 16 : i32
    %126 = arith.muli %1, %c16_i32 : i32
    %127 = vector.broadcast %126 : i32 to vector<16x32x128xi32>
    %128 = arith.addi %125, %127 : vector<16x32x128xi32>
    %129 = arith.sitofp %128 : vector<16x32x128xi32> to vector<16x32x128xf32>
    %cst_91 = arith.constant 8.000000e+00 : f32
    %130 = vector.broadcast %cst_91 : f32 to vector<16x32x128xf32>
    %131 = arith.mulf %129, %130 : vector<16x32x128xf32>
    %132 = vector.shape_cast %118 : vector<1x1x128xi1> to vector<1x1x128xi1>
    %133 = vector.broadcast %132 : vector<1x1x128xi1> to vector<16x32x128xi1>
    %134 = vector.shape_cast %124 : vector<1x32x128xf32> to vector<1x32x128xf32>
    %135 = vector.broadcast %134 : vector<1x32x128xf32> to vector<16x32x128xf32>
    %136 = arith.select %133, %135, %131 : vector<16x32x128xi1>, vector<16x32x128xf32>
    %c126_i32 = arith.constant 126 : i32
    %137 = tpu.dynamic_rotate %101 by %c126_i32 dim 2 : vector<16x32x128xf32>, i32 -> vector<16x32x128xf32>
    %cst_92 = arith.constant 4.13516665 : f32
    %138 = vector.broadcast %cst_92 : f32 to vector<16x32x128xf32>
    %139 = arith.minimumf %137, %138 : vector<16x32x128xf32>
    %140 = math.exp %139 : vector<16x32x128xf32>
    %141 = vector.broadcast %120 : vector<1x1x128xf32> to vector<16x32x128xf32>
    %142 = arith.mulf %140, %141 : vector<16x32x128xf32>
    %143 = vector.broadcast %120 : vector<1x1x128xf32> to vector<16x32x128xf32>
    %144 = arith.mulf %101, %143 : vector<16x32x128xf32>
    %145 = arith.addf %144, %136 : vector<16x32x128xf32>
    %cst_93 = arith.constant 5.000000e-01 : f32
    %146 = vector.broadcast %cst_93 : f32 to vector<16x32x128xf32>
    %147 = arith.mulf %146, %142 : vector<16x32x128xf32>
    %148 = arith.subf %145, %147 : vector<16x32x128xf32>
    %cst_94 = arith.constant 5.000000e-01 : f32
    %149 = vector.broadcast %cst_94 : f32 to vector<16x32x128xf32>
    %150 = arith.mulf %149, %142 : vector<16x32x128xf32>
    %151 = arith.addf %145, %150 : vector<16x32x128xf32>
    %c2_i32_95 = arith.constant 2 : i32
    %152 = tpu.dynamic_rotate %151 by %c2_i32_95 dim 2 : vector<16x32x128xf32>, i32 -> vector<16x32x128xf32>
    %153 = vector.shape_cast %114 : vector<1x1x128xi1> to vector<1x1x128xi1>
    %154 = vector.broadcast %153 : vector<1x1x128xi1> to vector<16x32x128xi1>
    %155 = arith.select %154, %148, %152 : vector<16x32x128xi1>, vector<16x32x128xf32>
    %c12_i32_96 = arith.constant 12 : i32
    %156 = tpu.dynamic_rotate %155 by %c12_i32_96 dim 2 : vector<16x32x128xf32>, i32 -> vector<16x32x128xf32>
    %c15_i32 = arith.constant 15 : i32
    %157 = vector.broadcast %c15_i32 : i32 to vector<1x1x128xi32>
    %158 = arith.cmpi slt, %102, %157 : vector<1x1x128xi32>
    %c15_i32_97 = arith.constant 15 : i32
    %159 = vector.broadcast %c15_i32_97 : i32 to vector<1x1x128xi32>
    %160 = arith.cmpi sge, %102, %159 : vector<1x1x128xi32>
    %c27_i32 = arith.constant 27 : i32
    %161 = vector.broadcast %c27_i32 : i32 to vector<1x1x128xi32>
    %162 = arith.cmpi slt, %102, %161 : vector<1x1x128xi32>
    %163 = arith.andi %160, %162 : vector<1x1x128xi1>
    %cst_98 = arith.constant 0.000000e+00 : f32
    %164 = vector.shape_cast %163 : vector<1x1x128xi1> to vector<1x1x128xi1>
    %165 = vector.broadcast %164 : vector<1x1x128xi1> to vector<16x32x128xi1>
    %166 = vector.broadcast %cst_98 : f32 to vector<16x32x128xf32>
    %167 = arith.select %165, %156, %166 : vector<16x32x128xi1>, vector<16x32x128xf32>
    %168 = vector.shape_cast %158 : vector<1x1x128xi1> to vector<1x1x128xi1>
    %169 = vector.broadcast %168 : vector<1x1x128xi1> to vector<16x32x128xi1>
    %170 = arith.select %169, %101, %167 : vector<16x32x128xi1>, vector<16x32x128xf32>
    %c0_99 = arith.constant 0 : index
    %c0_100 = arith.constant 0 : index
    %c0_101 = arith.constant 0 : index
    %c0_102 = arith.constant 0 : index
    %c0_103 = arith.constant 0 : index
    %171 = vector.load %arg9[%c0_99, %c0_100, %c0_101, %c0_102, %c0_103] : memref<1x1x16x32x128xf32, #tpu.memory_space<vmem>>, vector<1x1x16x32x128xf32>
    %172 = vector.shape_cast %171 : vector<1x1x16x32x128xf32> to vector<16x32x128xf32>
    %173 = vector.shape_cast %170 : vector<16x32x128xf32> to vector<1x1x16x32x128xf32>
    tpu.vector_store %arg9[%c0_99, %c0_100, %c0_101, %c0_102, %c0_103], %173 {strides = array<i32>} : memref<1x1x16x32x128xf32, #tpu.memory_space<vmem>>, vector<1x1x16x32x128xf32>,
    return
  }
  func.func @transform_1(%arg0: i32, %arg1: i32, %arg2: i32) -> (i32, i32, i32) {
    %c0_i32 = arith.constant 0 : i32
    %c0_i32_0 = arith.constant 0 : i32
    %c0_i32_1 = arith.constant 0 : i32
    %c0_i32_2 = arith.constant 0 : i32
    return %c0_i32, %c0_i32_0, %c0_i32_1 : i32, i32, i32
  }
  func.func @transform_2(%arg0: i32, %arg1: i32, %arg2: i32) -> (i32, i32) {
    %c0_i32 = arith.constant 0 : i32
    %c0_i32_0 = arith.constant 0 : i32
    %c0_i32_1 = arith.constant 0 : i32
    return %c0_i32, %c0_i32_0 : i32, i32
  }
  func.func @transform_3(%arg0: i32, %arg1: i32, %arg2: i32) -> (i32, i32) {
    %c0_i32 = arith.constant 0 : i32
    %c0_i32_0 = arith.constant 0 : i32
    %c0_i32_1 = arith.constant 0 : i32
    return %c0_i32, %c0_i32_0 : i32, i32
  }
  func.func @transform_4(%arg0: i32, %arg1: i32, %arg2: i32) -> (i32, i32) {
    %c0_i32 = arith.constant 0 : i32
    %c0_i32_0 = arith.constant 0 : i32
    %c0_i32_1 = arith.constant 0 : i32
    return %c0_i32, %c0_i32_0 : i32, i32
  }
  func.func @transform_5(%arg0: i32, %arg1: i32, %arg2: i32) -> (i32, i32) {
    %c0_i32 = arith.constant 0 : i32
    %c0_i32_0 = arith.constant 0 : i32
    %c0_i32_1 = arith.constant 0 : i32
    return %c0_i32, %c0_i32_0 : i32, i32
  }
  func.func @transform_6(%arg0: i32, %arg1: i32, %arg2: i32) -> (i32, i32, i32, i32, i32) {
    %c1_i32 = arith.constant 1 : i32
    %0 = arith.muli %arg1, %c1_i32 : i32
    %1 = arith.addi %0, %arg2 : i32
    %c0_i32 = arith.constant 0 : i32
    %c0_i32_0 = arith.constant 0 : i32
    %c0_i32_1 = arith.constant 0 : i32
    %c0_i32_2 = arith.constant 0 : i32
    return %arg0, %1, %c0_i32, %c0_i32_0, %c0_i32_1 : i32, i32, i32, i32, i32
  }
}

</mosaic_0001>

<bundles_post_ra>
// kernel: rpn_forward_pallas.1
= control target key start
LH: loop header
LB: loop body
LE: loop exit
PB: predicated region body
PF: predicated region fallthrough
CT: control target
= control target key end

     0   :  { %s10268_s21 = smov 0   ;;  %s10270_s22 = smov 0   ;;  %s13842_s0 = inlined_call_operand.vmem [shape: bf16[1216,128], index: 0, kind: input, shape index: {}]   ;;  %s13843_s1 = inlined_call_operand.vmem [shape: bf16[9,128,128], index: 1, kind: input, shape index: {}]   ;;  %s13844_s2 = inlined_call_operand.vmem [shape: f32[1,128], index: 2, kind: input, shape index: {}]   ;;  %s13845_s3 = inlined_call_operand.vmem [shape: bf16[128,128], index: 3, kind: input, shape index: {}]   ;;  %s13846_s4 = inlined_call_operand.vmem [shape: f32[1,128], index: 4, kind: input, shape index: {}]   ;;  %s13847_s5 = inlined_call_operand.vmem [shape: f32[1,128], index: 5, kind: input, shape index: {}]   ;;  %s13848_s6 = inlined_call_operand.vmem [shape: f32[2,1,16,32,128], index: 6, kind: output, shape index: {}]  }
   0x1   :  { %s10272_s23 = smov 0  }
   0x2 LB: > { %s35_s24 = sadd.s32 1, %s10224_s22  ;;  %p7980_p0 = scmp.ge.s32.totalorder %s10228_s23, 1  ;;  %s10228_s23 = sphi %s10272_s23, %s16_s23   ;;  %s10224_s22 = sphi %s10270_s22, %s14576_s22   ;;  %s10220_s21 = sphi %s10268_s21, %s14575_s21  }
   0x3   : > { %p37_p1 = scmp.ge.s32.totalorder %s35_s24, 2  ;;  %p201_p2 = scmp.lt.s32.totalorder %s10228_s23, 3 }
   0x5   : > { %s14578_s24 = smov (%p37_p1, %s35_s24), 0  ;;  %p202_p3 = pnand %p7980_p0, %p201_p2 }
   0x7   : > { %205 = sbr.rel (%p202_p3) target bundleno = 1539 (0x603), region = 40 }
   0xe   : > { %p230_p4 = scmp.lt.s32.totalorder %s10220_s21, 1  ;;  %s252_s25 = smul.u32 608, %s10220_s21 }
  0x10   : > { %s14580_s21 = smov (!%p230_p4, %s10220_s21), 1  ;;  %s255_s26 = sshra.s32 %s252_s25, 3 }
  0x11   : > { %s8240_s27 = sshll.u32 %s14580_s21, 9  ;;  %s7983_s28 = sshll.u32 %s255_s26, 2 }
  0x12   : > { %s10289_s7 = scalar_lea.vmem %s13848_s6, %s8240_s27  ;;  %s10294_s10 = scalar_lea.vmem %s13842_s0, %s7983_s28 }
  0x13   : > { %v295_v0 = vld [vmem:[%s10294_s10] sm:$0xff]  ;;  %v297_v1 = vld [vmem:[%s10294_s10 + $0x8] sm:$0xff]  ;;  %v299_v2 = vld [vmem:[%s10294_s10 + $0x10] sm:$0xff] }
  0x14   : > { %296 = vst [vmem:[#allocation2] sm:$0xff] %v295_v0  ;;  %298 = vst [vmem:[#allocation2 + $0x8] sm:$0xff] %v297_v1  ;;  %v301_v3 = vld [vmem:[%s10294_s10 + $0x18] sm:$0xff]  ;;  %v303_v4 = vld [vmem:[%s10294_s10 + $0x20] sm:$0xff] }
  0x15   : > { %300 = vst [vmem:[#allocation2 + $0x10] sm:$0xff] %v299_v2  ;;  %v305_v5 = vld [vmem:[%s10294_s10 + $0x28] sm:$0xff]  ;;  %302 = vst [vmem:[#allocation2 + $0x18] sm:$0xff] %v301_v3  ;;  %v307_v6 = vld [vmem:[%s10294_s10 + $0x30] sm:$0xff] }
  0x16   : > { %304 = vst [vmem:[#allocation2 + $0x20] sm:$0xff] %v303_v4  ;;  %306 = vst [vmem:[#allocation2 + $0x28] sm:$0xff] %v305_v5  ;;  %v309_v7 = vld [vmem:[%s10294_s10 + $0x38] sm:$0xff]  ;;  %v311_v8 = vld [vmem:[%s10294_s10 + $0x40] sm:$0xff] }
  0x17   : > { %308 = vst [vmem:[#allocation2 + $0x30] sm:$0xff] %v307_v6  ;;  %310 = vst [vmem:[#allocation2 + $0x38] sm:$0xff] %v309_v7  ;;  %v313_v9 = vld [vmem:[%s10294_s10 + $0x48] sm:$0xff]  ;;  %v315_v10 = vld [vmem:[%s10294_s10 + $0x50] sm:$0xff] }
  0x18   : > { %312 = vst [vmem:[#allocation2 + $0x40] sm:$0xff] %v311_v8  ;;  %v317_v11 = vld [vmem:[%s10294_s10 + $0x58] sm:$0xff]  ;;  %314 = vst [vmem:[#allocation2 + $0x48] sm:$0xff] %v313_v9  ;;  %v319_v12 = vld [vmem:[%s10294_s10 + $0x60] sm:$0xff] }
  0x19   : > { %316 = vst [vmem:[#allocation2 + $0x50] sm:$0xff] %v315_v10  ;;  %318 = vst [vmem:[#allocation2 + $0x58] sm:$0xff] %v317_v11  ;;  %v321_v13 = vld [vmem:[%s10294_s10 + $0x68] sm:$0xff]  ;;  %v323_v14 = vld [vmem:[%s10294_s10 + $0x70] sm:$0xff] }
  0x1a   : > { %320 = vst [vmem:[#allocation2 + $0x60] sm:$0xff] %v319_v12  ;;  %322 = vst [vmem:[#allocation2 + $0x68] sm:$0xff] %v321_v13  ;;  %v325_v15 = vld [vmem:[%s10294_s10 + $0x78] sm:$0xff]  ;;  %v327_v16 = vld [vmem:[%s10294_s10 + $0x80] sm:$0xff] }
  0x1b   : > { %324 = vst [vmem:[#allocation2 + $0x70] sm:$0xff] %v323_v14  ;;  %v329_v17 = vld [vmem:[%s10294_s10 + $0x88] sm:$0xff]  ;;  %326 = vst [vmem:[#allocation2 + $0x78] sm:$0xff] %v325_v15  ;;  %v331_v18 = vld [vmem:[%s10294_s10 + $0x90] sm:$0xff] }
  0x1c   : > { %328 = vst [vmem:[#allocation2 + $0x80] sm:$0xff] %v327_v16  ;;  %330 = vst [vmem:[#allocation2 + $0x88] sm:$0xff] %v329_v17  ;;  %v333_v19 = vld [vmem:[%s10294_s10 + $0x98] sm:$0xff]  ;;  %v335_v20 = vld [vmem:[%s10294_s10 + $0xa0] sm:$0xff] }
  0x1d   : > { %332 = vst [vmem:[#allocation2 + $0x90] sm:$0xff] %v331_v18  ;;  %334 = vst [vmem:[#allocation2 + $0x98] sm:$0xff] %v333_v19  ;;  %v337_v21 = vld [vmem:[%s10294_s10 + $0xa8] sm:$0xff]  ;;  %v339_v22 = vld [vmem:[%s10294_s10 + $0xb0] sm:$0xff] }
  0x1e   : > { %336 = vst [vmem:[#allocation2 + $0xa0] sm:$0xff] %v335_v20  ;;  %v341_v23 = vld [vmem:[%s10294_s10 + $0xb8] sm:$0xff]  ;;  %338 = vst [vmem:[#allocation2 + $0xa8] sm:$0xff] %v337_v21  ;;  %v343_v24 = vld [vmem:[%s10294_s10 + $0xc0] sm:$0xff] }
  0x1f   : > { %340 = vst [vmem:[#allocation2 + $0xb0] sm:$0xff] %v339_v22  ;;  %342 = vst [vmem:[#allocation2 + $0xb8] sm:$0xff] %v341_v23  ;;  %v345_v25 = vld [vmem:[%s10294_s10 + $0xc8] sm:$0xff]  ;;  %v347_v26 = vld [vmem:[%s10294_s10 + $0xd0] sm:$0xff] }
  0x20   : > { %344 = vst [vmem:[#allocation2 + $0xc0] sm:$0xff] %v343_v24  ;;  %346 = vst [vmem:[#allocation2 + $0xc8] sm:$0xff] %v345_v25  ;;  %v349_v27 = vld [vmem:[%s10294_s10 + $0xd8] sm:$0xff]  ;;  %v351_v28 = vld [vmem:[%s10294_s10 + $0xe0] sm:$0xff] }
  0x21   : > { %348 = vst [vmem:[#allocation2 + $0xd0] sm:$0xff] %v347_v26  ;;  %v353_v29 = vld [vmem:[%s10294_s10 + $0xe8] sm:$0xff]  ;;  %350 = vst [vmem:[#allocation2 + $0xd8] sm:$0xff] %v349_v27  ;;  %v355_v30 = vld [vmem:[%s10294_s10 + $0xf0] sm:$0xff] }
  0x22   : > { %352 = vst [vmem:[#allocation2 + $0xe0] sm:$0xff] %v351_v28  ;;  %354 = vst [vmem:[#allocation2 + $0xe8] sm:$0xff] %v353_v29  ;;  %v357_v31 = vld [vmem:[%s10294_s10 + $0xf8] sm:$0xff]  ;;  %v359_v32 = vld [vmem:[%s10294_s10 + $0x100] sm:$0xff] }
  0x23   : > { %356 = vst [vmem:[#allocation2 + $0xf0] sm:$0xff] %v355_v30  ;;  %358 = vst [vmem:[#allocation2 + $0xf8] sm:$0xff] %v357_v31  ;;  %v361_v33 = vld [vmem:[%s10294_s10 + $0x108] sm:$0xff]  ;;  %v363_v34 = vld [vmem:[%s10294_s10 + $0x110] sm:$0xff] }
  0x24   : > { %360 = vst [vmem:[#allocation2 + $0x100] sm:$0xff] %v359_v32  ;;  %v365_v35 = vld [vmem:[%s10294_s10 + $0x118] sm:$0xff]  ;;  %362 = vst [vmem:[#allocation2 + $0x108] sm:$0xff] %v361_v33  ;;  %v367_v36 = vld [vmem:[%s10294_s10 + $0x120] sm:$0xff] }
  0x25   : > { %364 = vst [vmem:[#allocation2 + $0x110] sm:$0xff] %v363_v34  ;;  %366 = vst [vmem:[#allocation2 + $0x118] sm:$0xff] %v365_v35 }
  0x26   : > { %368 = vst [vmem:[#allocation2 + $0x120] sm:$0xff] %v367_v36 }
  0x27   : > { %378 = vsyncadd [#allocation3], 4864 }
  0x28   : > { %10216 = dma.done.wait [#allocation3], 4864 }
  0x29   : > { %10217 = vsyncadd [#allocation3], 4294962432  ;;  %v9980_v37 = vld [vmem:[%s13843_s1] sm:$0xff]   ;;  %v9982_v39 = vld [vmem:[%s13843_s1 + $0x8] sm:$0xff]   ;;  %vm2122_vm0 = vsmask.f32 7424 }
  0x2a   : > { %v9981_v38 = vld [vmem:[%s13843_s1 + $0x100] sm:$0xff]   ;;  %8641 = vmatprep.subr.bf16.mxu1 %v9980_v37  ;;  %v9983_v40 = vld [vmem:[%s13843_s1 + $0x108] sm:$0xff]   ;;  %v9984_v41 = vld [vmem:[%s13843_s1 + $0x10] sm:$0xff]   ;;  %vm4159_vm1 = vcmask 1046528   ;;  %s10230_s15 = smov 126   ;;  %s10231_s18 = smov 2  }
  0x2b   : > { %8961 = vmatprep.subr.bf16.mxu0 %v9981_v38  ;;  %8642 = vmatpush3.bf16.msra.mxu1 %v9980_v37  ;;  %v9985_v42 = vld [vmem:[%s13843_s1 + $0x110] sm:$0xff]   ;;  %v9986_v43 = vld [vmem:[%s13843_s1 + $0x18] sm:$0xff]   ;;  %v9988_v45 = vld [vmem:[%s13843_s1 + $0x20] sm:$0xff]   ;;  %s10232_s21 = smov 12  }
  0x2c   : > { %8962 = vmatpush3.bf16.msra.mxu0 %v9981_v38  ;;  %8643 = vmatprep.subr.bf16.mxu1 %v9982_v39  ;;  %v9987_v44 = vld [vmem:[%s13843_s1 + $0x118] sm:$0xff]   ;;  %v9989_v46 = vld [vmem:[%s13843_s1 + $0x120] sm:$0xff]   ;;  %v9990_v47 = vld [vmem:[%s13843_s1 + $0x28] sm:$0xff]  }
  0x2d   : > { %8963 = vmatprep.subr.bf16.mxu0 %v9983_v40  ;;  %v523_v48 = vld [vmem:[#allocation2] sm:$0xff]  ;;  %v10366_v49 = vld [vmem:[#allocation2 + $0x10] sm:$0xff]  ;;  %v10368_v50 = vld [vmem:[#allocation2 + $0x18] sm:$0xff] }
  0x2e   : > { %v9991_v51 = vld [vmem:[%s13843_s1 + $0x128] sm:$0xff]   ;;  %8657 = vmatprep.mubr.bf16.mxu1 %v523_v48  ;;  %v2139_v52 = vshll.u32 %v10366_v49, 16  ;;  %v2143_v53 = vshrl.u32 %v10366_v49, 16  ;;  %v2147_v54 = vshll.u32 %v10368_v50, 16  ;;  %v9992_v57 = vld [vmem:[%s13843_s1 + $0x30] sm:$0xff]   ;;  %v10381_v58 = vld [vmem:[#allocation2 + $0x20] sm:$0xff] }
  0x2f   : > { %8644 = vmatpush3.bf16.msra.mxu1 %v9982_v39  ;;  %v9993_v59 = vld [vmem:[%s13843_s1 + $0x130] sm:$0xff]   ;;  %v10387_v61 = vld [vmem:[#allocation2 + $0x28] sm:$0xff]  ;;  %v2155_v63 = vshll.u32 %v10381_v58, 16  ;;  %v9994_v0 = vld [vmem:[%s13843_s1 + $0x38] sm:$0xff]   ;;  %v2151_v1 = vshrl.u32 %v10368_v50, 16  ;;  %v2159_v3 = vshrl.u32 %v10381_v58, 16 }
  0x30   : > { %8964 = vmatpush3.bf16.msra.mxu0 %v9983_v40  ;;  %8645 = vmatprep.subr.bf16.mxu1 %v9984_v41  ;;  %v10376_v55 = vrot.slane %v2139_v52, 1  ;;  %v2149_v56 = vrot.slane %v2147_v54, 1  ;;  %v9995_v2 = vld [vmem:[%s13843_s1 + $0x138] sm:$0xff]   ;;  %v2163_v4 = vshll.u32 %v10387_v61, 16  ;;  %v10403_v7 = vld [vmem:[#allocation2 + $0x30] sm:$0xff]  ;;  %v9996_v8 = vld [vmem:[%s13843_s1 + $0x1c0] sm:$0xff]  }
  0x31   : > { %8965 = vmatprep.subr.bf16.mxu0 %v9985_v42  ;;  %v2157_v5 = vrot.slane %v2155_v63, 1  ;;  %v10408_v11 = vld [vmem:[#allocation2 + $0x38] sm:$0xff]  ;;  %v524_v12 = vld [vmem:[#allocation2 + $0x8] sm:$0xff]  ;;  %v2171_v13 = vshll.u32 %v10403_v7, 16  ;;  %v2167_v15 = vshrl.u32 %v10387_v61, 16  ;;  %v2175_v17 = vshrl.u32 %v10403_v7, 16 }
  0x32   : > { %14051 = vst [vmem:[#allocation8_spill] sm:$0xff] %v10376_v55  ;;  %v2145_v60 = vor.u32 %v2143_v53, %v10376_v55  ;;  %v2153_v6 = vor.u32 %v2151_v1, %v2149_v56  ;;  %v2165_v10 = vrot.slane %v2163_v4, 1  ;;  %v2179_v18 = vshll.u32 %v10408_v11, 16  ;;  %v9997_v19 = vld [vmem:[%s13843_s1 + $0x1c8] sm:$0xff]   ;;  %v10002_v20 = vld [vmem:[%s13843_s1 + $0xc0] sm:$0xff]   ;;  %v9998_v27 = vld [vmem:[%s13843_s1 + $0x1d0] sm:$0xff]  }
  0x33   : > { %8646 = vmatpush3.bf16.msra.mxu1 %v9984_v41  ;;  %v2161_v9 = vor.u32 %v2159_v3, %v2157_v5  ;;  %v2173_v21 = vrot.slane %v2171_v13, 1  ;;  %v10004_v22 = vld [vmem:[%s13843_s1 + $0xc8] sm:$0xff]   ;;  %v10432_v24 = vld [vmem:[#allocation2 + $0x40] sm:$0xff]  ;;  %v2183_v31 = vshrl.u32 %v10408_v11, 16  ;;  %v9999_v35 = vld [vmem:[%s13843_s1 + $0x1d8] sm:$0xff]  }
  0x34   : > { %8966 = vmatpush3.bf16.msra.mxu0 %v9985_v42  ;;  %8647 = vmatprep.subr.bf16.mxu1 %v9986_v43  ;;  %v10390_v62 = vsel %vm2122_vm0, %v2145_v60, %v2149_v56  ;;  %v10412_v14 = vsel %vm2122_vm0, %v2153_v6, %v2157_v5  ;;  %v2169_v23 = vor.u32 %v2167_v15, %v2165_v10  ;;  %v2181_v26 = vrot.slane %v2179_v18, 1  ;;  %v10437_v28 = vld [vmem:[#allocation2 + $0x48] sm:$0xff]  ;;  %v10453_v36 = vld [vmem:[#allocation2 + $0x50] sm:$0xff]  ;;  %v10461_v40 = vld [vmem:[#allocation2 + $0x58] sm:$0xff] }
  0x35   : > { %8967 = vmatprep.subr.bf16.mxu0 %v9987_v44  ;;  %14052 = vst [vmem:[#allocation9_spill] sm:$0xff] %v10390_v62  ;;  %8977 = vmatprep.mubr.bf16.mxu0 %v10390_v62  ;;  %14053 = vst [vmem:[#allocation10_spill] sm:$0xff] %v10412_v14  ;;  %v10416_v16 = vsel %vm2122_vm0, %v2161_v9, %v2165_v10  ;;  %v2177_v25 = vor.u32 %v2175_v17, %v2173_v21  ;;  %v2187_v29 = vshll.u32 %v10432_v24, 16  ;;  %v10005_v37 = vld [vmem:[%s13843_s1 + $0xd0] sm:$0xff]   ;;  %v10463_v41 = vld [vmem:[#allocation2 + $0x60] sm:$0xff] }
  0x36   : > { %v10441_v30 = vsel %vm2122_vm0, %v2169_v23, %v2173_v21  ;;  %v2191_v32 = vshrl.u32 %v10432_v24, 16  ;;  %v2195_v34 = vshll.u32 %v10437_v28, 16  ;;  %v2185_v39 = vor.u32 %v2183_v31, %v2181_v26  ;;  %v10476_v52 = vld [vmem:[#allocation2 + $0x70] sm:$0xff]  ;;  %v10478_v53 = vld [vmem:[#allocation2 + $0x78] sm:$0xff]  ;;  %v10486_v60 = vld [vmem:[#allocation2 + $0x80] sm:$0xff] }
  0x37   : > { %8648 = vmatpush3.bf16.msra.mxu1 %v9986_v43  ;;  %v10446_v33 = vsel %vm2122_vm0, %v2177_v25, %v2181_v26  ;;  %v2189_v38 = vrot.slane %v2187_v29, 1  ;;  %v2199_v48 = vshrl.u32 %v10437_v28, 16  ;;  %v2211_v56 = vshll.u32 %v10461_v40, 16  ;;  %v10001_v1 = vld [vmem:[%s13843_s1 + $0x1e8] sm:$0xff]   ;;  %v10007_v5 = vld [vmem:[%s13843_s1 + $0xe0] sm:$0xff]   ;;  %v10509_v18 = vld [vmem:[#allocation2 + $0x90] sm:$0xff] }
  0x38   : > { %8968 = vmatpush3.bf16.msra.mxu0 %v9987_v44  ;;  %8649 = vmatprep.subr.bf16.mxu1 %v9988_v45  ;;  %v2197_v43 = vrot.slane %v2195_v34, 1  ;;  %v2203_v44 = vshll.u32 %v10453_v36, 16  ;;  %v2223_v3 = vshrl.u32 %v10463_v41, 16  ;;  %v2235_v4 = vshll.u32 %v10476_v52, 16  ;;  %v10505_v10 = vld [vmem:[#allocation2 + $0x88] sm:$0xff]  ;;  %v10003_v21 = vld [vmem:[%s13843_s1 + $0x1f0] sm:$0xff]  }
  0x39   : > { %8969 = vmatprep.subr.bf16.mxu0 %v9989_v46  ;;  %v2193_v42 = vor.u32 %v2191_v32, %v2189_v38  ;;  %v10481_v54 = vsel %vm2122_vm0, %v2185_v39, %v2189_v38  ;;  %v2251_v9 = vshll.u32 %v10486_v60, 16  ;;  %v10009_v23 = vld [vmem:[%s13843_s1 + $0xe8] sm:$0xff]   ;;  %v2247_v26 = vshrl.u32 %v10478_v53, 16  ;;  %v10008_v38 = vld [vmem:[%s13843_s1 + $0x1f8] sm:$0xff]  }
  0x3a   : > { %v2201_v6 = vor.u32 %v2199_v48, %v2197_v43  ;;  %v2255_v29 = vshrl.u32 %v10486_v60, 16  ;;  %v2259_v32 = vshll.u32 %v10505_v10, 16  ;;  %v2263_v34 = vshrl.u32 %v10505_v10, 16  ;;  %v10548_v48 = vld [vmem:[#allocation2 + $0x98] sm:$0xff] }
  0x3b   : > { %8650 = vmatpush3.bf16.msra.mxu1 %v9988_v45  ;;  %v10466_v45 = vld [vmem:[#allocation2 + $0x68] sm:$0xff]  ;;  %v10489_v63 = vsel %vm2122_vm0, %v2193_v42, %v2197_v43  ;;  %v2271_v39 = vshrl.u32 %v10509_v18, 16  ;;  %v10010_v42 = vld [vmem:[%s13843_s1 + $0xf0] sm:$0xff]   ;;  %v10542_v43 = vld [vmem:[%s13843_s1 + $0x80] sm:$0xff]  }
  0x3c   : > { %8970 = vmatpush3.bf16.msra.mxu0 %v9989_v46  ;;  %8651 = vmatprep.subr.bf16.mxu1 %v9990_v47  ;;  %v10000_v46 = vld [vmem:[%s13843_s1 + $0x1e0] sm:$0xff]   ;;  %v2231_v17 = vshrl.u32 %v10466_v45, 16 }
  0x3d   : > { %8971 = vmatprep.subr.bf16.mxu0 %v9991_v51 }
  0x3f   : > { %8652 = vmatpush3.bf16.msra.mxu1 %v9990_v47  ;;  %v10006_v47 = vld [vmem:[%s13843_s1 + $0xd8] sm:$0xff]  }
  0x40   : > { %8972 = vmatpush3.bf16.msra.mxu0 %v9991_v51  ;;  %8653 = vmatprep.subr.bf16.mxu1 %v9992_v57  ;;  %v2207_v51 = vshrl.u32 %v10453_v36, 16 }
  0x41   : > { %8973 = vmatprep.subr.bf16.mxu0 %v9993_v59 }
  0x43   : > { %8654 = vmatpush3.bf16.msra.mxu1 %v9992_v57  ;;  %v2219_v57 = vshll.u32 %v10463_v41, 16 }
  0x44   : > { %8974 = vmatpush3.bf16.msra.mxu0 %v9993_v59  ;;  %8655 = vmatprep.subr.bf16.mxu1 %v9994_v0  ;;  %v2227_v59 = vshll.u32 %v10466_v45, 16 }
  0x45   : > { %8975 = vmatprep.subr.bf16.mxu0 %v9995_v2  ;;  %v2221_v13 = vrot.slane %v2219_v57, 1  ;;  %v2261_v57 = vrot.slane %v2259_v32, 1  ;;  %v10600_v32 = vld [vmem:[#allocation2 + $0xb0] sm:$0xff] }
  0x46   : > { %v2229_v15 = vrot.slane %v2227_v59, 1  ;;  %v2275_v59 = vshll.u32 %v10548_v48, 16  ;;  %14054 = vst [vmem:[#allocation11_spill] sm:$0xff] %v10600_v32 }
  0x47   : > { %8656 = vmatpush3.bf16.msra.mxu1 %v9994_v0  ;;  %v2205_v0 = vrot.slane %v2203_v44, 1 }
  0x48   : > { %8976 = vmatpush3.bf16.msra.mxu0 %v9995_v2  ;;  %8721 = vmatprep.subr.bf16.mxu1 %v10002_v20  ;;  %v2215_v2 = vshrl.u32 %v10461_v40, 16 }
  0x49   : > { %9041 = vmatprep.subr.bf16.mxu0 %v9996_v8  ;;  %v10521_v31 = vsel %vm2122_vm0, %v2201_v6, %v2205_v0 }
  0x4a   : > { %8658 = vmatmul.mubr.bf16.vlgmr.msra.gmra.mrb[0].mxu1 %v524_v12  ;;  %v2213_v12 = vrot.slane %v2211_v56, 1 }
  0x4b   : > { %8978 = vmatmul.mubr.bf16.vlgmr.msra.gmra.mrb[0].mxu0 %v10412_v14  ;;  %8661 = vmatprep.mubr.bf16.mxu1 %v10366_v49 }
  0x4c   : > { %9042 = vmatpush3.bf16.msra.mxu0 %v9996_v8  ;;  %8981 = vmatprep.mubr.bf16.mxu0 %v10416_v16  ;;  %v2243_v8 = vshll.u32 %v10478_v53, 16  ;;  %v2217_v44 = vor.u32 %v2215_v2, %v2213_v12 }
  0x4d   : > { %9043 = vmatprep.subr.bf16.mxu0 %v9997_v19  ;;  %8722 = vmatpush3.bf16.msra.mxu1 %v10002_v20  ;;  %v2239_v20 = vshrl.u32 %v10476_v52, 16 }
  0x4e   : > { %8723 = vmatprep.subr.bf16.mxu1 %v10004_v22  ;;  %v2245_v25 = vrot.slane %v2243_v8, 1 }
  0x50   : > { %9044 = vmatpush3.bf16.msra.mxu0 %v9997_v19  ;;  %v2209_v19 = vor.u32 %v2207_v51, %v2205_v0  ;;  %v10551_v51 = vsel %vm2122_vm0, %v2217_v44, %v2221_v13  ;;  %v2233_v0 = vor.u32 %v2231_v17, %v2229_v15 }
  0x51   : > { %9045 = vmatprep.subr.bf16.mxu0 %v9998_v27  ;;  %8724 = vmatpush3.bf16.msra.mxu1 %v10004_v22  ;;  %v2237_v22 = vrot.slane %v2235_v4, 1  ;;  %v2249_v4 = vor.u32 %v2247_v26, %v2245_v25 }
  0x52   : > { %8662 = vmatmul.mubr.bf16.gmra.mrb[4].mxu1 %v10368_v50  ;;  %8725 = vmatprep.subr.bf16.mxu1 %v10005_v37 }
  0x53   : > { %8982 = vmatmul.mubr.bf16.gmra.mrb[4].mxu0 %v10441_v30  ;;  %8665 = vmatprep.mubr.bf16.mxu1 %v10381_v58  ;;  %v10563_v2 = vsel %vm2122_vm0, %v2233_v0, %v2237_v22 }
  0x54   : > { %8985 = vmatprep.mubr.bf16.mxu0 %v10446_v33  ;;  %9046 = vmatpush3.bf16.msra.mxu0 %v9998_v27  ;;  %v2253_v27 = vrot.slane %v2251_v9, 1  ;;  %v10579_v9 = vld [vmem:[#allocation2 + $0xa0] sm:$0xff] }
  0x55   : > { %9047 = vmatprep.subr.bf16.mxu0 %v9999_v35  ;;  %8726 = vmatpush3.bf16.msra.mxu1 %v10005_v37  ;;  %v2267_v37 = vshll.u32 %v10509_v18, 16 }
  0x56   : > { %8727 = vmatprep.subr.bf16.mxu1 %v10006_v47  ;;  %v10573_v6 = vsel %vm2122_vm0, %v2249_v4, %v2253_v27 }
  0x58   : > { %9048 = vmatpush3.bf16.msra.mxu0 %v9999_v35  ;;  %v10526_v35 = vsel %vm2122_vm0, %v2209_v19, %v2213_v12  ;;  %v2269_v12 = vrot.slane %v2267_v37, 1  ;;  %v10584_v19 = vld [vmem:[#allocation2 + $0xa8] sm:$0xff] }
  0x59   : > { %9049 = vmatprep.subr.bf16.mxu0 %v10000_v46  ;;  %8728 = vmatpush3.bf16.msra.mxu1 %v10006_v47  ;;  %v2225_v47 = vor.u32 %v2223_v3, %v2221_v13  ;;  %v2277_v13 = vrot.slane %v2275_v59, 1  ;;  %v2291_v26 = vshll.u32 %v10584_v19, 16  ;;  %v2295_v44 = vshrl.u32 %v10584_v19, 16 }
  0x5a   : > { %8666 = vmatmul.mubr.bf16.gmra.mrb[8].mxu1 %v10387_v61  ;;  %8729 = vmatprep.subr.bf16.mxu1 %v10007_v5  ;;  %v2273_v17 = vor.u32 %v2271_v39, %v2269_v12  ;;  %v2299_v39 = vshll.u32 %v10600_v32, 16 }
  0x5b   : > { %8986 = vmatmul.mubr.bf16.gmra.mrb[8].mxu0 %v10481_v54  ;;  %8669 = vmatprep.mubr.bf16.mxu1 %v10403_v7  ;;  %v10554_v56 = vsel %vm2122_vm0, %v2225_v47, %v2229_v15  ;;  %v2265_v15 = vor.u32 %v2263_v34, %v2261_v57  ;;  %v2293_v37 = vrot.slane %v2291_v26, 1  ;;  %v2303_v47 = vshrl.u32 %v10600_v32, 16 }
  0x5c   : > { %8989 = vmatprep.mubr.bf16.mxu0 %v10489_v63  ;;  %9050 = vmatpush3.bf16.msra.mxu0 %v10000_v46  ;;  %v10011_v46 = vld [vmem:[%s13843_s1 + $0xf8] sm:$0xff]   ;;  %v2301_v59 = vrot.slane %v2299_v39, 1 }
  0x5d   : > { %9051 = vmatprep.subr.bf16.mxu0 %v10001_v1  ;;  %8730 = vmatpush3.bf16.msra.mxu1 %v10007_v5  ;;  %v2257_v5 = vor.u32 %v2255_v29, %v2253_v27  ;;  %v2297_v0 = vor.u32 %v2295_v44, %v2293_v37  ;;  %v10638_v39 = vld [vmem:[#allocation2 + $0xd8] sm:$0xff] }
  0x5e   : > { %8731 = vmatprep.subr.bf16.mxu1 %v10009_v23  ;;  %v2305_v4 = vor.u32 %v2303_v47, %v2301_v59  ;;  %14058 = vst [vmem:[#allocation15_spill] sm:$0xff] %v10638_v39  ;;  %v2343_v14 = vshrl.u32 %v10638_v39, 16 }
  0x5f   : > { %v10576_v8 = vsel %vm2122_vm0, %v2257_v5, %v2261_v57 }
  0x60   : > { %9052 = vmatpush3.bf16.msra.mxu0 %v10001_v1  ;;  %v2241_v1 = vor.u32 %v2239_v20, %v2237_v22  ;;  %v2283_v20 = vshll.u32 %v10579_v9, 16  ;;  %v2279_v22 = vshrl.u32 %v10548_v48, 16 }
  0x61   : > { %9053 = vmatprep.subr.bf16.mxu0 %v10003_v21  ;;  %8732 = vmatpush3.bf16.msra.mxu1 %v10009_v23  ;;  %v10592_v23 = vsel %vm2122_vm0, %v2273_v17, %v2277_v13 }
  0x62   : > { %8670 = vmatmul.mubr.bf16.gmra.mrb[12].mxu1 %v10408_v11  ;;  %8733 = vmatprep.subr.bf16.mxu1 %v10010_v42  ;;  %v10566_v3 = vsel %vm2122_vm0, %v2241_v1, %v2245_v25  ;;  %v2287_v25 = vshrl.u32 %v10579_v9, 16  ;;  %v2285_v27 = vrot.slane %v2283_v20, 1  ;;  %v2281_v29 = vor.u32 %v2279_v22, %v2277_v13  ;;  %v10618_v1 = vld [vmem:[#allocation2 + $0xc0] sm:$0xff] }
  0x63   : > { %8990 = vmatmul.mubr.bf16.gmra.mrb[12].mxu0 %v10521_v31  ;;  %8673 = vmatprep.mubr.bf16.mxu1 %v10432_v24  ;;  %14056 = vst [vmem:[#allocation13_spill] sm:$0xff] %v10618_v1  ;;  %v2315_v13 = vshll.u32 %v10618_v1, 16  ;;  %v2319_v22 = vshrl.u32 %v10618_v1, 16 }
  0x64   : > { %8993 = vmatprep.mubr.bf16.mxu0 %v10526_v35  ;;  %9054 = vmatpush3.bf16.msra.mxu0 %v10003_v21  ;;  %v10588_v21 = vsel %vm2122_vm0, %v2265_v15, %v2269_v12  ;;  %v2289_v34 = vor.u32 %v2287_v25, %v2285_v27  ;;  %v10620_v12 = vld [vmem:[#allocation2 + $0xc8] sm:$0xff]  ;;  %v10624_v15 = vsel %vm2122_vm0, %v2297_v0, %v2301_v59 }
  0x65   : > { %9055 = vmatprep.subr.bf16.mxu0 %v10008_v38  ;;  %8734 = vmatpush3.bf16.msra.mxu1 %v10010_v42  ;;  %v10606_v42 = vsel %vm2122_vm0, %v2281_v29, %v2285_v27  ;;  %v2323_v25 = vshll.u32 %v10620_v12, 16  ;;  %v2317_v26 = vrot.slane %v2315_v13, 1  ;;  %v10636_v29 = vld [vmem:[#allocation2 + $0xd0] sm:$0xff] }
  0x66   : > { %8735 = vmatprep.subr.bf16.mxu1 %v10011_v46  ;;  %14057 = vst [vmem:[#allocation14_spill] sm:$0xff] %v10636_v29  ;;  %v2331_v44 = vshll.u32 %v10636_v29, 16  ;;  %v2335_v0 = vshrl.u32 %v10636_v29, 16 }
  0x68   : > { %9056 = vmatpush3.bf16.msra.mxu0 %v10008_v38  ;;  %v10602_v38 = vld [vmem:[#allocation2 + $0xb8] sm:$0xff] }
  0x69   : > { %9121 = vmatprep.subr.bf16.mxu0 %v10542_v43  ;;  %8736 = vmatpush3.bf16.msra.mxu1 %v10011_v46  ;;  %14055 = vst [vmem:[#allocation12_spill] sm:$0xff] %v10602_v38  ;;  %v10610_v46 = vsel %vm2122_vm0, %v2289_v34, %v2293_v37  ;;  %v2307_v57 = vshll.u32 %v10602_v38, 16  ;;  %v2311_v17 = vshrl.u32 %v10602_v38, 16  ;;  %v2321_v34 = vor.u32 %v2319_v22, %v2317_v26 }
  0x6a   : > { %8674 = vmatmul.mubr.bf16.gmra.mrb[16].mxu1 %v10437_v28  ;;  %v2325_v37 = vrot.slane %v2323_v25, 1 }
  0x6b   : > { %8994 = vmatmul.mubr.bf16.gmra.mrb[16].mxu0 %v10551_v51  ;;  %8677 = vmatprep.mubr.bf16.mxu1 %v10453_v36  ;;  %v2309_v5 = vrot.slane %v2307_v57, 1  ;;  %v2327_v57 = vshrl.u32 %v10620_v12, 16 }
  0x6c   : > { %8997 = vmatprep.mubr.bf16.mxu0 %v10554_v56  ;;  %v10646_v59 = vsel %vm2122_vm0, %v2321_v34, %v2325_v37 }
  0x6d   : > { %v10628_v20 = vsel %vm2122_vm0, %v2305_v4, %v2309_v5  ;;  %v2313_v27 = vor.u32 %v2311_v17, %v2309_v5  ;;  %14059 = vst [vmem:[#allocation16_spill] sm:$0xff] %v10646_v59  ;;  %v2339_v4 = vshll.u32 %v10638_v39, 16  ;;  %v2333_v5 = vrot.slane %v2331_v44, 1  ;;  %v10654_v17 = vld [vmem:[#allocation2 + $0xe0] sm:$0xff] }
  0x6e   : > { %v2329_v13 = vor.u32 %v2327_v57, %v2325_v37  ;;  %v2351_v44 = vshrl.u32 %v10654_v17, 16 }
  0x6f   : > { %v10642_v47 = vsel %vm2122_vm0, %v2313_v27, %v2317_v26  ;;  %v2337_v22 = vor.u32 %v2335_v0, %v2333_v5  ;;  %v2341_v25 = vrot.slane %v2339_v4, 1  ;;  %v10656_v26 = vld [vmem:[#allocation2 + $0xe8] sm:$0xff]  ;;  %v2347_v27 = vshll.u32 %v10654_v17, 16  ;;  %v10672_v4 = vld [vmem:[#allocation2 + $0xf0] sm:$0xff] }
  0x70   : > { %v10660_v34 = vsel %vm2122_vm0, %v2329_v13, %v2333_v5  ;;  %v2355_v37 = vshll.u32 %v10656_v26, 16  ;;  %v2363_v55 = vshll.u32 %v10672_v4, 16 }
  0x71   : > { %14060 = vst [vmem:[#allocation17_spill] sm:$0xff] %v10660_v34  ;;  %v10664_v62 = vsel %vm2122_vm0, %v2337_v22, %v2341_v25  ;;  %v2349_v57 = vrot.slane %v2347_v27, 1  ;;  %v2345_v0 = vor.u32 %v2343_v14, %v2341_v25  ;;  %v10674_v22 = vld [vmem:[#allocation2 + $0xf8] sm:$0xff]  ;;  %v2367_v27 = vshrl.u32 %v10672_v4, 16  ;;  %v10018_v25 = vld [vmem:[%s13843_s1 + $0x180] sm:$0xff]  }
  0x72   : > { %8678 = vmatmul.mubr.bf16.gmra.mrb[20].mxu1 %v10461_v40  ;;  %14061 = vst [vmem:[#allocation18_spill] sm:$0xff] %v10664_v62  ;;  %v2357_v13 = vrot.slane %v2355_v37, 1  ;;  %v2371_v14 = vshll.u32 %v10674_v22, 16  ;;  %8801 = vmatprep.subr.bf16.mxu1 %v10018_v25 }
  0x73   : > { %8998 = vmatmul.mubr.bf16.gmra.mrb[20].mxu0 %v10563_v2  ;;  %8681 = vmatprep.mubr.bf16.mxu1 %v10463_v41  ;;  %v2353_v5 = vor.u32 %v2351_v44, %v2349_v57  ;;  %v2365_v44 = vrot.slane %v2363_v55, 1 }
  0x74   : > { %9001 = vmatprep.mubr.bf16.mxu0 %v10566_v3 }
  0x7a   : > { %8682 = vmatmul.mubr.bf16.gmra.mrb[24].mxu1 %v10466_v45 }
  0x7b   : > { %9002 = vmatmul.mubr.bf16.gmra.mrb[24].mxu0 %v10573_v6  ;;  %8685 = vmatprep.mubr.bf16.mxu1 %v10476_v52 }
  0x7c   : > { %9005 = vmatprep.mubr.bf16.mxu0 %v10576_v8 }
  0x82   : > { %8686 = vmatmul.mubr.bf16.gmra.mrb[28].mxu1 %v10478_v53 }
  0x83   : > { %9006 = vmatmul.mubr.bf16.gmra.mrb[28].mxu0 %v10588_v21  ;;  %8689 = vmatprep.mubr.bf16.mxu1 %v10486_v60 }
  0x84   : > { %9009 = vmatprep.mubr.bf16.mxu0 %v10592_v23 }
  0x8a   : > { %8690 = vmatmul.mubr.bf16.gmra.mrb[32].mxu1 %v10505_v10 }
  0x8b   : > { %9010 = vmatmul.mubr.bf16.gmra.mrb[32].mxu0 %v10606_v42  ;;  %8693 = vmatprep.mubr.bf16.mxu1 %v10509_v18 }
  0x8c   : > { %9013 = vmatprep.mubr.bf16.mxu0 %v10610_v46 }
  0x92   : > { %8694 = vmatmul.mubr.bf16.gmra.mrb[36].mxu1 %v10548_v48 }
  0x93   : > { %9014 = vmatmul.mubr.bf16.gmra.mrb[36].mxu0 %v10624_v15  ;;  %8697 = vmatprep.mubr.bf16.mxu1 %v10579_v9 }
  0x94   : > { %9017 = vmatprep.mubr.bf16.mxu0 %v10628_v20 }
  0x9a   : > { %8698 = vmatmul.mubr.bf16.gmra.mrb[40].mxu1 %v10584_v19 }
  0x9b   : > { %9018 = vmatmul.mubr.bf16.gmra.mrb[40].mxu0 %v10642_v47  ;;  %8701 = vmatprep.mubr.bf16.mxu1 %v10600_v32 }
  0x9c   : > { %9021 = vmatprep.mubr.bf16.mxu0 %v10646_v59  ;;  %v10678_v59 = vsel %vm2122_vm0, %v2345_v0, %v2349_v57  ;;  %v10693_v57 = vld [vmem:[#allocation2 + $0x100] sm:$0xff]  ;;  %v2369_v0 = vor.u32 %v2367_v27, %v2365_v44 }
  0x9d   : > { %14062 = vst [vmem:[#allocation19_spill] sm:$0xff] %v10678_v59  ;;  %14064 = vst [vmem:[#allocation21_spill] sm:$0xff] %v10693_v57  ;;  %v2961_v55 = vshrl.u32 %v10693_v57, 16 }
  0xa2   : > { %8702 = vmatmul.mubr.bf16.gmra.mrb[44].mxu1 %v10602_v38  ;;  %v2359_v38 = vshrl.u32 %v10656_v26, 16 }
  0xa3   : > { %9022 = vmatmul.mubr.bf16.gmra.mrb[44].mxu0 %v10660_v34  ;;  %8705 = vmatprep.mubr.bf16.mxu1 %v10618_v1  ;;  %v10682_v34 = vsel %vm2122_vm0, %v2353_v5, %v2357_v13  ;;  %v2373_v5 = vrot.slane %v2371_v14, 1  ;;  %v2379_v1 = vshll.u32 %v10693_v57, 16 }
  0xa4   : > { %9025 = vmatprep.mubr.bf16.mxu0 %v10664_v62  ;;  %14063 = vst [vmem:[#allocation20_spill] sm:$0xff] %v10682_v34  ;;  %v2361_v37 = vor.u32 %v2359_v38, %v2357_v13  ;;  %v10695_v62 = vld [vmem:[#allocation2 + $0x108] sm:$0xff] }
  0xa5   : > { %v2965_v38 = vshll.u32 %v10695_v62, 16  ;;  %v2381_v13 = vrot.slane %v2379_v1, 1  ;;  %v2969_v57 = vshrl.u32 %v10695_v62, 16 }
  0xa6   : > { %v10699_v32 = vsel %vm2122_vm0, %v2361_v37, %v2365_v44  ;;  %v10711_v37 = vld [vmem:[#allocation2 + $0x110] sm:$0xff] }
  0xa7   : > { %14065 = vst [vmem:[#allocation22_spill] sm:$0xff] %v10699_v32  ;;  %v2963_v14 = vor.u32 %v2961_v55, %v2381_v13  ;;  %v2967_v44 = vrot.slane %v2965_v38, 1  ;;  %v10013_v55 = vld [vmem:[%s13843_s1 + $0x88] sm:$0xff]   ;;  %v10019_v38 = vld [vmem:[%s13843_s1 + $0xb0] sm:$0xff]  }
  0xa9   : > { %v2971_v1 = vor.u32 %v2969_v57, %v2967_v44  ;;  %v10025_v57 = vld [vmem:[%s13843_s1 + $0x1a8] sm:$0xff]  }
  0xaa   : > { %8706 = vmatmul.mubr.bf16.gmra.mrb[48].mxu1 %v10620_v12 }
  0xab   : > { %9026 = vmatmul.mubr.bf16.gmra.mrb[48].mxu0 %v10678_v59  ;;  %8709 = vmatprep.mubr.bf16.mxu1 %v10636_v29  ;;  %v2375_v59 = vshrl.u32 %v10674_v22, 16  ;;  %v10703_v29 = vsel %vm2122_vm0, %v2369_v0, %v2373_v5 }
  0xac   : > { %9029 = vmatprep.mubr.bf16.mxu0 %v10682_v34  ;;  %14066 = vst [vmem:[#allocation23_spill] sm:$0xff] %v10703_v29  ;;  %v2973_v34 = vshll.u32 %v10711_v37, 16 }
  0xad   : > { %v2377_v27 = vor.u32 %v2375_v59, %v2373_v5 }
  0xae   : > { %v10725_v59 = vrot.slane %v2973_v34, 1  ;;  %v10020_v34 = vld [vmem:[%s13843_s1 + $0x188] sm:$0xff]  }
  0xaf   : > { %v10714_v0 = vsel %vm2122_vm0, %v2377_v27, %v2381_v13  ;;  %v10027_v13 = vld [vmem:[%s13843_s1 + $0x1b8] sm:$0xff]   ;;  %v10797_v27 = vld [vmem:[%s13843_s1 + $0x140] sm:$0xff]  }
  0xb0   : > { %14067 = vst [vmem:[#allocation24_spill] sm:$0xff] %v10714_v0  ;;  %v10729_v5 = vsel %vm2122_vm0, %v2971_v1, %v10725_v59  ;;  %v3525_v1 = vshrl.u32 %v10711_v37, 16 }
  0xb2   : > { %8710 = vmatmul.mubr.bf16.gmra.mrb[52].mxu1 %v10638_v39  ;;  %v10719_v39 = vsel %vm2122_vm0, %v2963_v14, %v2967_v44  ;;  %v14077_v14 = vld [vmem:[#allocation15_spill] sm:$0xff] }
  0xb3   : > { %9030 = vmatmul.mubr.bf16.gmra.mrb[52].mxu0 %v10699_v32  ;;  %8713 = vmatprep.mubr.bf16.mxu1 %v10654_v17  ;;  %v10839_v44 = vld [vmem:[#allocation2 + $0x118] sm:$0xff] }
  0xb4   : > { %9033 = vmatprep.mubr.bf16.mxu0 %v10703_v29 }
  0xba   : > { %8714 = vmatmul.mubr.bf16.gmra.mrb[56].mxu1 %v10656_v26 }
  0xbb   : > { %9034 = vmatmul.mubr.bf16.gmra.mrb[56].mxu0 %v10714_v0  ;;  %8717 = vmatprep.mubr.bf16.mxu1 %v10672_v4 }
  0xbc   : > { %9037 = vmatprep.mubr.bf16.mxu0 %v10719_v39 }
  0xc2   : > { %8718 = vmatmul.mubr.bf16.gmra.mrb[60].mxu1 %v10674_v22 }
  0xc3   : > { %9038 = vmatmul.mubr.bf16.gmra.mrb[60].mxu0 %v10729_v5  ;;  %8737 = vmatprep.mubr.bf16.mxu1 %v10366_v49  ;;  %v10014_v49 = vld [vmem:[%s13843_s1 + $0x90] sm:$0xff]  }
  0xc4   : > { %9057 = vmatprep.mubr.bf16.mxu0 %v10416_v16 }
  0xca   : > { %8738 = vmatmul.mubr.bf16.vlgmr.msra.gmra.mrb[0].mxu1 %v10368_v50  ;;  %v10021_v50 = vld [vmem:[%s13843_s1 + $0x190] sm:$0xff]  }
  0xcb   : > { %9058 = vmatmul.mubr.bf16.vlgmr.msra.gmra.mrb[0].mxu0 %v10441_v30  ;;  %8741 = vmatprep.mubr.bf16.mxu1 %v10381_v58  ;;  %v10015_v58 = vld [vmem:[%s13843_s1 + $0x98] sm:$0xff]  }
  0xcc   : > { %9122 = vmatpush3.bf16.msra.mxu0 %v10542_v43  ;;  %9061 = vmatprep.mubr.bf16.mxu0 %v10446_v33  ;;  %v10022_v43 = vld [vmem:[%s13843_s1 + $0x198] sm:$0xff]  }
  0xcd   : > { %9123 = vmatprep.subr.bf16.mxu0 %v10013_v55  ;;  %8802 = vmatpush3.bf16.msra.mxu1 %v10018_v25  ;;  %v10016_v25 = vld [vmem:[%s13843_s1 + $0xa0] sm:$0xff]  }
  0xce   : > { %8803 = vmatprep.subr.bf16.mxu1 %v10020_v34 }
  0xd0   : > { %9124 = vmatpush3.bf16.msra.mxu0 %v10013_v55  ;;  %v3529_v55 = vshll.u32 %v10839_v44, 16 }
  0xd1   : > { %9125 = vmatprep.subr.bf16.mxu0 %v10014_v49  ;;  %8804 = vmatpush3.bf16.msra.mxu1 %v10020_v34  ;;  %v3527_v34 = vor.u32 %v3525_v1, %v10725_v59  ;;  %v4074_v1 = vld [vmem:[#allocation2 + $0x10] sm:$0xff] }
  0xd2   : > { %8742 = vmatmul.mubr.bf16.gmra.mrb[4].mxu1 %v10387_v61  ;;  %8805 = vmatprep.subr.bf16.mxu1 %v10021_v50  ;;  %v10023_v61 = vld [vmem:[%s13843_s1 + $0x1a0] sm:$0xff]  }
  0xd3   : > { %9062 = vmatmul.mubr.bf16.gmra.mrb[4].mxu0 %v10481_v54  ;;  %8745 = vmatprep.mubr.bf16.mxu1 %v10403_v7  ;;  %v10017_v7 = vld [vmem:[%s13843_s1 + $0xa8] sm:$0xff]  }
  0xd4   : > { %9065 = vmatprep.mubr.bf16.mxu0 %v10489_v63  ;;  %9126 = vmatpush3.bf16.msra.mxu0 %v10014_v49  ;;  %v3531_v49 = vrot.slane %v3529_v55, 1  ;;  %v4075_v55 = vld [vmem:[#allocation2 + $0x18] sm:$0xff] }
  0xd5   : > { %9127 = vmatprep.subr.bf16.mxu0 %v10015_v58  ;;  %8806 = vmatpush3.bf16.msra.mxu1 %v10021_v50  ;;  %v2104_v50 = vld [vmem:[#allocation2 + $0x120] sm:$0x1] }
  0xd6   : > { %8807 = vmatprep.subr.bf16.mxu1 %v10022_v43 }
  0xd8   : > { %9128 = vmatpush3.bf16.msra.mxu0 %v10015_v58  ;;  %v3533_v58 = vshrl.u32 %v10839_v44, 16 }
  0xd9   : > { %9129 = vmatprep.subr.bf16.mxu0 %v10016_v25  ;;  %8808 = vmatpush3.bf16.msra.mxu1 %v10022_v43  ;;  %v3537_v43 = vshll.u32 %v2104_v50, 16  ;;  %v4165_v50 = vrot.slane %v4075_v55, 1 }
  0xda   : > { %8746 = vmatmul.mubr.bf16.gmra.mrb[8].mxu1 %v10408_v11  ;;  %8809 = vmatprep.subr.bf16.mxu1 %v10023_v61  ;;  %v10026_v11 = vld [vmem:[%s13843_s1 + $0x1b0] sm:$0xff]  }
  0xdb   : > { %9066 = vmatmul.mubr.bf16.gmra.mrb[8].mxu0 %v10521_v31  ;;  %8749 = vmatprep.mubr.bf16.mxu1 %v10432_v24  ;;  %v10024_v24 = vld [vmem:[%s13843_s1 + $0xb8] sm:$0xff]  }
  0xdc   : > { %9069 = vmatprep.mubr.bf16.mxu0 %v10526_v35  ;;  %9130 = vmatpush3.bf16.msra.mxu0 %v10016_v25  ;;  %v3532_v25 = vsel %vm2122_vm0, %v3527_v34, %v3531_v49  ;;  %v10188_v34 = vld [vmem:[#allocation2 + $0x20] sm:$0xff] }
  0xdd   : > { %9131 = vmatprep.subr.bf16.mxu0 %v10017_v7  ;;  %8810 = vmatpush3.bf16.msra.mxu1 %v10023_v61  ;;  %v4072_v61 = vld [vmem:[#allocation2] sm:$0xfe] }
  0xde   : > { %8811 = vmatprep.subr.bf16.mxu1 %v10025_v57  ;;  %v4160_v59 = vrot.slane %v4072_v61, 1  ;;  %v10189_v61 = vld [vmem:[#allocation2 + $0x28] sm:$0xff] }
  0xe0   : > { %9132 = vmatpush3.bf16.msra.mxu0 %v10017_v7  ;;  %v10851_v7 = vld [vmem:[#allocation2 + $0x8] sm:$0xff] }
  0xe1   : > { %9133 = vmatprep.subr.bf16.mxu0 %v10019_v38  ;;  %8812 = vmatpush3.bf16.msra.mxu1 %v10025_v57  ;;  %v14078_v57 = vld [vmem:[#allocation21_spill] sm:$0xff] }
  0xe2   : > { %8750 = vmatmul.mubr.bf16.gmra.mrb[12].mxu1 %v10437_v28  ;;  %8813 = vmatprep.subr.bf16.mxu1 %v10026_v11  ;;  %v14068_v28 = vld [vmem:[#allocation11_spill] sm:$0xff] }
  0xe3   : > { %9070 = vmatmul.mubr.bf16.gmra.mrb[12].mxu0 %v10551_v51  ;;  %8753 = vmatprep.mubr.bf16.mxu1 %v10453_v36  ;;  %v14069_v36 = vld [vmem:[#allocation16_spill] sm:$0xff] }
  0xe4   : > { %9073 = vmatprep.mubr.bf16.mxu0 %v10554_v56  ;;  %9134 = vmatpush3.bf16.msra.mxu0 %v10019_v38  ;;  %v3539_v38 = vrot.slane %v3537_v43, 1  ;;  %v4076_v43 = vld [vmem:[#allocation2 + $0x20] sm:$0xff] }
  0xe5   : > { %9135 = vmatprep.subr.bf16.mxu0 %v10024_v24  ;;  %8814 = vmatpush3.bf16.msra.mxu1 %v10026_v11  ;;  %v4161_v11 = vrot.slane %v10851_v7, 1 }
  0xe6   : > { %8815 = vmatprep.subr.bf16.mxu1 %v10027_v13 }
  0xe8   : > { %9136 = vmatpush3.bf16.msra.mxu0 %v10024_v24 }
  0xe9   : > { %8816 = vmatpush3.bf16.msra.mxu1 %v10027_v13  ;;  %9201 = vmatprep.subr.bf16.mxu0 %v10797_v27  ;;  %v4162_v13 = vsel %vm4159_vm1, %v4160_v59, %v4161_v11  ;;  %v10190_v59 = vld [vmem:[#allocation2 + $0x30] sm:$0xff] }
  0xea   : > { %8754 = vmatmul.mubr.bf16.gmra.mrb[16].mxu1 %v10461_v40  ;;  %v14070_v40 = vld [vmem:[#allocation12_spill] sm:$0xff] }
  0xeb   : > { %9074 = vmatmul.mubr.bf16.gmra.mrb[16].mxu0 %v10563_v2  ;;  %8757 = vmatprep.mubr.bf16.mxu1 %v10463_v41  ;;  %v14071_v41 = vld [vmem:[#allocation17_spill] sm:$0xff] }
  0xec   : > { %9077 = vmatprep.mubr.bf16.mxu0 %v10566_v3 }
  0xf2   : > { %8758 = vmatmul.mubr.bf16.gmra.mrb[20].mxu1 %v10466_v45  ;;  %v14072_v45 = vld [vmem:[#allocation13_spill] sm:$0xff] }
  0xf3   : > { %9078 = vmatmul.mubr.bf16.gmra.mrb[20].mxu0 %v10573_v6  ;;  %8761 = vmatprep.mubr.bf16.mxu1 %v10476_v52  ;;  %v14073_v52 = vld [vmem:[#allocation18_spill] sm:$0xff] }
  0xf4   : > { %9081 = vmatprep.mubr.bf16.mxu0 %v10576_v8 }
  0xfa   : > { %8762 = vmatmul.mubr.bf16.gmra.mrb[24].mxu1 %v10478_v53  ;;  %v14074_v53 = vld [vmem:[#allocation19_spill] sm:$0xff] }
  0xfb   : > { %9082 = vmatmul.mubr.bf16.gmra.mrb[24].mxu0 %v10588_v21  ;;  %8765 = vmatprep.mubr.bf16.mxu1 %v10486_v60  ;;  %v14075_v60 = vld [vmem:[#allocation14_spill] sm:$0xff] }
  0xfc   : > { %9085 = vmatprep.mubr.bf16.mxu0 %v10592_v23 }
 0x102   : > { %8766 = vmatmul.mubr.bf16.gmra.mrb[28].mxu1 %v10505_v10  ;;  %v14076_v10 = vld [vmem:[#allocation20_spill] sm:$0xff] }
 0x103   : > { %9086 = vmatmul.mubr.bf16.gmra.mrb[28].mxu0 %v10606_v42  ;;  %8769 = vmatprep.mubr.bf16.mxu1 %v10509_v18  ;;  %v10034_v18 = vld [vmem:[%s13843_s1 + $0x40] sm:$0xff]  }
 0x104   : > { %9089 = vmatprep.mubr.bf16.mxu0 %v10610_v46  ;;  %8881 = vmatprep.subr.bf16.mxu1 %v10034_v18 }
 0x10a   : > { %8770 = vmatmul.mubr.bf16.gmra.mrb[32].mxu1 %v10548_v48 }
 0x10b   : > { %9090 = vmatmul.mubr.bf16.gmra.mrb[32].mxu0 %v10624_v15  ;;  %8773 = vmatprep.mubr.bf16.mxu1 %v10579_v9 }
 0x10c   : > { %9093 = vmatprep.mubr.bf16.mxu0 %v10628_v20 }
 0x112   : > { %8774 = vmatmul.mubr.bf16.gmra.mrb[36].mxu1 %v10584_v19 }
 0x113   : > { %9094 = vmatmul.mubr.bf16.gmra.mrb[36].mxu0 %v10642_v47  ;;  %8777 = vmatprep.mubr.bf16.mxu1 %v14068_v28 }
 0x114   : > { %9097 = vmatprep.mubr.bf16.mxu0 %v14069_v36 }
 0x11a   : > { %8778 = vmatmul.mubr.bf16.gmra.mrb[40].mxu1 %v14070_v40 }
 0x11b   : > { %9098 = vmatmul.mubr.bf16.gmra.mrb[40].mxu0 %v14071_v41  ;;  %8781 = vmatprep.mubr.bf16.mxu1 %v14072_v45 }
 0x11c   : > { %9101 = vmatprep.mubr.bf16.mxu0 %v14073_v52 }
 0x122   : > { %8782 = vmatmul.mubr.bf16.gmra.mrb[44].mxu1 %v10620_v12 }
 0x123   : > { %9102 = vmatmul.mubr.bf16.gmra.mrb[44].mxu0 %v14074_v53  ;;  %8785 = vmatprep.mubr.bf16.mxu1 %v14075_v60 }
 0x124   : > { %9105 = vmatprep.mubr.bf16.mxu0 %v14076_v10 }
 0x12a   : > { %8786 = vmatmul.mubr.bf16.gmra.mrb[48].mxu1 %v14077_v14 }
 0x12b   : > { %9106 = vmatmul.mubr.bf16.gmra.mrb[48].mxu0 %v10699_v32  ;;  %8789 = vmatprep.mubr.bf16.mxu1 %v10654_v17 }
 0x12c   : > { %9109 = vmatprep.mubr.bf16.mxu0 %v10703_v29 }
 0x132   : > { %8790 = vmatmul.mubr.bf16.gmra.mrb[52].mxu1 %v10656_v26 }
 0x133   : > { %9110 = vmatmul.mubr.bf16.gmra.mrb[52].mxu0 %v10714_v0  ;;  %8793 = vmatprep.mubr.bf16.mxu1 %v10672_v4 }
 0x134   : > { %9113 = vmatprep.mubr.bf16.mxu0 %v10719_v39  ;;  %v3535_v39 = vor.u32 %v3533_v58, %v3531_v49 }
 0x136   : > { %v3540_v24 = vsel %vm2122_vm0, %v3535_v39, %v3539_v38  ;;  %v4077_v39 = vld [vmem:[#allocation2 + $0x28] sm:$0xff] }
 0x137   : > { %v10036_v38 = vld [vmem:[%s13843_s1 + $0x48] sm:$0xff]  }
 0x13a   : > { %8794 = vmatmul.mubr.bf16.gmra.mrb[56].mxu1 %v10674_v22 }
 0x13b   : > { %9114 = vmatmul.mubr.bf16.gmra.mrb[56].mxu0 %v10729_v5  ;;  %8797 = vmatprep.mubr.bf16.mxu1 %v14078_v57  ;;  %v4163_v5 = vrot.slane %v4074_v1, 1  ;;  %v10037_v1 = vld [vmem:[%s13843_s1 + $0x50] sm:$0xff]  }
 0x13c   : > { %9117 = vmatprep.mubr.bf16.mxu0 %v3532_v25  ;;  %v10029_v25 = vld [vmem:[%s13843_s1 + $0x148] sm:$0xff]  }
 0x13d   : > { %v4164_v49 = vsel %vm4159_vm1, %v4161_v11, %v4163_v5  ;;  %v10861_v58 = vsel %vm4159_vm1, %v4163_v5, %v4165_v50  ;;  %v4167_v11 = vrot.slane %v4076_v43, 1  ;;  %v10031_v5 = vld [vmem:[%s13843_s1 + $0x158] sm:$0xff]   ;;  %v10192_v43 = vld [vmem:[#allocation2 + $0x40] sm:$0xff] }
 0x13f   : > { %v10878_v55 = vsel %vm4159_vm1, %v4165_v50, %v4167_v11  ;;  %v10038_v50 = vld [vmem:[%s13843_s1 + $0x58] sm:$0xff]  }
 0x142   : > { %8798 = vmatmul.mubr.bf16.gmra.mrb[60].mxu1 %v10695_v62 }
 0x143   : > { %9118 = vmatmul.mubr.bf16.gmra.mrb[60].mxu0 %v3540_v24  ;;  %8817 = vmatprep.mubr.bf16.mxu1 %v10188_v34  ;;  %v4169_v24 = vrot.slane %v4077_v39, 1  ;;  %v4078_v34 = vld [vmem:[#allocation2 + $0x30] sm:$0xff]  ;;  %v10032_v39 = vld [vmem:[%s13843_s1 + $0x160] sm:$0xff]  }
 0x144   : > { %9137 = vmatprep.mubr.bf16.mxu0 %v4162_v13  ;;  %v10030_v13 = vld [vmem:[%s13843_s1 + $0x150] sm:$0xff]  }
 0x14a   : > { %8818 = vmatmul.mubr.bf16.vlgmr.msra.gmra.mrb[0].mxu1 %v10189_v61 }
 0x14b   : > { %9138 = vmatmul.mubr.bf16.vlgmr.msra.gmra.mrb[0].mxu0 %v4164_v49  ;;  %8821 = vmatprep.mubr.bf16.mxu1 %v10190_v59  ;;  %v4079_v49 = vld [vmem:[#allocation2 + $0x38] sm:$0xff] }
 0x14c   : > { %9202 = vmatpush3.bf16.msra.mxu0 %v10797_v27  ;;  %9141 = vmatprep.mubr.bf16.mxu0 %v10861_v58  ;;  %v10881_v27 = vsel %vm4159_vm1, %v4167_v11, %v4169_v24  ;;  %v4173_v61 = vrot.slane %v4079_v49, 1 }
 0x14d   : > { %9203 = vmatprep.subr.bf16.mxu0 %v10029_v25  ;;  %8882 = vmatpush3.bf16.msra.mxu1 %v10034_v18  ;;  %v10191_v18 = vld [vmem:[#allocation2 + $0x38] sm:$0xff] }
 0x14e   : > { %8883 = vmatprep.subr.bf16.mxu1 %v10036_v38 }
 0x150   : > { %9204 = vmatpush3.bf16.msra.mxu0 %v10029_v25  ;;  %v4171_v25 = vrot.slane %v4078_v34, 1  ;;  %v10033_v34 = vld [vmem:[%s13843_s1 + $0x168] sm:$0xff]  }
 0x151   : > { %9205 = vmatprep.subr.bf16.mxu0 %v10030_v13  ;;  %8884 = vmatpush3.bf16.msra.mxu1 %v10036_v38  ;;  %v10039_v38 = vld [vmem:[%s13843_s1 + $0x60] sm:$0xff]  }
 0x152   : > { %8822 = vmatmul.mubr.bf16.gmra.mrb[4].mxu1 %v10191_v18  ;;  %8885 = vmatprep.subr.bf16.mxu1 %v10037_v1  ;;  %v10898_v59 = vsel %vm4159_vm1, %v4169_v24, %v4171_v25  ;;  %v10901_v11 = vsel %vm4159_vm1, %v4171_v25, %v4173_v61  ;;  %v4081_v18 = vld [vmem:[#allocation2 + $0x48] sm:$0xff]  ;;  %v10042_v25 = vld [vmem:[%s13843_s1 + $0x70] sm:$0xff]  }
 0x153   : > { %9142 = vmatmul.mubr.bf16.gmra.mrb[4].mxu0 %v10878_v55  ;;  %8825 = vmatprep.mubr.bf16.mxu1 %v10192_v43  ;;  %v10041_v24 = vld [vmem:[%s13843_s1 + $0x68] sm:$0xff]   ;;  %v4177_v43 = vrot.slane %v4081_v18, 1 }
 0x154   : > { %9145 = vmatprep.mubr.bf16.mxu0 %v10881_v27  ;;  %9206 = vmatpush3.bf16.msra.mxu0 %v10030_v13  ;;  %v4080_v13 = vld [vmem:[#allocation2 + $0x40] sm:$0xff] }
 0x155   : > { %9207 = vmatprep.subr.bf16.mxu0 %v10031_v5  ;;  %8886 = vmatpush3.bf16.msra.mxu1 %v10037_v1  ;;  %v10193_v1 = vld [vmem:[#allocation2 + $0x48] sm:$0xff]  ;;  %v4175_v49 = vrot.slane %v4080_v13, 1  ;;  %v10195_v13 = vld [vmem:[#allocation2 + $0x58] sm:$0xff] }
 0x156   : > { %8887 = vmatprep.subr.bf16.mxu1 %v10038_v50  ;;  %v4181_v18 = vrot.slane %v10195_v13, 1 }
 0x157   : > { %v10921_v0 = vsel %vm4159_vm1, %v4175_v49, %v4177_v43 }
 0x158   : > { %9208 = vmatpush3.bf16.msra.mxu0 %v10031_v5  ;;  %v10194_v5 = vld [vmem:[#allocation2 + $0x50] sm:$0xff] }
 0x159   : > { %9209 = vmatprep.subr.bf16.mxu0 %v10032_v39  ;;  %8888 = vmatpush3.bf16.msra.mxu1 %v10038_v50  ;;  %v10035_v50 = vld [vmem:[%s13843_s1 + $0x170] sm:$0xff]  }
 0x15a   : > { %8826 = vmatmul.mubr.bf16.gmra.mrb[8].mxu1 %v10193_v1  ;;  %8889 = vmatprep.subr.bf16.mxu1 %v10039_v38  ;;  %v10918_v1 = vsel %vm4159_vm1, %v4173_v61, %v4175_v49  ;;  %v10196_v61 = vld [vmem:[#allocation2 + $0x60] sm:$0xff] }
 0x15b   : > { %9146 = vmatmul.mubr.bf16.gmra.mrb[8].mxu0 %v10898_v59  ;;  %8829 = vmatprep.mubr.bf16.mxu1 %v10194_v5 }
 0x15c   : > { %9149 = vmatprep.mubr.bf16.mxu0 %v10901_v11  ;;  %9210 = vmatpush3.bf16.msra.mxu0 %v10032_v39  ;;  %v10040_v39 = vld [vmem:[%s13843_s1 + $0x178] sm:$0xff]  }
 0x15d   : > { %9211 = vmatprep.subr.bf16.mxu0 %v10033_v34  ;;  %8890 = vmatpush3.bf16.msra.mxu1 %v10039_v38  ;;  %v10043_v38 = vld [vmem:[%s13843_s1 + $0x78] sm:$0xff]  }
 0x15e   : > { %8891 = vmatprep.subr.bf16.mxu1 %v10041_v24 }
 0x160   : > { %9212 = vmatpush3.bf16.msra.mxu0 %v10033_v34  ;;  %v4179_v34 = vrot.slane %v10194_v5, 1  ;;  %v10197_v5 = vld [vmem:[#allocation2 + $0x68] sm:$0xff] }
 0x161   : > { %9213 = vmatprep.subr.bf16.mxu0 %v10035_v50  ;;  %8892 = vmatpush3.bf16.msra.mxu1 %v10041_v24  ;;  %v10934_v24 = vld [vmem:[%s13843_s1 + $0x200] sm:$0xff]  }
 0x162   : > { %8830 = vmatmul.mubr.bf16.gmra.mrb[12].mxu1 %v10195_v13  ;;  %8893 = vmatprep.subr.bf16.mxu1 %v10042_v25  ;;  %v10937_v49 = vsel %vm4159_vm1, %v4177_v43, %v4179_v34  ;;  %v10940_v29 = vsel %vm4159_vm1, %v4179_v34, %v4181_v18  ;;  %v4185_v13 = vrot.slane %v10197_v5, 1  ;;  %v10199_v34 = vld [vmem:[#allocation2 + $0x78] sm:$0xff] }
 0x163   : > { %9150 = vmatmul.mubr.bf16.gmra.mrb[12].mxu0 %v10918_v1  ;;  %8833 = vmatprep.mubr.bf16.mxu1 %v10196_v61  ;;  %v4189_v10 = vrot.slane %v10199_v34, 1 }
 0x164   : > { %9153 = vmatprep.mubr.bf16.mxu0 %v10921_v0  ;;  %9214 = vmatpush3.bf16.msra.mxu0 %v10035_v50  ;;  %v10198_v50 = vld [vmem:[#allocation2 + $0x70] sm:$0xff] }
 0x165   : > { %9215 = vmatprep.subr.bf16.mxu0 %v10040_v39  ;;  %8894 = vmatpush3.bf16.msra.mxu1 %v10042_v25  ;;  %v4183_v25 = vrot.slane %v10196_v61, 1  ;;  %v4187_v32 = vrot.slane %v10198_v50, 1 }
 0x166   : > { %8895 = vmatprep.subr.bf16.mxu1 %v10043_v38 }
 0x167   : > { %v10946_v43 = vsel %vm4159_vm1, %v4181_v18, %v4183_v25  ;;  %v10954_v53 = vsel %vm4159_vm1, %v4185_v13, %v4187_v32  ;;  %v10957_v61 = vsel %vm4159_vm1, %v4187_v32, %v4189_v10  ;;  %v10201_v18 = vld [vmem:[#allocation2 + $0x88] sm:$0xff] }
 0x168   : > { %9216 = vmatpush3.bf16.msra.mxu0 %v10040_v39  ;;  %v10949_v39 = vsel %vm4159_vm1, %v4183_v25, %v4185_v13  ;;  %v4193_v52 = vrot.slane %v10201_v18, 1  ;;  %v4197_v13 = vrot.slane %v10548_v48, 1 }
 0x169   : > { %8896 = vmatpush3.bf16.msra.mxu1 %v10043_v38  ;;  %9281 = vmatprep.subr.bf16.mxu0 %v10934_v24  ;;  %v10200_v38 = vld [vmem:[#allocation2 + $0x80] sm:$0xff] }
 0x16a   : > { %8834 = vmatmul.mubr.bf16.gmra.mrb[16].mxu1 %v10197_v5  ;;  %v10202_v5 = vld [vmem:[#allocation2 + $0x90] sm:$0xff]  ;;  %v4191_v25 = vrot.slane %v10200_v38, 1 }
 0x16b   : > { %9154 = vmatmul.mubr.bf16.gmra.mrb[16].mxu0 %v10937_v49  ;;  %8837 = vmatprep.mubr.bf16.mxu1 %v10198_v50  ;;  %v4195_v32 = vrot.slane %v10202_v5, 1 }
 0x16c   : > { %9157 = vmatprep.mubr.bf16.mxu0 %v10940_v29  ;;  %v10962_v41 = vsel %vm4159_vm1, %v4189_v10, %v4191_v25  ;;  %v10965_v50 = vsel %vm4159_vm1, %v4191_v25, %v4193_v52 }
 0x16d   : > { %v10976_v10 = vsel %vm4159_vm1, %v4195_v32, %v4197_v13 }
 0x172   : > { %8838 = vmatmul.mubr.bf16.gmra.mrb[20].mxu1 %v10199_v34  ;;  %v10973_v34 = vsel %vm4159_vm1, %v4193_v52, %v4195_v32  ;;  %v4207_v32 = vrot.slane %v14072_v45, 1 }
 0x173   : > { %9158 = vmatmul.mubr.bf16.gmra.mrb[20].mxu0 %v10946_v43  ;;  %8841 = vmatprep.mubr.bf16.mxu1 %v10200_v38  ;;  %v4199_v38 = vrot.slane %v10579_v9, 1 }
 0x174   : > { %9161 = vmatprep.mubr.bf16.mxu0 %v10949_v39 }
 0x17a   : > { %8842 = vmatmul.mubr.bf16.gmra.mrb[24].mxu1 %v10201_v18  ;;  %v4201_v18 = vrot.slane %v10584_v19, 1 }
 0x17b   : > { %9162 = vmatmul.mubr.bf16.gmra.mrb[24].mxu0 %v10954_v53  ;;  %8845 = vmatprep.mubr.bf16.mxu1 %v10202_v5  ;;  %v4203_v5 = vrot.slane %v14068_v28, 1 }
 0x17c   : > { %9165 = vmatprep.mubr.bf16.mxu0 %v10957_v61  ;;  %v10988_v52 = vsel %vm4159_vm1, %v4199_v38, %v4201_v18 }
 0x182   : > { %8846 = vmatmul.mubr.bf16.gmra.mrb[28].mxu1 %v10548_v48  ;;  %v10985_v48 = vsel %vm4159_vm1, %v4197_v13, %v4199_v38  ;;  %v4211_v38 = vrot.slane %v14075_v60, 1 }
 0x183   : > { %9166 = vmatmul.mubr.bf16.gmra.mrb[28].mxu0 %v10962_v41  ;;  %8849 = vmatprep.mubr.bf16.mxu1 %v10579_v9  ;;  %v4205_v9 = vrot.slane %v14070_v40, 1 }
 0x184   : > { %9169 = vmatprep.mubr.bf16.mxu0 %v10965_v50 }
 0x185   : > { %v11000_v25 = vsel %vm4159_vm1, %v4203_v5, %v4205_v9 }
 0x18a   : > { %8850 = vmatmul.mubr.bf16.gmra.mrb[32].mxu1 %v10584_v19  ;;  %v10997_v19 = vsel %vm4159_vm1, %v4201_v18, %v4203_v5  ;;  %v4215_v5 = vrot.slane %v10654_v17, 1 }
 0x18b   : > { %9170 = vmatmul.mubr.bf16.gmra.mrb[32].mxu0 %v10973_v34  ;;  %8853 = vmatprep.mubr.bf16.mxu1 %v14068_v28  ;;  %v4209_v28 = vrot.slane %v10620_v12, 1 }
 0x18c   : > { %9173 = vmatprep.mubr.bf16.mxu0 %v10976_v10 }
 0x18d   : > { %v11012_v13 = vsel %vm4159_vm1, %v4207_v32, %v4209_v28 }
 0x192   : > { %8854 = vmatmul.mubr.bf16.gmra.mrb[36].mxu1 %v14070_v40  ;;  %v11009_v40 = vsel %vm4159_vm1, %v4205_v9, %v4207_v32  ;;  %v2068_v32 = vld [vmem:[#allocation2] sm:$0xff] }
 0x193   : > { %9174 = vmatmul.mubr.bf16.gmra.mrb[36].mxu0 %v10985_v48  ;;  %8857 = vmatprep.mubr.bf16.mxu1 %v14072_v45  ;;  %v4213_v45 = vrot.slane %v14077_v14, 1 }
 0x194   : > { %9177 = vmatprep.mubr.bf16.mxu0 %v10988_v52 }
 0x195   : > { %v11024_v18 = vsel %vm4159_vm1, %v4211_v38, %v4213_v45 }
 0x196   : > { %14079 = vst [vmem:[#allocation11_spill] sm:$0xff] %v11024_v18 }
 0x19a   : > { %8858 = vmatmul.mubr.bf16.gmra.mrb[40].mxu1 %v10620_v12  ;;  %v11021_v12 = vsel %vm4159_vm1, %v4209_v28, %v4211_v38  ;;  %v4219_v28 = vrot.slane %v10672_v4, 1 }
 0x19b   : > { %9178 = vmatmul.mubr.bf16.gmra.mrb[40].mxu0 %v10997_v19  ;;  %8861 = vmatprep.mubr.bf16.mxu1 %v14075_v60  ;;  %v4217_v60 = vrot.slane %v10656_v26, 1 }
 0x19c   : > { %9181 = vmatprep.mubr.bf16.mxu0 %v11000_v25 }
 0x19d   : > { %v11036_v9 = vsel %vm4159_vm1, %v4215_v5, %v4217_v60  ;;  %v11045_v38 = vsel %vm4159_vm1, %v4217_v60, %v4219_v28 }
 0x1a2   : > { %8862 = vmatmul.mubr.bf16.gmra.mrb[44].mxu1 %v14077_v14  ;;  %v11033_v14 = vsel %vm4159_vm1, %v4213_v45, %v4215_v5  ;;  %v2124_v45 = vshrl.u32 %v2068_v32, 16 }
 0x1a3   : > { %9182 = vmatmul.mubr.bf16.gmra.mrb[44].mxu0 %v11009_v40  ;;  %8865 = vmatprep.mubr.bf16.mxu1 %v10654_v17  ;;  %v2126_v17 = vshll.u32 %v2068_v32, 16  ;;  %v2135_v32 = vshrl.u32 %v10851_v7, 16 }
 0x1a4   : > { %9185 = vmatprep.mubr.bf16.mxu0 %v11012_v13 }
 0x1a5   : > { %v2128_v5 = vrot.slane %v2126_v17, 1 }
 0x1aa   : > { %8866 = vmatmul.mubr.bf16.gmra.mrb[48].mxu1 %v10656_v26  ;;  %v4221_v26 = vrot.slane %v10674_v22, 1 }
 0x1ab   : > { %9186 = vmatmul.mubr.bf16.gmra.mrb[48].mxu0 %v11021_v12  ;;  %8869 = vmatprep.mubr.bf16.mxu1 %v10672_v4  ;;  %v4223_v4 = vrot.slane %v14078_v57, 1 }
 0x1ac   : > { %9189 = vmatprep.mubr.bf16.mxu0 %v11024_v18  ;;  %v2131_v18 = vshll.u32 %v10851_v7, 16  ;;  %v11049_v36 = vsel %vm4159_vm1, %v4219_v28, %v4221_v26  ;;  %v10045_v7 = vld [vmem:[%s13843_s1 + $0x208] sm:$0xff]  }
 0x1ad   : > { %v11060_v17 = vsel %vm4159_vm1, %v4221_v26, %v4223_v4  ;;  %v14081_v26 = vld [vmem:[#allocation9_spill] sm:$0xff] }
 0x1ae   : > { %v2133_v60 = vrot.slane %v2131_v18, 1 }
 0x1b2   : > { %8870 = vmatmul.mubr.bf16.gmra.mrb[52].mxu1 %v10674_v22  ;;  %v2129_v22 = vor.u32 %v2128_v5, %v2124_v45  ;;  %v10047_v45 = vld [vmem:[%s13843_s1 + $0x218] sm:$0xff]   ;;  %v14082_v5 = vld [vmem:[#allocation10_spill] sm:$0xff] }
 0x1b3   : > { %9190 = vmatmul.mubr.bf16.gmra.mrb[52].mxu0 %v11033_v14  ;;  %8873 = vmatprep.mubr.bf16.mxu1 %v14078_v57  ;;  %v10056_v57 = vld [vmem:[%s13845_s3 + $0x20] sm:$0xff]  }
 0x1b4   : > { %9193 = vmatprep.mubr.bf16.mxu0 %v11036_v9  ;;  %v2134_v28 = vsel %vm2122_vm0, %v2129_v22, %v2133_v60  ;;  %v10051_v22 = vld [vmem:[%s13843_s1 + $0x238] sm:$0xff]  }
 0x1ba   : > { %8874 = vmatmul.mubr.bf16.gmra.mrb[56].mxu1 %v10695_v62  ;;  %v2137_v62 = vor.u32 %v2135_v32, %v2133_v60 }
 0x1bb   : > { %9194 = vmatmul.mubr.bf16.gmra.mrb[56].mxu0 %v11045_v38  ;;  %8877 = vmatprep.mubr.bf16.mxu1 %v10711_v37  ;;  %v14080_v37 = vld [vmem:[#allocation8_spill] sm:$0xff] }
 0x1bc   : > { %9197 = vmatprep.mubr.bf16.mxu0 %v11049_v36  ;;  %v2142_v18 = vsel %vm2122_vm0, %v2137_v62, %v14080_v37 }
 0x1c2   : > { %8878 = vmatmul.mubr.bf16.gmra.mrb[60].mxu1 %v10839_v44 }
 0x1c3   : > { %9198 = vmatmul.mubr.bf16.gmra.mrb[60].mxu0 %v11060_v17  ;;  %8897 = vmatprep.mubr.bf16.mxu1 %v2134_v28 }
 0x1c4   : > { %9217 = vmatprep.mubr.bf16.mxu0 %v10861_v58  ;;  %v10046_v58 = vld [vmem:[%s13843_s1 + $0x210] sm:$0xff]  }
 0x1ca   : > { %8898 = vmatmul.mubr.bf16.vlgmr.msra.gmra.mrb[0].mxu1 %v2142_v18 }
 0x1cb   : > { %9218 = vmatmul.mubr.bf16.vlgmr.msra.gmra.mrb[0].mxu0 %v10878_v55  ;;  %8901 = vmatprep.mubr.bf16.mxu1 %v14081_v26  ;;  %v10048_v55 = vld [vmem:[%s13843_s1 + $0x220] sm:$0xff]  }
 0x1cc   : > { %9282 = vmatpush3.bf16.msra.mxu0 %v10934_v24  ;;  %9221 = vmatprep.mubr.bf16.mxu0 %v10881_v27  ;;  %v10049_v24 = vld [vmem:[%s13843_s1 + $0x228] sm:$0xff]  }
 0x1cd   : > { %9283 = vmatprep.subr.bf16.mxu0 %v10045_v7 }
 0x1d0   : > { %9284 = vmatpush3.bf16.msra.mxu0 %v10045_v7 }
 0x1d1   : > { %9285 = vmatprep.subr.bf16.mxu0 %v10046_v58 }
 0x1d2   : > { %8902 = vmatmul.mubr.bf16.gmra.mrb[4].mxu1 %v14082_v5 }
 0x1d3   : > { %9222 = vmatmul.mubr.bf16.gmra.mrb[4].mxu0 %v10898_v59  ;;  %8905 = vmatprep.mubr.bf16.mxu1 %v10416_v16  ;;  %v10050_v16 = vld [vmem:[%s13843_s1 + $0x230] sm:$0xff]  }
 0x1d4   : > { %9225 = vmatprep.mubr.bf16.mxu0 %v10901_v11  ;;  %9286 = vmatpush3.bf16.msra.mxu0 %v10046_v58 }
 0x1d5   : > { %9287 = vmatprep.subr.bf16.mxu0 %v10047_v45 }
 0x1d8   : > { %9288 = vmatpush3.bf16.msra.mxu0 %v10047_v45 }
 0x1d9   : > { %9289 = vmatprep.subr.bf16.mxu0 %v10048_v55 }
 0x1da   : > { %8906 = vmatmul.mubr.bf16.gmra.mrb[8].mxu1 %v10441_v30  ;;  %v14083_v30 = vld [vmem:[#allocation16_spill] sm:$0xff] }
 0x1db   : > { %9226 = vmatmul.mubr.bf16.gmra.mrb[8].mxu0 %v10918_v1  ;;  %8909 = vmatprep.mubr.bf16.mxu1 %v10446_v33  ;;  %v14084_v33 = vld [vmem:[#allocation11_spill] sm:$0xff] }
 0x1dc   : > { %9229 = vmatprep.mubr.bf16.mxu0 %v10921_v0  ;;  %9290 = vmatpush3.bf16.msra.mxu0 %v10048_v55 }
 0x1dd   : > { %9291 = vmatprep.subr.bf16.mxu0 %v10049_v24 }
 0x1e0   : > { %9292 = vmatpush3.bf16.msra.mxu0 %v10049_v24 }
 0x1e1   : > { %9293 = vmatprep.subr.bf16.mxu0 %v10050_v16 }
 0x1e2   : > { %8910 = vmatmul.mubr.bf16.gmra.mrb[12].mxu1 %v10481_v54  ;;  %v14085_v54 = vld [vmem:[#allocation17_spill] sm:$0xff] }
 0x1e3   : > { %9230 = vmatmul.mubr.bf16.gmra.mrb[12].mxu0 %v10937_v49  ;;  %8913 = vmatprep.mubr.bf16.mxu1 %v10489_v63  ;;  %v14086_v63 = vld [vmem:[#allocation18_spill] sm:$0xff] }
 0x1e4   : > { %9233 = vmatprep.mubr.bf16.mxu0 %v10940_v29  ;;  %9294 = vmatpush3.bf16.msra.mxu0 %v10050_v16 }
 0x1e5   : > { %9295 = vmatprep.subr.bf16.mxu0 %v10051_v22 }
 0x1e8   : > { %9296 = vmatpush3.bf16.msra.mxu0 %v10051_v22 }
 0x1ea   : > { %8914 = vmatmul.mubr.bf16.gmra.mrb[16].mxu1 %v10521_v31  ;;  %v10052_v31 = vld [vmem:[%s13845_s3] sm:$0xff]  }
 0x1eb   : > { %9234 = vmatmul.mubr.bf16.gmra.mrb[16].mxu0 %v10946_v43  ;;  %8917 = vmatprep.mubr.bf16.mxu1 %v10526_v35  ;;  %v14087_v35 = vld [vmem:[#allocation19_spill] sm:$0xff] }
 0x1ec   : > { %9237 = vmatprep.mubr.bf16.mxu0 %v10949_v39  ;;  %9361 = vmatprep.subr.bf16.mxu1 %v10052_v31 }
 0x1ed   : > { %9362 = vmatpush3.bf16.msra.mxu1 %v10052_v31 }
 0x1f2   : > { %8918 = vmatmul.mubr.bf16.gmra.mrb[20].mxu1 %v10551_v51  ;;  %v4105_v51 = vld [vmem:[#allocation2 + $0x108] sm:$0xff] }
 0x1f3   : > { %9238 = vmatmul.mubr.bf16.gmra.mrb[20].mxu0 %v10954_v53  ;;  %8921 = vmatprep.mubr.bf16.mxu1 %v10554_v56  ;;  %v14088_v56 = vld [vmem:[#allocation20_spill] sm:$0xff] }
 0x1f4   : > { %9241 = vmatprep.mubr.bf16.mxu0 %v10957_v61 }
 0x1fa   : > { %8922 = vmatmul.mubr.bf16.gmra.mrb[24].mxu1 %v10563_v2  ;;  %v4805_v2 = vrot.slane %v4105_v51, 1 }
 0x1fb   : > { %9242 = vmatmul.mubr.bf16.gmra.mrb[24].mxu0 %v10962_v41  ;;  %8925 = vmatprep.mubr.bf16.mxu1 %v10566_v3 }
 0x1fc   : > { %9245 = vmatprep.mubr.bf16.mxu0 %v10965_v50  ;;  %v11151_v3 = vsel %vm4159_vm1, %v4223_v4, %v4805_v2 }
 0x202   : > { %8926 = vmatmul.mubr.bf16.gmra.mrb[28].mxu1 %v10573_v6  ;;  %v11153_v6 = vld [vmem:[#allocation2 + $0x110] sm:$0xff] }
 0x203   : > { %9246 = vmatmul.mubr.bf16.gmra.mrb[28].mxu0 %v10973_v34  ;;  %8929 = vmatprep.mubr.bf16.mxu1 %v10576_v8  ;;  %v14089_v8 = vld [vmem:[#allocation22_spill] sm:$0xff] }
 0x204   : > { %9249 = vmatprep.mubr.bf16.mxu0 %v10976_v10 }
 0x20a   : > { %8930 = vmatmul.mubr.bf16.gmra.mrb[32].mxu1 %v10588_v21  ;;  %v14090_v21 = vld [vmem:[#allocation23_spill] sm:$0xff] }
 0x20b   : > { %9250 = vmatmul.mubr.bf16.gmra.mrb[32].mxu0 %v10985_v48  ;;  %8933 = vmatprep.mubr.bf16.mxu1 %v10592_v23  ;;  %v10053_v23 = vld [vmem:[%s13845_s3 + $0x8] sm:$0xff]  }
 0x20c   : > { %9253 = vmatprep.mubr.bf16.mxu0 %v10988_v52  ;;  %9363 = vmatprep.subr.bf16.mxu1 %v10053_v23 }
 0x20d   : > { %9364 = vmatpush3.bf16.msra.mxu1 %v10053_v23 }
 0x212   : > { %8934 = vmatmul.mubr.bf16.gmra.mrb[36].mxu1 %v10606_v42  ;;  %v4807_v42 = vrot.slane %v11153_v6, 1 }
 0x213   : > { %9254 = vmatmul.mubr.bf16.gmra.mrb[36].mxu0 %v10997_v19  ;;  %8937 = vmatprep.mubr.bf16.mxu1 %v10610_v46 }
 0x214   : > { %9257 = vmatprep.mubr.bf16.mxu0 %v11000_v25  ;;  %v11166_v46 = vsel %vm4159_vm1, %v4805_v2, %v4807_v42 }
 0x21a   : > { %8938 = vmatmul.mubr.bf16.gmra.mrb[40].mxu1 %v10624_v15  ;;  %v14091_v15 = vld [vmem:[#allocation24_spill] sm:$0xff] }
 0x21b   : > { %9258 = vmatmul.mubr.bf16.gmra.mrb[40].mxu0 %v11009_v40  ;;  %8941 = vmatprep.mubr.bf16.mxu1 %v10628_v20  ;;  %v10054_v20 = vld [vmem:[%s13845_s3 + $0x10] sm:$0xff]  }
 0x21c   : > { %9261 = vmatprep.mubr.bf16.mxu0 %v11012_v13  ;;  %9365 = vmatprep.subr.bf16.mxu1 %v10054_v20 }
 0x21d   : > { %9366 = vmatpush3.bf16.msra.mxu1 %v10054_v20 }
 0x222   : > { %8942 = vmatmul.mubr.bf16.gmra.mrb[44].mxu1 %v10642_v47  ;;  %v10055_v47 = vld [vmem:[%s13845_s3 + $0x18] sm:$0xff]  }
 0x223   : > { %9262 = vmatmul.mubr.bf16.gmra.mrb[44].mxu0 %v11021_v12  ;;  %8945 = vmatprep.mubr.bf16.mxu1 %v14083_v30 }
 0x224   : > { %9265 = vmatprep.mubr.bf16.mxu0 %v14084_v33  ;;  %9367 = vmatprep.subr.bf16.mxu1 %v10055_v47 }
 0x225   : > { %9368 = vmatpush3.bf16.msra.mxu1 %v10055_v47 }
 0x226   : > { %9369 = vmatprep.subr.bf16.mxu1 %v10056_v57 }
 0x229   : > { %9370 = vmatpush3.bf16.msra.mxu1 %v10056_v57 }
 0x22a   : > { %8946 = vmatmul.mubr.bf16.gmra.mrb[48].mxu1 %v14085_v54 }
 0x22b   : > { %9266 = vmatmul.mubr.bf16.gmra.mrb[48].mxu0 %v11033_v14  ;;  %8949 = vmatprep.mubr.bf16.mxu1 %v14086_v63 }
 0x22c   : > { %9269 = vmatprep.mubr.bf16.mxu0 %v11036_v9 }
 0x232   : > { %8950 = vmatmul.mubr.bf16.gmra.mrb[52].mxu1 %v14087_v35 }
 0x233   : > { %9270 = vmatmul.mubr.bf16.gmra.mrb[52].mxu0 %v11045_v38  ;;  %8953 = vmatprep.mubr.bf16.mxu1 %v14088_v56 }
 0x234   : > { %9273 = vmatprep.mubr.bf16.mxu0 %v11049_v36 }
 0x23a   : > { %8954 = vmatmul.mubr.bf16.gmra.mrb[56].mxu1 %v14089_v8 }
 0x23b   : > { %9274 = vmatmul.mubr.bf16.gmra.mrb[56].mxu0 %v11060_v17  ;;  %8957 = vmatprep.mubr.bf16.mxu1 %v14090_v21 }
 0x23c   : > { %9277 = vmatprep.mubr.bf16.mxu0 %v11151_v3 }
 0x242   : > { %8958 = vmatmul.mubr.bf16.gmra.mrb[60].mxu1 %v14091_v15 }
 0x243   : > { %9278 = vmatmul.mubr.bf16.gmra.mrb[60].mxu0 %v11166_v46 }
 0x244   : > { %9297 = vmatprep.mubr.bf16.mxu0 %v10881_v27 }
 0x24b   : > { %9298 = vmatmul.mubr.bf16.vlgmr.msra.gmra.mrb[0].mxu0 %v10898_v59 }
 0x24c   : > { %9301 = vmatprep.mubr.bf16.mxu0 %v10901_v11 }
 0x253   : > { %9302 = vmatmul.mubr.bf16.gmra.mrb[4].mxu0 %v10918_v1 }
 0x254   : > { %9305 = vmatprep.mubr.bf16.mxu0 %v10921_v0  ;;  %v10058_v0 = vld [vmem:[%s13845_s3 + $0x30] sm:$0xff]  }
 0x25b   : > { %9306 = vmatmul.mubr.bf16.gmra.mrb[8].mxu0 %v10937_v49 }
 0x25c   : > { %9309 = vmatprep.mubr.bf16.mxu0 %v10940_v29  ;;  %v10057_v29 = vld [vmem:[%s13845_s3 + $0x28] sm:$0xff]  }
 0x25d   : > { %9371 = vmatprep.subr.bf16.mxu1 %v10057_v29 }
 0x25e   : > { %9372 = vmatpush3.bf16.msra.mxu1 %v10057_v29 }
 0x25f   : > { %9373 = vmatprep.subr.bf16.mxu1 %v10058_v0 }
 0x262   : > { %9374 = vmatpush3.bf16.msra.mxu1 %v10058_v0 }
 0x263   : > { %9310 = vmatmul.mubr.bf16.gmra.mrb[12].mxu0 %v10946_v43 }
 0x264   : > { %9313 = vmatprep.mubr.bf16.mxu0 %v10949_v39 }
 0x26b   : > { %9314 = vmatmul.mubr.bf16.gmra.mrb[16].mxu0 %v10954_v53 }
 0x26c   : > { %9317 = vmatprep.mubr.bf16.mxu0 %v10957_v61 }
 0x273   : > { %9318 = vmatmul.mubr.bf16.gmra.mrb[20].mxu0 %v10962_v41  ;;  %v10059_v41 = vld [vmem:[%s13845_s3 + $0x38] sm:$0xff]  }
 0x274   : > { %9321 = vmatprep.mubr.bf16.mxu0 %v10965_v50  ;;  %9375 = vmatprep.subr.bf16.mxu1 %v10059_v41 }
 0x275   : > { %9376 = vmatpush3.bf16.msra.mxu1 %v10059_v41 }
 0x27b   : > { %9322 = vmatmul.mubr.bf16.gmra.mrb[24].mxu0 %v10973_v34 }
 0x27c   : > { %9325 = vmatprep.mubr.bf16.mxu0 %v10976_v10 }
 0x283   : > { %9326 = vmatmul.mubr.bf16.gmra.mrb[28].mxu0 %v10985_v48 }
 0x284   : > { %9329 = vmatprep.mubr.bf16.mxu0 %v10988_v52  ;;  %v5359_v52 = vrot.slane %v10839_v44, 1 }
 0x28b   : > { %9330 = vmatmul.mubr.bf16.gmra.mrb[32].mxu0 %v10997_v19 }
 0x28c   : > { %9333 = vmatprep.mubr.bf16.mxu0 %v11000_v25 }
 0x293   : > { %9334 = vmatmul.mubr.bf16.gmra.mrb[36].mxu0 %v11009_v40  ;;  %v5360_v40 = vsel %vm4159_vm1, %v4807_v42, %v5359_v52 }
 0x294   : > { %9337 = vmatprep.mubr.bf16.mxu0 %v11012_v13  ;;  %v4108_v13 = vld [vmem:[#allocation2 + $0x120] sm:$0x1] }
 0x29b   : > { %9338 = vmatmul.mubr.bf16.gmra.mrb[40].mxu0 %v11021_v12  ;;  %v5361_v12 = vrot.slane %v4108_v13, 1 }
 0x29c   : > { %9341 = vmatprep.mubr.bf16.mxu0 %v14084_v33 }
 0x29d   : > { %v11211_v53 = vpop.f32.mrb[0].mxu1  ;;  %v5362_v4 = vsel %vm4159_vm1, %v5359_v52, %v5361_v12 }
 0x29e   : > { %v11213_v27 = vpop.f32.mrb[1].mxu1 }
 0x29f   : > { %v11215_v59 = vpop.f32.mrb[2].mxu1 }
 0x2a0   : > { %v11217_v11 = vpop.f32.mrb[3].mxu1 }
 0x2a3   : > { %9342 = vmatmul.mubr.bf16.gmra.mrb[44].mxu0 %v11033_v14 }
 0x2a4   : > { %9345 = vmatprep.mubr.bf16.mxu0 %v11036_v9 }
 0x2a5   : > { %v11221_v1 = vpop.f32.mrb[4].mxu1 }
 0x2a6   : > { %v11223_v49 = vpop.f32.mrb[5].mxu1 }
 0x2a7   : > { %v11225_v43 = vpop.f32.mrb[6].mxu1 }
 0x2a8   : > { %v11227_v39 = vpop.f32.mrb[7].mxu1 }
 0x2ab   : > { %9346 = vmatmul.mubr.bf16.gmra.mrb[48].mxu0 %v11045_v38 }
 0x2ac   : > { %9349 = vmatprep.mubr.bf16.mxu0 %v11049_v36 }
 0x2ad   : > { %v11231_v61 = vpop.f32.mrb[8].mxu1 }
 0x2ae   : > { %v11233_v50 = vpop.f32.mrb[9].mxu1 }
 0x2af   : > { %v11235_v34 = vpop.f32.mrb[10].mxu1 }
 0x2b0   : > { %v11237_v10 = vpop.f32.mrb[11].mxu1 }
 0x2b3   : > { %9350 = vmatmul.mubr.bf16.gmra.mrb[52].mxu0 %v11060_v17 }
 0x2b4   : > { %9353 = vmatprep.mubr.bf16.mxu0 %v11151_v3 }
 0x2b5   : > { %v11241_v48 = vpop.f32.mrb[12].mxu1 }
 0x2b6   : > { %v11244_v19 = vpop.f32.mrb[13].mxu1 }
 0x2b7   : > { %v11246_v25 = vpop.f32.mrb[14].mxu1 }
 0x2b8   : > { %v11248_v36 = vpop.f32.mrb[15].mxu1 }
 0x2bb   : > { %9354 = vmatmul.mubr.bf16.gmra.mrb[56].mxu0 %v11166_v46 }
 0x2bc   : > { %9357 = vmatprep.mubr.bf16.mxu0 %v5360_v40 }
 0x2bd   : > { %v11254_v14 = vpop.f32.mrb[16].mxu1 }
 0x2be   : > { %v11256_v9 = vpop.f32.mrb[17].mxu1 }
 0x2bf   : > { %v11258_v44 = vpop.f32.mrb[18].mxu1 }
 0x2c0   : > { %v11260_v38 = vpop.f32.mrb[19].mxu1 }
 0x2c3   : > { %9358 = vmatmul.mubr.bf16.gmra.mrb[60].mxu0 %v5362_v4 }
 0x2c5   : > { %v11263_v60 = vpop.f32.mrb[20].mxu1 }
 0x2c6   : > { %v11265_v32 = vpop.f32.mrb[21].mxu1 }
 0x2c7   : > { %v11267_v17 = vpop.f32.mrb[22].mxu1 }
 0x2c8   : > { %v11269_v28 = vpop.f32.mrb[23].mxu1 }
 0x2cd   : > { %v11271_v62 = vpop.f32.mrb[24].mxu1 }
 0x2ce   : > { %v11273_v37 = vpop.f32.mrb[25].mxu1 }
 0x2cf   : > { %v11275_v18 = vpop.f32.mrb[26].mxu1 }
 0x2d0   : > { %v11277_v7 = vpop.f32.mrb[27].mxu1 }
 0x2d5   : > { %v11279_v26 = vpop.f32.mrb[28].mxu1 }
 0x2d6   : > { %v11281_v58 = vpop.f32.mrb[29].mxu1 }
 0x2d7   : > { %v11283_v45 = vpop.f32.mrb[30].mxu1 }
 0x2d8   : > { %v11285_v5 = vpop.f32.mrb[31].mxu1 }
 0x2dd   : > { %v11287_v55 = vpop.f32.mrb[32].mxu1 }
 0x2de   : > { %v11289_v24 = vpop.f32.mrb[33].mxu1 }
 0x2df   : > { %v11291_v16 = vpop.f32.mrb[34].mxu1 }
 0x2e0   : > { %v11293_v22 = vpop.f32.mrb[35].mxu1 }
 0x2e5   : > { %v11295_v30 = vpop.f32.mrb[36].mxu1 }
 0x2e6   : > { %v11297_v33 = vpop.f32.mrb[37].mxu1 }
 0x2e7   : > { %v11299_v54 = vpop.f32.mrb[38].mxu1 }
 0x2e8   : > { %v11301_v63 = vpop.f32.mrb[39].mxu1 }
 0x2ed   : > { %v11303_v31 = vpop.f32.mrb[40].mxu1 }
 0x2ee   : > { %v11305_v35 = vpop.f32.mrb[41].mxu1 }
 0x2ef   : > { %v11307_v51 = vpop.f32.mrb[42].mxu1 }
 0x2f0   : > { %v11309_v56 = vpop.f32.mrb[43].mxu1 }
 0x2f5   : > { %v11311_v2 = vpop.f32.mrb[44].mxu1 }
 0x2f6   : > { %v11313_v3 = vpop.f32.mrb[45].mxu1 }
 0x2f7   : > { %v11315_v6 = vpop.f32.mrb[46].mxu1 }
 0x2f8   : > { %v11317_v8 = vpop.f32.mrb[47].mxu1 }
 0x2f9   : > { %14092 = vst [vmem:[#allocation12_spill] sm:$0xff] %v11317_v8 }
 0x2fd   : > { %v11319_v21 = vpop.f32.mrb[48].mxu1 }
 0x2fe   : > { %14093 = vst [vmem:[#allocation13_spill] sm:$0xff] %v11319_v21  ;;  %v11321_v23 = vpop.f32.mrb[49].mxu1 }
 0x2ff   : > { %14094 = vst [vmem:[#allocation14_spill] sm:$0xff] %v11321_v23  ;;  %v11323_v42 = vpop.f32.mrb[50].mxu1 }
 0x300   : > { %14095 = vst [vmem:[#allocation15_spill] sm:$0xff] %v11323_v42  ;;  %v11325_v46 = vpop.f32.mrb[51].mxu1 }
 0x301   : > { %14096 = vst [vmem:[#allocation21_spill] sm:$0xff] %v11325_v46 }
 0x305   : > { %v11327_v15 = vpop.f32.mrb[52].mxu1 }
 0x306   : > { %14097 = vst [vmem:[#allocation8_spill] sm:$0xff] %v11327_v15  ;;  %v11329_v20 = vpop.f32.mrb[53].mxu1 }
 0x307   : > { %14098 = vst [vmem:[#allocation9_spill] sm:$0xff] %v11329_v20  ;;  %v11331_v47 = vpop.f32.mrb[54].mxu1 }
 0x308   : > { %14099 = vst [vmem:[#allocation10_spill] sm:$0xff] %v11331_v47  ;;  %v11333_v57 = vpop.f32.mrb[55].mxu1 }
 0x309   : > { %14100 = vst [vmem:[#allocation16_spill] sm:$0xff] %v11333_v57  ;;  %v11354_v57 = vld [vmem:[%s13844_s2] ss:$0 sm:$0xff] }
 0x30d   : > { %v11335_v29 = vpop.f32.mrb[56].mxu1 }
 0x30e   : > { %14101 = vst [vmem:[#allocation11_spill] sm:$0xff] %v11335_v29  ;;  %v11337_v0 = vpop.f32.mrb[57].mxu1 }
 0x30f   : > { %14102 = vst [vmem:[#allocation17_spill] sm:$0xff] %v11337_v0  ;;  %v11339_v41 = vpop.f32.mrb[58].mxu1 }
 0x310   : > { %14103 = vst [vmem:[#allocation18_spill] sm:$0xff] %v11339_v41  ;;  %v11341_v52 = vpop.f32.mrb[59].mxu1 }
 0x311   : > { %14104 = vst [vmem:[#allocation19_spill] sm:$0xff] %v11341_v52 }
 0x315   : > { %v11343_v40 = vpop.f32.mrb[60].mxu1 }
 0x316   : > { %14105 = vst [vmem:[#allocation20_spill] sm:$0xff] %v11343_v40  ;;  %v11345_v13 = vpop.f32.mrb[61].mxu1 }
 0x317   : > { %14106 = vst [vmem:[#allocation22_spill] sm:$0xff] %v11345_v13  ;;  %v11347_v12 = vpop.f32.mrb[62].mxu1 }
 0x318   : > { %14107 = vst [vmem:[#allocation23_spill] sm:$0xff] %v11347_v12  ;;  %v11349_v4 = vpop.f32.mrb[63].mxu1 }
 0x319   : > { %14108 = vst [vmem:[#allocation24_spill] sm:$0xff] %v11349_v4 }
 0x31e   : > { %v9299_v20 = vpop.f32.mrb[0].mxu0 }
 0x31f   : > { %v9441_v0 = vadd.f32 %v9299_v20, %v11211_v53  ;;  %v5447_v29 = vpop.f32.mrb[1].mxu0 }
 0x320   : > { %v9442_v41 = vadd.f32 %v5447_v29, %v11213_v27  ;;  %v9300_v52 = vpop.f32.mrb[2].mxu0 }
 0x321   : > { %v5967_v40 = vadd.f32 %v9441_v0, %v11354_v57  ;;  %v9443_v13 = vadd.f32 %v9300_v52, %v11215_v59  ;;  %v5450_v47 = vpop.f32.mrb[3].mxu0 }
 0x322   : > { %v5965_v12 = vadd.f32 %v9442_v41, %v11354_v57  ;;  %v9444_v4 = vadd.f32 %v5450_v47, %v11217_v11 }
 0x323   : > { %v5968_v15 = vadd.f32 %v9443_v13, %v11354_v57  ;;  %v6031_v42 = vmax.f32 %v5967_v40, 0.0 }
 0x324   : > { %v5966_v46 = vadd.f32 %v9444_v4, %v11354_v57  ;;  %v6029_v53 = vmax.f32 %v5965_v12, 0.0 }
 0x325   : > { %v6032_v23 = vmax.f32 %v5968_v15, 0.0 }
 0x326   : > { %v6030_v20 = vmax.f32 %v5966_v46, 0.0  ;;  %v9303_v21 = vpop.f32.mrb[4].mxu0 }
 0x327   : > { %v6094_v27 = vpack.c.bf16 %v6032_v23, %v6031_v42  ;;  %v9445_v29 = vadd.f32 %v9303_v21, %v11221_v1  ;;  %v5463_v0 = vpop.f32.mrb[5].mxu0 }
 0x328   : > { %v9446_v59 = vadd.f32 %v5463_v0, %v11223_v49  ;;  %v9304_v52 = vpop.f32.mrb[6].mxu0  ;;  %v6093_v8 = vpack.c.bf16 %v6030_v20, %v6029_v53 }
 0x329   : > { %v5971_v41 = vadd.f32 %v9445_v29, %v11354_v57  ;;  %v9447_v11 = vadd.f32 %v9304_v52, %v11225_v43  ;;  %v5466_v47 = vpop.f32.mrb[7].mxu0 }
 0x32a   : > { %v5969_v13 = vadd.f32 %v9446_v59, %v11354_v57  ;;  %v9448_v15 = vadd.f32 %v5466_v47, %v11227_v39  ;;  %9377 = vmatprep.mubr.bf16.mxu1 %v6093_v8 }
 0x32b   : > { %v5972_v46 = vadd.f32 %v9447_v11, %v11354_v57  ;;  %9378 = vmatmul.mubr.bf16.vlgmr.msra.gmra.mrb[64].mxu1 %v6094_v27  ;;  %v6035_v21 = vmax.f32 %v5971_v41, 0.0 }
 0x32c   : > { %v5970_v1 = vadd.f32 %v9448_v15, %v11354_v57  ;;  %v6033_v49 = vmax.f32 %v5969_v13, 0.0 }
 0x32d   : > { %v6036_v23 = vmax.f32 %v5972_v46, 0.0 }
 0x32e   : > { %v6034_v42 = vmax.f32 %v5970_v1, 0.0  ;;  %v9307_v40 = vpop.f32.mrb[8].mxu0 }
 0x32f   : > { %v9449_v12 = vadd.f32 %v9307_v40, %v11231_v61  ;;  %v5479_v4 = vpop.f32.mrb[9].mxu0  ;;  %v6096_v43 = vpack.c.bf16 %v6036_v23, %v6035_v21 }
 0x330   : > { %v9450_v53 = vadd.f32 %v5479_v4, %v11233_v50  ;;  %v9308_v20 = vpop.f32.mrb[10].mxu0  ;;  %v6095_v29 = vpack.c.bf16 %v6034_v42, %v6033_v49 }
 0x331   : > { %v5975_v39 = vadd.f32 %v9449_v12, %v11354_v57  ;;  %v9451_v8 = vadd.f32 %v9308_v20, %v11235_v34  ;;  %v5482_v27 = vpop.f32.mrb[11].mxu0 }
 0x332   : > { %v5973_v0 = vadd.f32 %v9450_v53, %v11354_v57  ;;  %v9452_v59 = vadd.f32 %v5482_v27, %v11237_v10  ;;  %9381 = vmatprep.mubr.bf16.mxu1 %v6095_v29 }
 0x333   : > { %v5976_v52 = vadd.f32 %v9451_v8, %v11354_v57  ;;  %9382 = vmatmul.mubr.bf16.gmra.mrb[68].mxu1 %v6096_v43  ;;  %v6039_v41 = vmax.f32 %v5975_v39, 0.0 }
 0x334   : > { %v5974_v61 = vadd.f32 %v9452_v59, %v11354_v57  ;;  %v6037_v50 = vmax.f32 %v5973_v0, 0.0 }
 0x335   : > { %v6040_v11 = vmax.f32 %v5976_v52, 0.0 }
 0x336   : > { %v6038_v47 = vmax.f32 %v5974_v61, 0.0  ;;  %v9311_v13 = vpop.f32.mrb[12].mxu0 }
 0x337   : > { %v9453_v15 = vadd.f32 %v9311_v13, %v11241_v48  ;;  %v5495_v46 = vpop.f32.mrb[13].mxu0  ;;  %v6098_v34 = vpack.c.bf16 %v6040_v11, %v6039_v41 }
 0x338   : > { %v9454_v1 = vadd.f32 %v5495_v46, %v11244_v19  ;;  %v9312_v21 = vpop.f32.mrb[14].mxu0  ;;  %v6097_v23 = vpack.c.bf16 %v6038_v47, %v6037_v50 }
 0x339   : > { %v5979_v10 = vadd.f32 %v9453_v15, %v11354_v57  ;;  %v9455_v49 = vadd.f32 %v9312_v21, %v11246_v25  ;;  %v5498_v42 = vpop.f32.mrb[15].mxu0 }
 0x33a   : > { %v5977_v40 = vadd.f32 %v9454_v1, %v11354_v57  ;;  %v9456_v12 = vadd.f32 %v5498_v42, %v11248_v36  ;;  %9385 = vmatprep.mubr.bf16.mxu1 %v6097_v23 }
 0x33b   : > { %v5980_v4 = vadd.f32 %v9455_v49, %v11354_v57  ;;  %9386 = vmatmul.mubr.bf16.gmra.mrb[72].mxu1 %v6098_v34  ;;  %v6043_v43 = vmax.f32 %v5979_v10, 0.0 }
 0x33c   : > { %v5978_v48 = vadd.f32 %v9456_v12, %v11354_v57  ;;  %v6041_v19 = vmax.f32 %v5977_v40, 0.0 }
 0x33d   : > { %v6044_v53 = vmax.f32 %v5980_v4, 0.0 }
 0x33e   : > { %v6042_v20 = vmax.f32 %v5978_v48, 0.0  ;;  %v9315_v29 = vpop.f32.mrb[16].mxu0 }
 0x33f   : > { %v9457_v39 = vadd.f32 %v9315_v29, %v11254_v14  ;;  %v5511_v8 = vpop.f32.mrb[17].mxu0  ;;  %v6100_v25 = vpack.c.bf16 %v6044_v53, %v6043_v43 }
 0x340   : > { %v9458_v27 = vadd.f32 %v5511_v8, %v11256_v9  ;;  %v9316_v0 = vpop.f32.mrb[18].mxu0  ;;  %v6099_v59 = vpack.c.bf16 %v6042_v20, %v6041_v19 }
 0x341   : > { %v5983_v36 = vadd.f32 %v9457_v39, %v11354_v57  ;;  %v9459_v52 = vadd.f32 %v9316_v0, %v11258_v44  ;;  %v5514_v61 = vpop.f32.mrb[19].mxu0 }
 0x342   : > { %v5981_v41 = vadd.f32 %v9458_v27, %v11354_v57  ;;  %v9460_v11 = vadd.f32 %v5514_v61, %v11260_v38  ;;  %9389 = vmatprep.mubr.bf16.mxu1 %v6099_v59 }
 0x343   : > { %v5984_v50 = vadd.f32 %v9459_v52, %v11354_v57  ;;  %9390 = vmatmul.mubr.bf16.gmra.mrb[76].mxu1 %v6100_v25  ;;  %v6047_v47 = vmax.f32 %v5983_v36, 0.0 }
 0x344   : > { %v5982_v14 = vadd.f32 %v9460_v11, %v11354_v57  ;;  %v6045_v9 = vmax.f32 %v5981_v41, 0.0 }
 0x345   : > { %v6048_v13 = vmax.f32 %v5984_v50, 0.0 }
 0x346   : > { %v6046_v15 = vmax.f32 %v5982_v14, 0.0  ;;  %v9319_v46 = vpop.f32.mrb[20].mxu0 }
 0x347   : > { %v9461_v34 = vadd.f32 %v9319_v46, %v11263_v60  ;;  %v5527_v1 = vpop.f32.mrb[21].mxu0  ;;  %v6102_v44 = vpack.c.bf16 %v6048_v13, %v6047_v47 }
 0x348   : > { %v9462_v21 = vadd.f32 %v5527_v1, %v11265_v32  ;;  %v9320_v23 = vpop.f32.mrb[22].mxu0  ;;  %v6101_v10 = vpack.c.bf16 %v6046_v15, %v6045_v9 }
 0x349   : > { %v5987_v38 = vadd.f32 %v9461_v34, %v11354_v57  ;;  %v9463_v49 = vadd.f32 %v9320_v23, %v11267_v17  ;;  %v5530_v42 = vpop.f32.mrb[23].mxu0 }
 0x34a   : > { %v5985_v40 = vadd.f32 %v9462_v21, %v11354_v57  ;;  %v9464_v12 = vadd.f32 %v5530_v42, %v11269_v28  ;;  %9393 = vmatprep.mubr.bf16.mxu1 %v6101_v10 }
 0x34b   : > { %v5988_v4 = vadd.f32 %v9463_v49, %v11354_v57  ;;  %9394 = vmatmul.mubr.bf16.gmra.mrb[80].mxu1 %v6102_v44  ;;  %v6051_v48 = vmax.f32 %v5987_v38, 0.0 }
 0x34c   : > { %v5986_v60 = vadd.f32 %v9464_v12, %v11354_v57  ;;  %v6049_v32 = vmax.f32 %v5985_v40, 0.0 }
 0x34d   : > { %v6052_v43 = vmax.f32 %v5988_v4, 0.0 }
 0x34e   : > { %v6050_v53 = vmax.f32 %v5986_v60, 0.0  ;;  %v9323_v19 = vpop.f32.mrb[24].mxu0 }
 0x34f   : > { %v9465_v20 = vadd.f32 %v9323_v19, %v11271_v62  ;;  %v5543_v29 = vpop.f32.mrb[25].mxu0  ;;  %v6104_v17 = vpack.c.bf16 %v6052_v43, %v6051_v48 }
 0x350   : > { %v9466_v39 = vadd.f32 %v5543_v29, %v11273_v37  ;;  %v9324_v8 = vpop.f32.mrb[26].mxu0  ;;  %v6103_v25 = vpack.c.bf16 %v6050_v53, %v6049_v32 }
 0x351   : > { %v5991_v28 = vadd.f32 %v9465_v20, %v11354_v57  ;;  %v9467_v27 = vadd.f32 %v9324_v8, %v11275_v18  ;;  %v5546_v0 = vpop.f32.mrb[27].mxu0 }
 0x352   : > { %v5989_v59 = vadd.f32 %v9466_v39, %v11354_v57  ;;  %v9468_v36 = vadd.f32 %v5546_v0, %v11277_v7  ;;  %9397 = vmatprep.mubr.bf16.mxu1 %v6103_v25 }
 0x353   : > { %v5992_v52 = vadd.f32 %v9467_v27, %v11354_v57  ;;  %9398 = vmatmul.mubr.bf16.gmra.mrb[84].mxu1 %v6104_v17  ;;  %v6055_v61 = vmax.f32 %v5991_v28, 0.0 }
 0x354   : > { %v5990_v62 = vadd.f32 %v9468_v36, %v11354_v57  ;;  %v6053_v37 = vmax.f32 %v5989_v59, 0.0 }
 0x355   : > { %v6056_v41 = vmax.f32 %v5992_v52, 0.0 }
 0x356   : > { %v6054_v11 = vmax.f32 %v5990_v62, 0.0  ;;  %v9327_v50 = vpop.f32.mrb[28].mxu0 }
 0x357   : > { %v9469_v14 = vadd.f32 %v9327_v50, %v11279_v26  ;;  %v5559_v47 = vpop.f32.mrb[29].mxu0  ;;  %v6106_v18 = vpack.c.bf16 %v6056_v41, %v6055_v61 }
 0x358   : > { %v9470_v13 = vadd.f32 %v5559_v47, %v11281_v58  ;;  %v9328_v9 = vpop.f32.mrb[30].mxu0  ;;  %v6105_v15 = vpack.c.bf16 %v6054_v11, %v6053_v37 }
 0x359   : > { %v5995_v7 = vadd.f32 %v9469_v14, %v11354_v57  ;;  %v9471_v46 = vadd.f32 %v9328_v9, %v11283_v45  ;;  %v5562_v34 = vpop.f32.mrb[31].mxu0 }
 0x35a   : > { %v5993_v1 = vadd.f32 %v9470_v13, %v11354_v57  ;;  %v9472_v44 = vadd.f32 %v5562_v34, %v11285_v5  ;;  %9401 = vmatprep.mubr.bf16.mxu1 %v6105_v15 }
 0x35b   : > { %v5996_v21 = vadd.f32 %v9471_v46, %v11354_v57  ;;  %9402 = vmatmul.mubr.bf16.gmra.mrb[88].mxu1 %v6106_v18  ;;  %v6059_v23 = vmax.f32 %v5995_v7, 0.0 }
 0x35c   : > { %v5994_v26 = vadd.f32 %v9472_v44, %v11354_v57  ;;  %v6057_v58 = vmax.f32 %v5993_v1, 0.0 }
 0x35d   : > { %v6060_v10 = vmax.f32 %v5996_v21, 0.0 }
 0x35e   : > { %v6058_v38 = vmax.f32 %v5994_v26, 0.0  ;;  %v9331_v49 = vpop.f32.mrb[32].mxu0 }
 0x35f   : > { %v9473_v42 = vadd.f32 %v9331_v49, %v11287_v55  ;;  %v5575_v40 = vpop.f32.mrb[33].mxu0  ;;  %v6108_v45 = vpack.c.bf16 %v6060_v10, %v6059_v23 }
 0x360   : > { %v9474_v12 = vadd.f32 %v5575_v40, %v11289_v24  ;;  %v9332_v4 = vpop.f32.mrb[34].mxu0  ;;  %v6107_v60 = vpack.c.bf16 %v6058_v38, %v6057_v58 }
 0x361   : > { %v5999_v5 = vadd.f32 %v9473_v42, %v11354_v57  ;;  %v9475_v48 = vadd.f32 %v9332_v4, %v11291_v16  ;;  %v5578_v43 = vpop.f32.mrb[35].mxu0  ;;  %v14109_v4 = vld [vmem:[#allocation12_spill] sm:$0xff] }
 0x362   : > { %v5997_v32 = vadd.f32 %v9474_v12, %v11354_v57  ;;  %v9476_v53 = vadd.f32 %v5578_v43, %v11293_v22  ;;  %9405 = vmatprep.mubr.bf16.mxu1 %v6107_v60 }
 0x363   : > { %v6000_v19 = vadd.f32 %v9475_v48, %v11354_v57  ;;  %9406 = vmatmul.mubr.bf16.gmra.mrb[92].mxu1 %v6108_v45  ;;  %v6063_v20 = vmax.f32 %v5999_v5, 0.0 }
 0x364   : > { %v5998_v55 = vadd.f32 %v9476_v53, %v11354_v57  ;;  %v6061_v24 = vmax.f32 %v5997_v32, 0.0 }
 0x365   : > { %v6064_v29 = vmax.f32 %v6000_v19, 0.0  ;;  %v14110_v19 = vld [vmem:[#allocation13_spill] sm:$0xff] }
 0x366   : > { %v6062_v17 = vmax.f32 %v5998_v55, 0.0  ;;  %v9335_v39 = vpop.f32.mrb[36].mxu0 }
 0x367   : > { %v9477_v8 = vadd.f32 %v9335_v39, %v11295_v30  ;;  %v5591_v25 = vpop.f32.mrb[37].mxu0  ;;  %v6110_v16 = vpack.c.bf16 %v6064_v29, %v6063_v20  ;;  %v14111_v29 = vld [vmem:[#allocation14_spill] sm:$0xff] }
 0x368   : > { %v9478_v28 = vadd.f32 %v5591_v25, %v11297_v33  ;;  %v9336_v27 = vpop.f32.mrb[38].mxu0  ;;  %v6109_v0 = vpack.c.bf16 %v6062_v17, %v6061_v24  ;;  %v14112_v25 = vld [vmem:[#allocation15_spill] sm:$0xff] }
 0x369   : > { %v6003_v22 = vadd.f32 %v9477_v8, %v11354_v57  ;;  %v9479_v59 = vadd.f32 %v9336_v27, %v11299_v54  ;;  %v5594_v36 = vpop.f32.mrb[39].mxu0 }
 0x36a   : > { %v6001_v52 = vadd.f32 %v9478_v28, %v11354_v57  ;;  %v9480_v62 = vadd.f32 %v5594_v36, %v11301_v63  ;;  %9409 = vmatprep.mubr.bf16.mxu1 %v6109_v0  ;;  %v14113_v0 = vld [vmem:[#allocation21_spill] sm:$0xff] }
 0x36b   : > { %v6004_v61 = vadd.f32 %v9479_v59, %v11354_v57  ;;  %9410 = vmatmul.mubr.bf16.gmra.mrb[96].mxu1 %v6110_v16  ;;  %v6067_v41 = vmax.f32 %v6003_v22, 0.0 }
 0x36c   : > { %v6002_v30 = vadd.f32 %v9480_v62, %v11354_v57  ;;  %v6065_v33 = vmax.f32 %v6001_v52, 0.0 }
 0x36d   : > { %v6068_v37 = vmax.f32 %v6004_v61, 0.0 }
 0x36e   : > { %v6066_v11 = vmax.f32 %v6002_v30, 0.0  ;;  %v9339_v50 = vpop.f32.mrb[40].mxu0 }
 0x36f   : > { %v9481_v14 = vadd.f32 %v9339_v50, %v11303_v31  ;;  %v5607_v47 = vpop.f32.mrb[41].mxu0  ;;  %v6112_v54 = vpack.c.bf16 %v6068_v37, %v6067_v41  ;;  %v14114_v37 = vld [vmem:[#allocation8_spill] sm:$0xff] }
 0x370   : > { %v9482_v18 = vadd.f32 %v5607_v47, %v11305_v35  ;;  %v9340_v13 = vpop.f32.mrb[42].mxu0  ;;  %v6111_v9 = vpack.c.bf16 %v6066_v11, %v6065_v33 }
 0x371   : > { %v6007_v63 = vadd.f32 %v9481_v14, %v11354_v57  ;;  %v9483_v15 = vadd.f32 %v9340_v13, %v11307_v51  ;;  %v5610_v7 = vpop.f32.mrb[43].mxu0  ;;  %v14115_v14 = vld [vmem:[#allocation9_spill] sm:$0xff] }
 0x372   : > { %v6005_v46 = vadd.f32 %v9482_v18, %v11354_v57  ;;  %v9484_v34 = vadd.f32 %v5610_v7, %v11309_v56  ;;  %9413 = vmatprep.mubr.bf16.mxu1 %v6111_v9  ;;  %v14116_v9 = vld [vmem:[#allocation10_spill] sm:$0xff] }
 0x373   : > { %v6008_v1 = vadd.f32 %v9483_v15, %v11354_v57  ;;  %9414 = vmatmul.mubr.bf16.gmra.mrb[100].mxu1 %v6112_v54  ;;  %v6071_v44 = vmax.f32 %v6007_v63, 0.0 }
 0x374   : > { %v6006_v31 = vadd.f32 %v9484_v34, %v11354_v57  ;;  %v6069_v35 = vmax.f32 %v6005_v46, 0.0  ;;  %v14117_v46 = vld [vmem:[#allocation16_spill] sm:$0xff] }
 0x375   : > { %v6072_v21 = vmax.f32 %v6008_v1, 0.0 }
 0x376   : > { %v6070_v26 = vmax.f32 %v6006_v31, 0.0  ;;  %v9343_v23 = vpop.f32.mrb[44].mxu0 }
 0x377   : > { %v9485_v10 = vadd.f32 %v9343_v23, %v11311_v2  ;;  %v5623_v58 = vpop.f32.mrb[45].mxu0  ;;  %v6114_v51 = vpack.c.bf16 %v6072_v21, %v6071_v44 }
 0x378   : > { %v9486_v38 = vadd.f32 %v5623_v58, %v11313_v3  ;;  %v9344_v49 = vpop.f32.mrb[46].mxu0  ;;  %v6113_v42 = vpack.c.bf16 %v6070_v26, %v6069_v35 }
 0x379   : > { %v6011_v56 = vadd.f32 %v9485_v10, %v11354_v57  ;;  %v9487_v40 = vadd.f32 %v9344_v49, %v11315_v6  ;;  %v5626_v45 = vpop.f32.mrb[47].mxu0  ;;  %v14118_v10 = vld [vmem:[#allocation11_spill] sm:$0xff]  ;;  %v14119_v49 = vld [vmem:[#allocation17_spill] sm:$0xff] }
 0x37a   : > { %v6009_v12 = vadd.f32 %v9486_v38, %v11354_v57  ;;  %v9488_v60 = vadd.f32 %v5626_v45, %v14109_v4  ;;  %9417 = vmatprep.mubr.bf16.mxu1 %v6113_v42 }
 0x37b   : > { %v6012_v5 = vadd.f32 %v9487_v40, %v11354_v57  ;;  %9418 = vmatmul.mubr.bf16.gmra.mrb[104].mxu1 %v6114_v51  ;;  %v6075_v48 = vmax.f32 %v6011_v56, 0.0 }
 0x37c   : > { %v6010_v2 = vadd.f32 %v9488_v60, %v11354_v57  ;;  %v6073_v3 = vmax.f32 %v6009_v12, 0.0  ;;  %v14120_v12 = vld [vmem:[#allocation18_spill] sm:$0xff] }
 0x37d   : > { %v6076_v43 = vmax.f32 %v6012_v5, 0.0 }
 0x37e   : > { %v6074_v32 = vmax.f32 %v6010_v2, 0.0  ;;  %v9347_v53 = vpop.f32.mrb[48].mxu0  ;;  %v14121_v2 = vld [vmem:[#allocation19_spill] sm:$0xff] }
 0x37f   : > { %v9489_v55 = vadd.f32 %v9347_v53, %v14110_v19  ;;  %v5639_v20 = vpop.f32.mrb[49].mxu0  ;;  %v6116_v6 = vpack.c.bf16 %v6076_v43, %v6075_v48 }
 0x380   : > { %v9490_v24 = vadd.f32 %v5639_v20, %v14111_v29  ;;  %v9348_v17 = vpop.f32.mrb[50].mxu0  ;;  %v6115_v39 = vpack.c.bf16 %v6074_v32, %v6073_v3 }
 0x381   : > { %v6015_v8 = vadd.f32 %v9489_v55, %v11354_v57  ;;  %v9491_v16 = vadd.f32 %v9348_v17, %v14112_v25  ;;  %v5642_v28 = vpop.f32.mrb[51].mxu0 }
 0x382   : > { %v6013_v27 = vadd.f32 %v9490_v24, %v11354_v57  ;;  %v9492_v22 = vadd.f32 %v5642_v28, %v14113_v0  ;;  %9421 = vmatprep.mubr.bf16.mxu1 %v6115_v39  ;;  %v14123_v39 = vld [vmem:[#allocation22_spill] sm:$0xff] }
 0x383   : > { %v6016_v59 = vadd.f32 %v9491_v16, %v11354_v57  ;;  %9422 = vmatmul.mubr.bf16.gmra.mrb[108].mxu1 %v6116_v6  ;;  %v6079_v52 = vmax.f32 %v6015_v8, 0.0  ;;  %v14122_v6 = vld [vmem:[#allocation20_spill] sm:$0xff] }
 0x384   : > { %v6014_v36 = vadd.f32 %v9492_v22, %v11354_v57  ;;  %v6077_v61 = vmax.f32 %v6013_v27, 0.0  ;;  %v14124_v27 = vld [vmem:[#allocation23_spill] sm:$0xff] }
 0x385   : > { %v6080_v62 = vmax.f32 %v6016_v59, 0.0 }
 0x386   : > { %v6078_v30 = vmax.f32 %v6014_v36, 0.0  ;;  %v9351_v41 = vpop.f32.mrb[52].mxu0  ;;  %v14125_v36 = vld [vmem:[#allocation24_spill] sm:$0xff] }
 0x387   : > { %v9493_v33 = vadd.f32 %v9351_v41, %v14114_v37  ;;  %v5655_v11 = vpop.f32.mrb[53].mxu0  ;;  %v6118_v50 = vpack.c.bf16 %v6080_v62, %v6079_v52 }
 0x388   : > { %v9494_v47 = vadd.f32 %v5655_v11, %v14115_v14  ;;  %v9352_v54 = vpop.f32.mrb[54].mxu0  ;;  %v6117_v18 = vpack.c.bf16 %v6078_v30, %v6077_v61  ;;  %v11487_v14 = vld [vmem:[%s13846_s4] ss:$0 sm:$0xff] }
 0x389   : > { %v6019_v13 = vadd.f32 %v9493_v33, %v11354_v57  ;;  %v9495_v63 = vadd.f32 %v9352_v54, %v14116_v9  ;;  %v5658_v15 = vpop.f32.mrb[55].mxu0 }
 0x38a   : > { %v6017_v7 = vadd.f32 %v9494_v47, %v11354_v57  ;;  %v9496_v34 = vadd.f32 %v5658_v15, %v14117_v46  ;;  %9425 = vmatprep.mubr.bf16.mxu1 %v6117_v18 }
 0x38b   : > { %v6020_v1 = vadd.f32 %v9495_v63, %v11354_v57  ;;  %9426 = vmatmul.mubr.bf16.gmra.mrb[112].mxu1 %v6118_v50  ;;  %v6083_v44 = vmax.f32 %v6019_v13, 0.0 }
 0x38c   : > { %v6018_v31 = vadd.f32 %v9496_v34, %v11354_v57  ;;  %v6081_v35 = vmax.f32 %v6017_v7, 0.0 }
 0x38d   : > { %v6084_v21 = vmax.f32 %v6020_v1, 0.0 }
 0x38e   : > { %v6082_v26 = vmax.f32 %v6018_v31, 0.0  ;;  %v9355_v23 = vpop.f32.mrb[56].mxu0 }
 0x38f   : > { %v9497_v58 = vadd.f32 %v9355_v23, %v14118_v10  ;;  %v5671_v51 = vpop.f32.mrb[57].mxu0  ;;  %v6120_v38 = vpack.c.bf16 %v6084_v21, %v6083_v44 }
 0x390   : > { %v9498_v42 = vadd.f32 %v5671_v51, %v14119_v49  ;;  %v9356_v56 = vpop.f32.mrb[58].mxu0  ;;  %v6119_v40 = vpack.c.bf16 %v6082_v26, %v6081_v35 }
 0x391   : > { %v6023_v45 = vadd.f32 %v9497_v58, %v11354_v57  ;;  %v9499_v4 = vadd.f32 %v9356_v56, %v14120_v12  ;;  %v5674_v60 = vpop.f32.mrb[59].mxu0 }
 0x392   : > { %v6021_v5 = vadd.f32 %v9498_v42, %v11354_v57  ;;  %v9500_v48 = vadd.f32 %v5674_v60, %v14121_v2  ;;  %9429 = vmatprep.mubr.bf16.mxu1 %v6119_v40 }
 0x393   : > { %v6024_v43 = vadd.f32 %v9499_v4, %v11354_v57  ;;  %9430 = vmatmul.mubr.bf16.gmra.mrb[116].mxu1 %v6120_v38  ;;  %v6087_v32 = vmax.f32 %v6023_v45, 0.0 }
 0x394   : > { %v6022_v3 = vadd.f32 %v9500_v48, %v11354_v57  ;;  %v6085_v19 = vmax.f32 %v6021_v5, 0.0 }
 0x395   : > { %v6088_v53 = vmax.f32 %v6024_v43, 0.0 }
 0x396   : > { %v6086_v55 = vmax.f32 %v6022_v3, 0.0  ;;  %v9359_v20 = vpop.f32.mrb[60].mxu0 }
 0x397   : > { %v9501_v29 = vadd.f32 %v9359_v20, %v14122_v6  ;;  %v5687_v24 = vpop.f32.mrb[61].mxu0  ;;  %v6122_v17 = vpack.c.bf16 %v6088_v53, %v6087_v32 }
 0x398   : > { %v9502_v8 = vadd.f32 %v5687_v24, %v14123_v39  ;;  %v9360_v25 = vpop.f32.mrb[62].mxu0  ;;  %v6121_v16 = vpack.c.bf16 %v6086_v55, %v6085_v19 }
 0x399   : > { %v6027_v28 = vadd.f32 %v9501_v29, %v11354_v57  ;;  %v9503_v0 = vadd.f32 %v9360_v25, %v14124_v27  ;;  %v5690_v22 = vpop.f32.mrb[63].mxu0 }
 0x39a   : > { %v6025_v59 = vadd.f32 %v9502_v8, %v11354_v57  ;;  %v9504_v52 = vadd.f32 %v5690_v22, %v14125_v36  ;;  %9433 = vmatprep.mubr.bf16.mxu1 %v6121_v16 }
 0x39b   : > { %v6028_v62 = vadd.f32 %v9503_v0, %v11354_v57  ;;  %9434 = vmatmul.mubr.bf16.gmra.mrb[120].mxu1 %v6122_v17  ;;  %v6091_v30 = vmax.f32 %v6027_v28, 0.0 }
 0x39c   : > { %v6026_v61 = vadd.f32 %v9504_v52, %v11354_v57  ;;  %v6089_v37 = vmax.f32 %v6025_v59, 0.0 }
 0x39d   : > { %v6092_v41 = vmax.f32 %v6028_v62, 0.0 }
 0x39e   : > { %v6090_v33 = vmax.f32 %v6026_v61, 0.0 }
 0x39f   : > { %v6124_v11 = vpack.c.bf16 %v6092_v41, %v6091_v30 }
 0x3a0   : > { %v6123_v50 = vpack.c.bf16 %v6090_v33, %v6089_v37 }
 0x3a2   : > { %9437 = vmatprep.mubr.bf16.mxu1 %v6123_v50 }
 0x3a3   : > { %9438 = vmatmul.mubr.bf16.gmra.mrb[124].mxu1 %v6124_v11 }
 0x3fe   : > { %v9379_v47 = vpop.f32.mrb[64].mxu1 }
 0x3ff   : > { %v11490_v54 = vadd.f32 %v9379_v47, %v11487_v14  ;;  %v6230_v18 = vpop.f32.mrb[65].mxu1 }
 0x400   : > { %v11493_v57 = vadd.f32 %v11487_v14, %v6230_v18  ;;  %v9380_v13 = vpop.f32.mrb[66].mxu1 }
 0x401   : > { %14126 = vst [vmem:[#allocation12_spill] sm:$0xff] %v11490_v54  ;;  %6629 = vrot.lane.b32.xlu1 %v11490_v54, %s10230_s15  ;;  %v6233_v9 = vpop.f32.mrb[67].mxu1  ;;  %v11500_v63 = vadd.f32 %v9380_v13, %v11487_v14 }
 0x402   : > { %14127 = vst [vmem:[#allocation13_spill] sm:$0xff] %v11493_v57  ;;  %6625 = vrot.lane.b32.xlu0 %v11493_v57, %s10230_s15  ;;  %v11503_v15 = vadd.f32 %v11487_v14, %v6233_v9 }
 0x403   : > { %14128 = vst [vmem:[#allocation14_spill] sm:$0xff] %v11500_v63 }
 0x404   : > { %14129 = vst [vmem:[#allocation15_spill] sm:$0xff] %v11503_v15 }
 0x405   : > { %6631 = vrot.lane.b32.xlu1 %v11500_v63, %s10230_s15 }
 0x406   : > { %v9383_v7 = vpop.f32.mrb[68].mxu1  ;;  %6627 = vrot.lane.b32.xlu0 %v11503_v15, %s10230_s15 }
 0x407   : > { %v11510_v46 = vadd.f32 %v9383_v7, %v11487_v14  ;;  %v6246_v34 = vpop.f32.mrb[69].mxu1 }
 0x408   : > { %v9384_v1 = vpop.f32.mrb[70].mxu1  ;;  %v11520_v21 = vadd.f32 %v11487_v14, %v6246_v34 }
 0x409   : > { %14130 = vst [vmem:[#allocation21_spill] sm:$0xff] %v11510_v46  ;;  %v11513_v31 = vadd.f32 %v9384_v1, %v11487_v14  ;;  %v6249_v44 = vpop.f32.mrb[71].mxu1 }
 0x40a   : > { %6637 = vrot.lane.b32.xlu0 %v11510_v46, %s10230_s15  ;;  %14132 = vst [vmem:[#allocation9_spill] sm:$0xff] %v11520_v21  ;;  %v11523_v35 = vadd.f32 %v11487_v14, %v6249_v44 }
 0x40b   : > { %14131 = vst [vmem:[#allocation8_spill] sm:$0xff] %v11513_v31  ;;  %6639 = vrot.lane.b32.xlu1 %v11513_v31, %s10230_s15 }
 0x40c   : > { %14133 = vst [vmem:[#allocation10_spill] sm:$0xff] %v11523_v35 }
 0x40e   : > { %v9387_v26 = vpop.f32.mrb[72].mxu1  ;;  %6633 = vrot.lane.b32.xlu0 %v11520_v21, %s10230_s15 }
 0x40f   : > { %v11528_v23 = vadd.f32 %v9387_v26, %v11487_v14  ;;  %v6262_v10 = vpop.f32.mrb[73].mxu1  ;;  %6635 = vrot.lane.b32.xlu1 %v11523_v35, %s10230_s15 }
 0x410   : > { %v9388_v58 = vpop.f32.mrb[74].mxu1  ;;  %v11540_v49 = vadd.f32 %v11487_v14, %v6262_v10 }
 0x411   : > { %14134 = vst [vmem:[#allocation16_spill] sm:$0xff] %v11528_v23  ;;  %v11533_v51 = vadd.f32 %v9388_v58, %v11487_v14  ;;  %v6265_v38 = vpop.f32.mrb[75].mxu1 }
 0x412   : > { %6645 = vrot.lane.b32.xlu0 %v11528_v23, %s10230_s15  ;;  %14136 = vst [vmem:[#allocation17_spill] sm:$0xff] %v11540_v49  ;;  %v11543_v42 = vadd.f32 %v11487_v14, %v6265_v38 }
 0x413   : > { %14135 = vst [vmem:[#allocation11_spill] sm:$0xff] %v11533_v51  ;;  %6647 = vrot.lane.b32.xlu1 %v11533_v51, %s10230_s15 }
 0x414   : > { %14137 = vst [vmem:[#allocation18_spill] sm:$0xff] %v11543_v42 }
 0x416   : > { %v9391_v56 = vpop.f32.mrb[76].mxu1  ;;  %6641 = vrot.lane.b32.xlu0 %v11540_v49, %s10230_s15 }
 0x417   : > { %v11548_v40 = vadd.f32 %v9391_v56, %v11487_v14  ;;  %v6278_v45 = vpop.f32.mrb[77].mxu1  ;;  %6643 = vrot.lane.b32.xlu1 %v11543_v42, %s10230_s15 }
 0x418   : > { %v9392_v12 = vpop.f32.mrb[78].mxu1  ;;  %v11560_v5 = vadd.f32 %v11487_v14, %v6278_v45 }
 0x419   : > { %14138 = vst [vmem:[#allocation19_spill] sm:$0xff] %v11548_v40  ;;  %v11553_v4 = vadd.f32 %v9392_v12, %v11487_v14  ;;  %v6281_v60 = vpop.f32.mrb[79].mxu1 }
 0x41a   : > { %6653 = vrot.lane.b32.xlu0 %v11548_v40, %s10230_s15  ;;  %14140 = vst [vmem:[#allocation22_spill] sm:$0xff] %v11560_v5  ;;  %v11563_v2 = vadd.f32 %v11487_v14, %v6281_v60  ;;  %v6485_v60 = vlaneseq }
 0x41b   : > { %14139 = vst [vmem:[#allocation20_spill] sm:$0xff] %v11553_v4  ;;  %6655 = vrot.lane.b32.xlu1 %v11553_v4, %s10230_s15 }
 0x41c   : > { %14141 = vst [vmem:[#allocation23_spill] sm:$0xff] %v11563_v2 }
 0x41e   : > { %v9395_v48 = vpop.f32.mrb[80].mxu1  ;;  %6649 = vrot.lane.b32.xlu0 %v11560_v5, %s10230_s15 }
 0x41f   : > { %v11568_v43 = vadd.f32 %v9395_v48, %v11487_v14  ;;  %v6294_v3 = vpop.f32.mrb[81].mxu1  ;;  %6651 = vrot.lane.b32.xlu1 %v11563_v2, %s10230_s15 }
 0x420   : > { %v9396_v32 = vpop.f32.mrb[82].mxu1  ;;  %v11580_v55 = vadd.f32 %v11487_v14, %v6294_v3 }
 0x421   : > { %14142 = vst [vmem:[#allocation24_spill] sm:$0xff] %v11568_v43  ;;  %v11573_v53 = vadd.f32 %v9396_v32, %v11487_v14  ;;  %v6297_v19 = vpop.f32.mrb[83].mxu1  ;;  %v6498_v32 = vshrl.u32 %v6485_v60, 7 }
 0x422   : > { %6661 = vrot.lane.b32.xlu0 %v11568_v43, %s10230_s15  ;;  %14144 = vst [vmem:[#allocation26_spill] sm:$0xff] %v11580_v55  ;;  %v11583_v20 = vadd.f32 %v11487_v14, %v6297_v19 }
 0x423   : > { %14143 = vst [vmem:[#allocation25_spill] sm:$0xff] %v11573_v53  ;;  %6663 = vrot.lane.b32.xlu1 %v11573_v53, %s10230_s15 }
 0x424   : > { %14145 = vst [vmem:[#allocation27_spill] sm:$0xff] %v11583_v20 }
 0x426   : > { %v9399_v6 = vpop.f32.mrb[84].mxu1  ;;  %6657 = vrot.lane.b32.xlu0 %v11580_v55, %s10230_s15 }
 0x427   : > { %v11588_v29 = vadd.f32 %v9399_v6, %v11487_v14  ;;  %v6310_v24 = vpop.f32.mrb[85].mxu1  ;;  %6659 = vrot.lane.b32.xlu1 %v11583_v20, %s10230_s15  ;;  %v11687_v6 = vand.u32 127, %v6485_v60 }
 0x428   : > { %v9400_v17 = vpop.f32.mrb[86].mxu1  ;;  %v11600_v25 = vadd.f32 %v11487_v14, %v6310_v24 }
 0x429   : > { %14146 = vst [vmem:[#allocation28_spill] sm:$0xff] %v11588_v29  ;;  %v11593_v39 = vadd.f32 %v9400_v17, %v11487_v14  ;;  %v6313_v8 = vpop.f32.mrb[87].mxu1  ;;  %14166 = vst [vmem:[#allocation48_spill] sm:$0xff] %v11687_v6 }
 0x42a   : > { %6669 = vrot.lane.b32.xlu0 %v11588_v29, %s10230_s15  ;;  %14148 = vst [vmem:[#allocation30_spill] sm:$0xff] %v11600_v25  ;;  %v11603_v16 = vadd.f32 %v11487_v14, %v6313_v8 }
 0x42b   : > { %14147 = vst [vmem:[#allocation29_spill] sm:$0xff] %v11593_v39  ;;  %6671 = vrot.lane.b32.xlu1 %v11593_v39, %s10230_s15 }
 0x42c   : > { %14149 = vst [vmem:[#allocation31_spill] sm:$0xff] %v11603_v16 }
 0x42e   : > { %v9403_v28 = vpop.f32.mrb[88].mxu1  ;;  %6665 = vrot.lane.b32.xlu0 %v11600_v25, %s10230_s15 }
 0x42f   : > { %v11608_v27 = vadd.f32 %v9403_v28, %v11487_v14  ;;  %v6326_v0 = vpop.f32.mrb[89].mxu1  ;;  %6667 = vrot.lane.b32.xlu1 %v11603_v16, %s10230_s15 }
 0x430   : > { %v9404_v22 = vpop.f32.mrb[90].mxu1  ;;  %v11620_v52 = vadd.f32 %v11487_v14, %v6326_v0 }
 0x431   : > { %14150 = vst [vmem:[#allocation32_spill] sm:$0xff] %v11608_v27  ;;  %v11613_v59 = vadd.f32 %v9404_v22, %v11487_v14  ;;  %v6329_v36 = vpop.f32.mrb[91].mxu1  ;;  %v6499_v22 = vadd.s32 8, %v6498_v32 }
 0x432   : > { %6677 = vrot.lane.b32.xlu0 %v11608_v27, %s10230_s15  ;;  %14152 = vst [vmem:[#allocation34_spill] sm:$0xff] %v11620_v52  ;;  %v11623_v62 = vadd.f32 %v11487_v14, %v6329_v36  ;;  %v6500_v36 = vadd.s32 16, %v6498_v32 }
 0x433   : > { %14151 = vst [vmem:[#allocation33_spill] sm:$0xff] %v11613_v59  ;;  %6679 = vrot.lane.b32.xlu1 %v11613_v59, %s10230_s15 }
 0x434   : > { %14153 = vst [vmem:[#allocation35_spill] sm:$0xff] %v11623_v62 }
 0x436   : > { %v9407_v61 = vpop.f32.mrb[92].mxu1  ;;  %6673 = vrot.lane.b32.xlu0 %v11620_v52, %s10230_s15 }
 0x437   : > { %v11628_v30 = vadd.f32 %v9407_v61, %v11487_v14  ;;  %v6342_v41 = vpop.f32.mrb[93].mxu1  ;;  %6675 = vrot.lane.b32.xlu1 %v11623_v62, %s10230_s15  ;;  %v6501_v61 = vadd.s32 24, %v6498_v32 }
 0x438   : > { %v9408_v37 = vpop.f32.mrb[94].mxu1  ;;  %v11640_v50 = vadd.f32 %v11487_v14, %v6342_v41  ;;  %v11700_v41 = vadd.s32 4294967293, %v11687_v6 }
 0x439   : > { %14154 = vst [vmem:[#allocation36_spill] sm:$0xff] %v11628_v30  ;;  %v11633_v33 = vadd.f32 %v9408_v37, %v11487_v14  ;;  %v6345_v11 = vpop.f32.mrb[95].mxu1 }
 0x43a   : > { %6685 = vrot.lane.b32.xlu0 %v11628_v30, %s10230_s15  ;;  %14156 = vst [vmem:[#allocation38_spill] sm:$0xff] %v11640_v50  ;;  %v11643_v47 = vadd.f32 %v11487_v14, %v6345_v11  ;;  %14169 = vst [vmem:[#allocation51_spill] sm:$0xff] %v11700_v41 }
 0x43b   : > { %14155 = vst [vmem:[#allocation37_spill] sm:$0xff] %v11633_v33  ;;  %6687 = vrot.lane.b32.xlu1 %v11633_v33, %s10230_s15 }
 0x43c   : > { %14157 = vst [vmem:[#allocation39_spill] sm:$0xff] %v11643_v47 }
 0x43e   : > { %v9411_v18 = vpop.f32.mrb[96].mxu1  ;;  %6681 = vrot.lane.b32.xlu0 %v11640_v50, %s10230_s15 }
 0x43f   : > { %v11648_v13 = vadd.f32 %v9411_v18, %v11487_v14  ;;  %v6358_v9 = vpop.f32.mrb[97].mxu1  ;;  %6683 = vrot.lane.b32.xlu1 %v11643_v47, %s10230_s15  ;;  %v6502_v18 = vcvt.s32.f32 %v6498_v32 }
 0x440   : > { %v9412_v7 = vpop.f32.mrb[98].mxu1  ;;  %v11660_v44 = vadd.f32 %v11487_v14, %v6358_v9  ;;  %v6503_v9 = vcvt.s32.f32 %v6499_v22 }
 0x441   : > { %14158 = vst [vmem:[#allocation40_spill] sm:$0xff] %v11648_v13  ;;  %v11653_v34 = vadd.f32 %v9412_v7, %v11487_v14  ;;  %v6361_v1 = vpop.f32.mrb[99].mxu1  ;;  %v6504_v7 = vcvt.s32.f32 %v6500_v36 }
 0x442   : > { %6693 = vrot.lane.b32.xlu0 %v11648_v13, %s10230_s15  ;;  %14160 = vst [vmem:[#allocation42_spill] sm:$0xff] %v11660_v44  ;;  %v11663_v26 = vadd.f32 %v11487_v14, %v6361_v1  ;;  %v6505_v1 = vcvt.s32.f32 %v6501_v61 }
 0x443   : > { %14159 = vst [vmem:[#allocation41_spill] sm:$0xff] %v11653_v34  ;;  %6695 = vrot.lane.b32.xlu1 %v11653_v34, %s10230_s15 }
 0x444   : > { %14161 = vst [vmem:[#allocation43_spill] sm:$0xff] %v11663_v26  ;;  %v11727_v22 = vmul.f32 8.0, %v6505_v1 }
 0x446   : > { %v9415_v10 = vpop.f32.mrb[100].mxu1  ;;  %6689 = vrot.lane.b32.xlu0 %v11660_v44, %s10230_s15 }
 0x447   : > { %v11668_v58 = vadd.f32 %v9415_v10, %v11487_v14  ;;  %v6374_v38 = vpop.f32.mrb[101].mxu1  ;;  %6691 = vrot.lane.b32.xlu1 %v11663_v26, %s10230_s15 }
 0x448   : > { %v9416_v56 = vpop.f32.mrb[102].mxu1  ;;  %v11680_v48 = vadd.f32 %v11487_v14, %v6374_v38  ;;  %v6494_v38 = vand.u32 1, %v11700_v41 }
 0x449   : > { %14162 = vst [vmem:[#allocation44_spill] sm:$0xff] %v11668_v58  ;;  %v11673_v45 = vadd.f32 %v9416_v56, %v11487_v14  ;;  %v6377_v12 = vpop.f32.mrb[103].mxu1 }
 0x44a   : > { %6701 = vrot.lane.b32.xlu0 %v11668_v58, %s10230_s15  ;;  %14164 = vst [vmem:[#allocation46_spill] sm:$0xff] %v11680_v48  ;;  %v11683_v3 = vadd.f32 %v11487_v14, %v6377_v12  ;;  %vm11731_vm2 = vcmp.eq.s32.totalorder %v6494_v38, 0 }
 0x44b   : > { %14163 = vst [vmem:[#allocation45_spill] sm:$0xff] %v11673_v45  ;;  %6703 = vrot.lane.b32.xlu1 %v11673_v45, %s10230_s15 }
 0x44c   : > { %14165 = vst [vmem:[#allocation47_spill] sm:$0xff] %v11683_v3 }
 0x44e   : > { %v9419_v19 = vpop.f32.mrb[104].mxu1  ;;  %6697 = vrot.lane.b32.xlu0 %v11680_v48, %s10230_s15 }
 0x44f   : > { %v11690_v24 = vadd.f32 %v9419_v19, %v11487_v14  ;;  %v6390_v17 = vpop.f32.mrb[105].mxu1  ;;  %6699 = vrot.lane.b32.xlu1 %v11683_v3, %s10230_s15 }
 0x450   : > { %v9420_v8 = vpop.f32.mrb[106].mxu1  ;;  %v11705_v37 = vadd.f32 %v11487_v14, %v6390_v17  ;;  %v11721_v17 = vmul.f32 8.0, %v6502_v18 }
 0x451   : > { %14167 = vst [vmem:[#allocation49_spill] sm:$0xff] %v11690_v24  ;;  %v11695_v28 = vadd.f32 %v9420_v8, %v11487_v14  ;;  %v6393_v0 = vpop.f32.mrb[107].mxu1  ;;  %v11723_v8 = vmul.f32 8.0, %v6503_v9 }
 0x452   : > { %6709 = vrot.lane.b32.xlu0 %v11690_v24, %s10230_s15  ;;  %14170 = vst [vmem:[#allocation52_spill] sm:$0xff] %v11705_v37  ;;  %v11708_v11 = vadd.f32 %v11487_v14, %v6393_v0  ;;  %v11725_v0 = vmul.f32 8.0, %v6504_v7 }
 0x453   : > { %14168 = vst [vmem:[#allocation50_spill] sm:$0xff] %v11695_v28  ;;  %6711 = vrot.lane.b32.xlu1 %v11695_v28, %s10230_s15 }
 0x454   : > { %14171 = vst [vmem:[#allocation53_spill] sm:$0xff] %v11708_v11 }
 0x456   : > { %v9423_v10 = vpop.f32.mrb[108].mxu1  ;;  %6705 = vrot.lane.b32.xlu0 %v11705_v37, %s10230_s15 }
 0x457   : > { %v11714_v56 = vadd.f32 %v9423_v10, %v11487_v14  ;;  %v6406_v12 = vpop.f32.mrb[109].mxu1  ;;  %6707 = vrot.lane.b32.xlu1 %v11708_v11, %s10230_s15 }
 0x458   : > { %v9424_v60 = vpop.f32.mrb[110].mxu1  ;;  %v11738_v61 = vadd.f32 %v11487_v14, %v6406_v12 }
 0x459   : > { %14172 = vst [vmem:[#allocation54_spill] sm:$0xff] %v11714_v56  ;;  %v11719_v19 = vadd.f32 %v9424_v60, %v11487_v14  ;;  %v6409_v32 = vpop.f32.mrb[111].mxu1 }
 0x45a   : > { %6717 = vrot.lane.b32.xlu0 %v11714_v56, %s10230_s15  ;;  %14176 = vst [vmem:[#allocation56_spill] sm:$0xff] %v11738_v61  ;;  %v11741_v18 = vadd.f32 %v11487_v14, %v6409_v32 }
 0x45b   : > { %14173 = vst [vmem:[#allocation55_spill] sm:$0xff] %v11719_v19  ;;  %6719 = vrot.lane.b32.xlu1 %v11719_v19, %s10230_s15 }
 0x45c   : > { %14177 = vst [vmem:[#allocation57_spill] sm:$0xff] %v11741_v18 }
 0x45e   : > { %v9427_v9 = vpop.f32.mrb[112].mxu1  ;;  %6713 = vrot.lane.b32.xlu0 %v11738_v61, %s10230_s15 }
 0x45f   : > { %v11758_v12 = vadd.f32 %v9427_v9, %v11487_v14  ;;  %v6422_v60 = vpop.f32.mrb[113].mxu1  ;;  %6715 = vrot.lane.b32.xlu1 %v11741_v18, %s10230_s15 }
 0x460   : > { %v9428_v38 = vpop.f32.mrb[114].mxu1  ;;  %v11824_v7 = vadd.f32 %v11487_v14, %v6422_v60 }
 0x461   : > { %14178 = vst [vmem:[#allocation58_spill] sm:$0xff] %v11758_v12  ;;  %v11784_v6 = vadd.f32 %v9428_v38, %v11487_v14  ;;  %v6425_v10 = vpop.f32.mrb[115].mxu1 }
 0x462   : > { %6725 = vrot.lane.b32.xlu0 %v11758_v12, %s10230_s15  ;;  %14180 = vst [vmem:[#allocation60_spill] sm:$0xff] %v11824_v7  ;;  %v11836_v1 = vadd.f32 %v11487_v14, %v6425_v10 }
 0x463   : > { %14179 = vst [vmem:[#allocation59_spill] sm:$0xff] %v11784_v6  ;;  %6727 = vrot.lane.b32.xlu1 %v11784_v6, %s10230_s15 }
 0x464   : > { %14181 = vst [vmem:[#allocation61_spill] sm:$0xff] %v11836_v1 }
 0x466   : > { %v9431_v32 = vpop.f32.mrb[116].mxu1  ;;  %6721 = vrot.lane.b32.xlu0 %v11824_v7, %s10230_s15 }
 0x467   : > { %v11868_v6 = vadd.f32 %v9431_v32, %v11487_v14  ;;  %v6438_v60 = vpop.f32.mrb[117].mxu1  ;;  %6723 = vrot.lane.b32.xlu1 %v11836_v1, %s10230_s15  ;;  %v11902_v1 = vld [vmem:[%s13847_s5] ss:$0 sm:$0xff] }
 0x468   : > { %v9432_v10 = vpop.f32.mrb[118].mxu1  ;;  %v11942_v41 = vadd.f32 %v11487_v14, %v6438_v60  ;;  %v7017_v38 = vmul.f32 %v11902_v1, %v11490_v54  ;;  %v7015_v9 = vmul.f32 %v11902_v1, %v11493_v57  ;;  %v7018_v60 = vmul.f32 %v11902_v1, %v11500_v63 }
 0x469   : > { %14182 = vst [vmem:[#allocation62_spill] sm:$0xff] %v11868_v6  ;;  %v11897_v7 = vadd.f32 %v9432_v10, %v11487_v14  ;;  %v6441_v32 = vpop.f32.mrb[119].mxu1  ;;  %v7016_v54 = vmul.f32 %v11902_v1, %v11503_v15  ;;  %v7022_v10 = vmul.f32 %v11902_v1, %v11513_v31  ;;  %v7020_v57 = vmul.f32 %v11902_v1, %v11523_v35 }
 0x46a   : > { %6733 = vrot.lane.b32.xlu0 %v11868_v6, %s10230_s15  ;;  %14184 = vst [vmem:[#allocation64_spill] sm:$0xff] %v11942_v41  ;;  %v11953_v12 = vadd.f32 %v11487_v14, %v6441_v32  ;;  %v7021_v6 = vmul.f32 %v11902_v1, %v11510_v46  ;;  %v7019_v32 = vmul.f32 %v11902_v1, %v11520_v21  ;;  %v14188_v31 = vsel %vm11731_vm2, %v11725_v0, 0.0 }
 0x46b   : > { %14183 = vst [vmem:[#allocation63_spill] sm:$0xff] %v11897_v7  ;;  %6735 = vrot.lane.b32.xlu1 %v11897_v7, %s10230_s15  ;;  %v12000_v18 = vadd.f32 %v7017_v38, %v14188_v31  ;;  %v14190_v21 = vsel %vm11731_vm2, %v11721_v17, 0.0  ;;  %v14192_v31 = vsel %vm11731_vm2, %v11723_v8, 0.0 }
 0x46c   : > { %14185 = vst [vmem:[#allocation65_spill] sm:$0xff] %v11953_v12  ;;  %v12016_v19 = vadd.f32 %v7015_v9, %v14190_v21  ;;  %v12022_v38 = vadd.f32 %v7016_v54, %v14192_v31  ;;  %v14194_v21 = vsel %vm11731_vm2, %v11727_v22, 8.0  ;;  %v14195_v54 = vsel %vm11731_vm2, %v11721_v17, 8.0 }
 0x46d   : > { %v12036_v9 = vadd.f32 %v7022_v10, %v14194_v21  ;;  %v12042_v31 = vadd.f32 %v7019_v32, %v14195_v54  ;;  %v7029_v32 = vmul.f32 %v11902_v1, %v11548_v40 }
 0x46e   : > { %v9435_v7 = vpop.f32.mrb[120].mxu1  ;;  %6729 = vrot.lane.b32.xlu0 %v11942_v41, %s10230_s15  ;;  %14191 = vst [vmem:[#allocation68_spill] sm:$0xff] %v12016_v19 }
 0x46f   : > { %v11972_v63 = vadd.f32 %v9435_v7, %v11487_v14  ;;  %v6454_v15 = vpop.f32.mrb[121].mxu1  ;;  %6731 = vrot.lane.b32.xlu1 %v11953_v12, %s10230_s15  ;;  %v7025_v12 = vmul.f32 %v11902_v1, %v11528_v23  ;;  %v7023_v7 = vmul.f32 %v11902_v1, %v11540_v49 }
 0x470   : > { %v9436_v35 = vpop.f32.mrb[122].mxu1  ;;  %v12055_v10 = vadd.f32 %v11487_v14, %v6454_v15  ;;  %v7030_v15 = vmul.f32 %v11902_v1, %v11553_v4 }
 0x471   : > { %14186 = vst [vmem:[#allocation66_spill] sm:$0xff] %v11972_v63  ;;  %v11991_v41 = vadd.f32 %v9436_v35, %v11487_v14  ;;  %v6457_v46 = vpop.f32.mrb[123].mxu1  ;;  %v14189_v35 = vsel %vm11731_vm2, %v11727_v22, 0.0 }
 0x472   : > { %6741 = vrot.lane.b32.xlu0 %v11972_v63, %s10230_s15  ;;  %v12010_v23 = vadd.f32 %v7018_v60, %v14189_v35  ;;  %v14193_v60 = vsel %vm11731_vm2, %v11725_v0, 8.0  ;;  %14197 = vst [vmem:[#allocation69_spill] sm:$0xff] %v12055_v10  ;;  %v12060_v54 = vadd.f32 %v11487_v14, %v6457_v46  ;;  %v14200_v46 = vsel %vm11731_vm2, %v11721_v17, 16.0 }
 0x473   : > { %14187 = vst [vmem:[#allocation67_spill] sm:$0xff] %v11991_v41  ;;  %v6630_v49 = vpop.permute.xlu1 %6629  ;;  %6743 = vrot.lane.b32.xlu1 %v11991_v41, %s10230_s15  ;;  %v12030_v35 = vadd.f32 %v7021_v6, %v14193_v60  ;;  %v14196_v41 = vsel %vm11731_vm2, %v11723_v8, 8.0  ;;  %v7026_v6 = vmul.f32 %v11902_v1, %v11533_v51  ;;  %v7024_v60 = vmul.f32 %v11902_v1, %v11543_v42 }
 0x474   : > { %v12048_v63 = vadd.f32 %v7020_v57, %v14196_v41  ;;  %v6755_v21 = vmin.f32 %v6630_v49, 4.1351666  ;;  %v6626_v61 = vpop.permute.xlu0 %6625  ;;  %14198 = vst [vmem:[#allocation70_spill] sm:$0xff] %v12060_v54  ;;  %v14199_v57 = vsel %vm11731_vm2, %v11725_v0, 16.0  ;;  %v7027_v42 = vmul.f32 %v11902_v1, %v11560_v5 }
 0x475   : > { %v6753_v56 = vmin.f32 %v6626_v61, 4.1351666  ;;  %v12066_v41 = vadd.f32 %v7025_v12, %v14199_v57  ;;  %v12078_v61 = vadd.f32 %v7023_v7, %v14200_v46  ;;  %v7028_v12 = vmul.f32 %v11902_v1, %v11563_v2 }
 0x476   : > { %v6821_v49 = vmul.f32 1.442695, %v6755_v21  ;;  %6737 = vrot.lane.b32.xlu0 %v12055_v10, %s10230_s15  ;;  %v9439_v40 = vpop.f32.mrb[124].mxu1  ;;  %v7033_v57 = vmul.f32 %v11902_v1, %v11568_v43  ;;  %v14202_v46 = vsel %vm11731_vm2, %v11727_v22, 16.0 }
 0x477   : > { %v6817_v5 = vmul.f32 1.442695, %v6753_v56  ;;  %v12085_v4 = vadd.f32 %v9439_v40, %v11487_v14  ;;  %v6632_v21 = vpop.permute.xlu1 %6631  ;;  %6739 = vrot.lane.b32.xlu1 %v12060_v54, %s10230_s15  ;;  %v6470_v51 = vpop.f32.mrb[125].mxu1  ;;  %v12093_v2 = vadd.f32 %v7026_v6, %v14202_v46  ;;  %v14203_v40 = vsel %vm11731_vm2, %v11723_v8, 16.0 }
 0x478   : > { %10060 = vpow2.f32 %v6821_v49  ;;  %v6756_v10 = vmin.f32 %v6632_v21, 4.1351666  ;;  %v6628_v11 = vpop.permute.xlu0 %6627  ;;  %v9440_v7 = vpop.f32.mrb[126].mxu1  ;;  %v12099_v56 = vadd.f32 %v7024_v60, %v14203_v40  ;;  %v14205_v21 = vsel %vm11731_vm2, %v11725_v0, 24.0 }
 0x479   : > { %14201 = vst [vmem:[#allocation71_spill] sm:$0xff] %v12085_v4  ;;  %10062 = vpow2.f32 %v6817_v5  ;;  %v6754_v43 = vmin.f32 %v6628_v11, 4.1351666  ;;  %v12102_v54 = vadd.f32 %v9440_v7, %v11487_v14  ;;  %v6473_v49 = vpop.f32.mrb[127].mxu1  ;;  %v12108_v28 = vadd.f32 %v7029_v32, %v14205_v21 }
 0x47a   : > { %v7031_v6 = vmul.f32 %v11902_v1, %v11580_v55  ;;  %v6823_v46 = vmul.f32 1.442695, %v6756_v10  ;;  %6749 = vrot.lane.b32.xlu0 %v12085_v4, %s10230_s15  ;;  %v14206_v5 = vsel %vm11731_vm2, %v11727_v22, 24.0  ;;  %v14207_v60 = vsel %vm11731_vm2, %v11721_v17, 24.0 }
 0x47b   : > { %14204 = vst [vmem:[#allocation72_spill] sm:$0xff] %v12102_v54  ;;  %v12118_v11 = vadd.f32 %v7030_v15, %v14206_v5  ;;  %v12124_v7 = vadd.f32 %v7027_v42, %v14207_v60  ;;  %v7034_v32 = vmul.f32 %v11902_v1, %v11573_v53  ;;  %v6819_v40 = vmul.f32 1.442695, %v6754_v43  ;;  %6751 = vrot.lane.b32.xlu1 %v12102_v54, %s10230_s15 }
 0x47c   : > { %v14208_v10 = vsel %vm11731_vm2, %v11723_v8, 24.0  ;;  %v14209_v15 = vsel %vm11731_vm2, %v11725_v0, 32.0  ;;  %v7032_v42 = vmul.f32 %v11902_v1, %v11583_v20  ;;  %v7037_v43 = vmul.f32 %v11902_v1, %v11588_v29  ;;  %v6638_v55 = vpop.permute.xlu0 %6637 }
 0x47d   : > { %v12134_v21 = vadd.f32 %v7028_v12, %v14208_v10  ;;  %v12140_v5 = vadd.f32 %v7033_v57, %v14209_v15  ;;  %10064 = vpow2.f32 %v6823_v46  ;;  %v12147_v60 = vadd.f32 %v11487_v14, %v6470_v51  ;;  %v6640_v15 = vpop.permute.xlu1 %6639 }
 0x47e   : > { %v7035_v12 = vmul.f32 %v11902_v1, %v11600_v25  ;;  %10066 = vpow2.f32 %v6819_v40  ;;  %v12152_v10 = vadd.f32 %v11487_v14, %v6473_v49  ;;  %v6759_v57 = vmin.f32 %v6638_v55, 4.1351666 }
 0x47f   : > { %14210 = vst [vmem:[#allocation73_spill] sm:$0xff] %v12147_v60  ;;  %v7038_v20 = vmul.f32 %v11902_v1, %v11593_v39  ;;  %v7036_v29 = vmul.f32 %v11902_v1, %v11603_v16  ;;  %v6760_v46 = vmin.f32 %v6640_v15, 4.1351666  ;;  %6745 = vrot.lane.b32.xlu0 %v12147_v60, %s10230_s15  ;;  %v14212_v51 = vsel %vm11731_vm2, %v11721_v17, 32.0 }
 0x480   : > { %14211 = vst [vmem:[#allocation74_spill] sm:$0xff] %v12152_v10  ;;  %v12164_v40 = vadd.f32 %v7031_v6, %v14212_v51  ;;  %v7041_v14 = vmul.f32 %v11902_v1, %v11608_v27  ;;  %v7039_v55 = vmul.f32 %v11902_v1, %v11620_v52  ;;  %v6829_v49 = vmul.f32 1.442695, %v6759_v57  ;;  %6747 = vrot.lane.b32.xlu1 %v12152_v10, %s10230_s15  ;;  %v6634_v25 = vpop.permute.xlu0 %6633 }
 0x481   : > { %v14213_v15 = vsel %vm11731_vm2, %v11727_v22, 32.0  ;;  %v7042_v6 = vmul.f32 %v11902_v1, %v11613_v59  ;;  %v7040_v51 = vmul.f32 %v11902_v1, %v11623_v62  ;;  %v6831_v27 = vmul.f32 1.442695, %v6760_v46  ;;  %v6636_v53 = vpop.permute.xlu1 %6635 }
 0x482   : > { %v12176_v16 = vadd.f32 %v7034_v32, %v14213_v15  ;;  %v14214_v57 = vsel %vm11731_vm2, %v11723_v8, 32.0  ;;  %10068 = vpow2.f32 %v6829_v49  ;;  %v6757_v39 = vmin.f32 %v6634_v25, 4.1351666  ;;  %v10061_v59 = vpop.eup %10060 }
 0x483   : > { %v12186_v52 = vadd.f32 %v7032_v42, %v14214_v57  ;;  %v14215_v32 = vsel %vm11731_vm2, %v11725_v0, 40.0  ;;  %v14217_v46 = vsel %vm11731_vm2, %v11721_v17, 40.0  ;;  %10070 = vpow2.f32 %v6831_v27  ;;  %v10063_v57 = vpop.eup %10062 }
 0x484   : > { %v12192_v15 = vadd.f32 %v7037_v43, %v14215_v32  ;;  %v12198_v62 = vadd.f32 %v7035_v12, %v14217_v46  ;;  %v6758_v10 = vmin.f32 %v6636_v53, 4.1351666  ;;  %v14219_v25 = vsel %vm11731_vm2, %v11727_v22, 40.0  ;;  %v6646_v60 = vpop.permute.xlu0 %6645 }
 0x485   : > { %v12204_v42 = vadd.f32 %v7038_v20, %v14219_v25  ;;  %v14220_v43 = vsel %vm11731_vm2, %v11723_v8, 40.0  ;;  %v6825_v32 = vmul.f32 1.442695, %v6757_v39  ;;  %v6953_v12 = vmul.f32 %v10061_v59, %v11902_v1 }
 0x486   : > { %14216 = vst [vmem:[#allocation75_spill] sm:$0xff] %v12192_v15  ;;  %14218 = vst [vmem:[#allocation76_spill] sm:$0xff] %v12198_v62  ;;  %v12210_v49 = vadd.f32 %v7036_v29, %v14220_v43  ;;  %v14221_v53 = vsel %vm11731_vm2, %v11725_v0, 48.0  ;;  %v14223_v20 = vsel %vm11731_vm2, %v11721_v17, 48.0  ;;  %v6827_v25 = vmul.f32 1.442695, %v6758_v10 }
 0x487   : > { %v12217_v27 = vadd.f32 %v7041_v14, %v14221_v53  ;;  %v12223_v46 = vadd.f32 %v7039_v55, %v14223_v20  ;;  %v6951_v29 = vmul.f32 %v10063_v57, %v11902_v1  ;;  %v14225_v39 = vsel %vm11731_vm2, %v11727_v22, 48.0  ;;  %v6648_v53 = vpop.permute.xlu1 %6647  ;;  %v10065_v57 = vpop.eup %10064 }
 0x488   : > { %v12230_v59 = vadd.f32 %v7042_v6, %v14225_v39  ;;  %v14227_v14 = vsel %vm11731_vm2, %v11723_v8, 48.0  ;;  %v7045_v55 = vmul.f32 %v11902_v1, %v11628_v30  ;;  %10072 = vpow2.f32 %v6825_v32  ;;  %v10067_v4 = vpop.eup %10066  ;;  %v6642_v30 = vpop.permute.xlu0 %6641 }
 0x489   : > { %14222 = vst [vmem:[#allocation77_spill] sm:$0xff] %v12217_v27  ;;  %14224 = vst [vmem:[#allocation78_spill] sm:$0xff] %v12223_v46  ;;  %v12236_v43 = vadd.f32 %v7040_v51, %v14227_v14  ;;  %v6763_v10 = vmin.f32 %v6646_v60, 4.1351666  ;;  %v12240_v20 = vmul.f32 0.5, %v6953_v12  ;;  %v7043_v54 = vmul.f32 %v11902_v1, %v11640_v50 }
 0x48a   : > { %14226 = vst [vmem:[#allocation79_spill] sm:$0xff] %v12230_v59  ;;  %10074 = vpow2.f32 %v6827_v25  ;;  %v6764_v6 = vmin.f32 %v6648_v53, 4.1351666  ;;  %v12244_v39 = vmul.f32 0.5, %v6951_v29  ;;  %v6954_v14 = vmul.f32 %v10065_v57, %v11902_v1 }
 0x48b   : > { %14228 = vst [vmem:[#allocation80_spill] sm:$0xff] %v12240_v20  ;;  %v6837_v46 = vmul.f32 1.442695, %v6763_v10  ;;  %v7273_v51 = vadd.f32 %v12240_v20, %v12000_v18  ;;  %v7046_v32 = vmul.f32 %v11902_v1, %v11633_v33  ;;  %v6952_v25 = vmul.f32 %v10067_v4, %v11902_v1  ;;  %v6644_v53 = vpop.permute.xlu1 %6643 }
 0x48c   : > { %14229 = vst [vmem:[#allocation81_spill] sm:$0xff] %v12244_v39  ;;  %v6839_v12 = vmul.f32 1.442695, %v6764_v6  ;;  %v6761_v10 = vmin.f32 %v6642_v30, 4.1351666  ;;  %v12257_v57 = vmul.f32 0.5, %v6954_v14  ;;  %v7044_v4 = vmul.f32 %v11902_v1, %v11643_v47  ;;  %v10069_v30 = vpop.eup %10068  ;;  %v6654_v20 = vpop.permute.xlu0 %6653 }
 0x48d   : > { %10076 = vpow2.f32 %v6837_v46  ;;  %7339 = vrot.lane.b32.xlu0 %v7273_v51, %s10231_s18  ;;  %v14230_v60 = vsel %vm11731_vm2, %v11725_v0, 56.0  ;;  %v6762_v6 = vmin.f32 %v6644_v53, 4.1351666  ;;  %v12267_v29 = vmul.f32 0.5, %v6952_v25 }
 0x48e   : > { %v12263_v50 = vadd.f32 %v7045_v55, %v14230_v60  ;;  %10078 = vpow2.f32 %v6839_v12  ;;  %v6833_v46 = vmul.f32 1.442695, %v6761_v10  ;;  %v7274_v51 = vadd.f32 %v12257_v57, %v12010_v23  ;;  %v10071_v55 = vpop.eup %10070 }
 0x48f   : > { %14232 = vst [vmem:[#allocation83_spill] sm:$0xff] %v12267_v29  ;;  %v7271_v14 = vadd.f32 %v12244_v39, %v12016_v19  ;;  %v6835_v60 = vmul.f32 1.442695, %v6762_v6  ;;  %v6957_v47 = vmul.f32 %v10069_v30, %v11902_v1  ;;  %v14233_v12 = vsel %vm11731_vm2, %v11721_v17, 56.0  ;;  %v6656_v39 = vpop.permute.xlu1 %6655 }
 0x490   : > { %14231 = vst [vmem:[#allocation82_spill] sm:$0xff] %v12263_v50  ;;  %v12280_v25 = vadd.f32 %v7043_v54, %v14233_v12  ;;  %10080 = vpow2.f32 %v6833_v46  ;;  %v6767_v53 = vmin.f32 %v6654_v20, 4.1351666  ;;  %7341 = vrot.lane.b32.xlu1 %v7274_v51, %s10231_s18  ;;  %v6958_v6 = vmul.f32 %v10071_v55, %v11902_v1 }
 0x491   : > { %7335 = vrot.lane.b32.xlu0 %v7271_v14, %s10231_s18  ;;  %v14234_v30 = vsel %vm11731_vm2, %v11727_v22, 56.0  ;;  %10082 = vpow2.f32 %v6835_v60  ;;  %v6768_v54 = vmin.f32 %v6656_v39, 4.1351666  ;;  %v12293_v12 = vmul.f32 0.5, %v6957_v47  ;;  %v6650_v47 = vpop.permute.xlu0 %6649 }
 0x492   : > { %v12291_v33 = vadd.f32 %v7046_v32, %v14234_v30  ;;  %v14236_v20 = vsel %vm11731_vm2, %v11723_v8, 56.0  ;;  %v10073_v51 = vpop.eup %10072  ;;  %v7049_v14 = vmul.f32 %v11902_v1, %v11648_v13  ;;  %v6845_v55 = vmul.f32 1.442695, %v6767_v53 }
 0x493   : > { %14235 = vst [vmem:[#allocation84_spill] sm:$0xff] %v12293_v12  ;;  %v12299_v46 = vadd.f32 %v7044_v4, %v14236_v20  ;;  %v7272_v10 = vadd.f32 %v12267_v29, %v12022_v38  ;;  %v12305_v32 = vmul.f32 0.5, %v6958_v6  ;;  %v6847_v39 = vmul.f32 1.442695, %v6768_v54  ;;  %v6652_v13 = vpop.permute.xlu1 %6651 }
 0x494   : > { %v10075_v60 = vpop.eup %10074  ;;  %v7277_v30 = vadd.f32 %v12293_v12, %v12030_v35  ;;  %v6955_v19 = vmul.f32 %v10073_v51, %v11902_v1  ;;  %v7047_v20 = vmul.f32 %v11902_v1, %v11660_v44  ;;  %10084 = vpow2.f32 %v6845_v55 }
 0x495   : > { %14237 = vst [vmem:[#allocation85_spill] sm:$0xff] %v12305_v32  ;;  %v6765_v53 = vmin.f32 %v6650_v47, 4.1351666  ;;  %7337 = vrot.lane.b32.xlu1 %v7272_v10, %s10231_s18  ;;  %v6956_v6 = vmul.f32 %v10075_v60, %v11902_v1  ;;  %10086 = vpow2.f32 %v6847_v39  ;;  %v6766_v54 = vmin.f32 %v6652_v13, 4.1351666  ;;  %v6662_v13 = vpop.permute.xlu0 %6661 }
 0x496   : > { %7347 = vrot.lane.b32.xlu0 %v7277_v30, %s10231_s18  ;;  %v12317_v29 = vmul.f32 0.5, %v6955_v19  ;;  %v7050_v44 = vmul.f32 %v11902_v1, %v11653_v34  ;;  %v7278_v47 = vadd.f32 %v12305_v32, %v12036_v9  ;;  %v6771_v12 = vmin.f32 %v6662_v13, 4.1351666 }
 0x497   : > { %v10077_v4 = vpop.eup %10076  ;;  %v6841_v55 = vmul.f32 1.442695, %v6765_v53  ;;  %v12325_v10 = vmul.f32 0.5, %v6956_v6  ;;  %v6843_v39 = vmul.f32 1.442695, %v6766_v54  ;;  %v6664_v34 = vpop.permute.xlu1 %6663  ;;  %v14240_v6 = vsel %vm11731_vm2, %v11725_v0, 64.0 }
 0x498   : > { %14238 = vst [vmem:[#allocation86_spill] sm:$0xff] %v12317_v29  ;;  %v10079_v60 = vpop.eup %10078  ;;  %v7275_v19 = vadd.f32 %v12317_v29, %v12042_v31  ;;  %v6961_v30 = vmul.f32 %v10077_v4, %v11902_v1  ;;  %v12338_v54 = vadd.f32 %v7049_v14, %v14240_v6  ;;  %v6772_v32 = vmin.f32 %v6664_v34, 4.1351666 }
 0x499   : > { %14239 = vst [vmem:[#allocation87_spill] sm:$0xff] %v12325_v10  ;;  %10088 = vpow2.f32 %v6841_v55  ;;  %7349 = vrot.lane.b32.xlu1 %v7278_v47, %s10231_s18  ;;  %v6962_v53 = vmul.f32 %v10079_v60, %v11902_v1  ;;  %v14243_v47 = vsel %vm11731_vm2, %v11721_v17, 64.0  ;;  %v6853_v51 = vmul.f32 1.442695, %v6771_v12 }
 0x49a   : > { %14241 = vst [vmem:[#allocation88_spill] sm:$0xff] %v12338_v54  ;;  %10090 = vpow2.f32 %v6843_v39  ;;  %7343 = vrot.lane.b32.xlu0 %v7275_v19, %s10231_s18  ;;  %v12341_v4 = vmul.f32 0.5, %v6961_v30  ;;  %v10081_v13 = vpop.eup %10080  ;;  %v12349_v60 = vadd.f32 %v7047_v20, %v14243_v47  ;;  %v7276_v14 = vadd.f32 %v12325_v10, %v12048_v63  ;;  %v6658_v30 = vpop.permute.xlu0 %6657 }
 0x49b   : > { %v12353_v39 = vmul.f32 0.5, %v6962_v53  ;;  %v10083_v34 = vpop.eup %10082  ;;  %v6855_v19 = vmul.f32 1.442695, %v6772_v32  ;;  %v6959_v55 = vmul.f32 %v10081_v13, %v11902_v1  ;;  %v7048_v20 = vmul.f32 %v11902_v1, %v11663_v26  ;;  %v6660_v47 = vpop.permute.xlu1 %6659 }
 0x49c   : > { %14242 = vst [vmem:[#allocation89_spill] sm:$0xff] %v12341_v4  ;;  %14244 = vst [vmem:[#allocation90_spill] sm:$0xff] %v12349_v60  ;;  %v7281_v6 = vadd.f32 %v12341_v4, %v12066_v41  ;;  %10092 = vpow2.f32 %v6853_v51  ;;  %v6769_v12 = vmin.f32 %v6658_v30, 4.1351666  ;;  %v6960_v53 = vmul.f32 %v10083_v34, %v11902_v1 }
 0x49d   : > { %14245 = vst [vmem:[#allocation91_spill] sm:$0xff] %v12353_v39  ;;  %7345 = vrot.lane.b32.xlu1 %v7276_v14, %s10231_s18  ;;  %10094 = vpow2.f32 %v6855_v19  ;;  %v6770_v32 = vmin.f32 %v6660_v47, 4.1351666  ;;  %v12365_v10 = vmul.f32 0.5, %v6959_v55  ;;  %v7282_v51 = vadd.f32 %v12353_v39, %v12093_v2 }
 0x49e   : > { %7355 = vrot.lane.b32.xlu0 %v7281_v6, %s10231_s18  ;;  %v10085_v29 = vpop.eup %10084  ;;  %v6849_v4 = vmul.f32 1.442695, %v6769_v12  ;;  %v12371_v30 = vmul.f32 0.5, %v6960_v53  ;;  %v14248_v14 = vsel %vm11731_vm2, %v11727_v22, 64.0  ;;  %v6670_v55 = vpop.permute.xlu0 %6669  ;;  %v14250_v53 = vsel %vm11731_vm2, %v11723_v8, 64.0 }
 0x49f   : > { %14246 = vst [vmem:[#allocation92_spill] sm:$0xff] %v12365_v10  ;;  %v12377_v34 = vadd.f32 %v7050_v44, %v14248_v14  ;;  %v10087_v19 = vpop.eup %10086  ;;  %v6851_v6 = vmul.f32 1.442695, %v6770_v32  ;;  %v7279_v47 = vadd.f32 %v12365_v10, %v12078_v61  ;;  %v6965_v13 = vmul.f32 %v10085_v29, %v11902_v1  ;;  %v6672_v14 = vpop.permute.xlu1 %6671 }
 0x4a0   : > { %14247 = vst [vmem:[#allocation93_spill] sm:$0xff] %v12371_v30  ;;  %v12388_v26 = vadd.f32 %v7048_v20, %v14250_v53  ;;  %10096 = vpow2.f32 %v6849_v4  ;;  %v6775_v44 = vmin.f32 %v6670_v55, 4.1351666  ;;  %v6966_v32 = vmul.f32 %v10087_v19, %v11902_v1 }
 0x4a1   : > { %14249 = vst [vmem:[#allocation94_spill] sm:$0xff] %v12377_v34  ;;  %7357 = vrot.lane.b32.xlu1 %v7282_v51, %s10231_s18  ;;  %10098 = vpow2.f32 %v6851_v6  ;;  %v6776_v39 = vmin.f32 %v6672_v14, 4.1351666  ;;  %v12393_v29 = vmul.f32 0.5, %v6965_v13  ;;  %v7053_v20 = vmul.f32 %v11902_v1, %v11668_v58 }
 0x4a2   : > { %7351 = vrot.lane.b32.xlu0 %v7279_v47, %s10231_s18  ;;  %v6861_v4 = vmul.f32 1.442695, %v6775_v44  ;;  %v7280_v55 = vadd.f32 %v12371_v30, %v12099_v56  ;;  %v12401_v51 = vmul.f32 0.5, %v6966_v32  ;;  %v6666_v53 = vpop.permute.xlu0 %6665  ;;  %v7051_v12 = vmul.f32 %v11902_v1, %v11680_v48 }
 0x4a3   : > { %14251 = vst [vmem:[#allocation95_spill] sm:$0xff] %v12393_v29  ;;  %v10089_v10 = vpop.eup %10088  ;;  %v6863_v6 = vmul.f32 1.442695, %v6776_v39  ;;  %v7285_v13 = vadd.f32 %v12393_v29, %v12108_v28  ;;  %v6773_v44 = vmin.f32 %v6666_v53, 4.1351666  ;;  %v6668_v58 = vpop.permute.xlu1 %6667 }
 0x4a4   : > { %14252 = vst [vmem:[#allocation96_spill] sm:$0xff] %v12401_v51  ;;  %v10091_v19 = vpop.eup %10090  ;;  %v6963_v47 = vmul.f32 %v10089_v10, %v11902_v1  ;;  %10100 = vpow2.f32 %v6861_v4  ;;  %v6774_v39 = vmin.f32 %v6668_v58, 4.1351666  ;;  %v14254_v4 = vsel %vm11731_vm2, %v11725_v0, 72.0 }
 0x4a5   : > { %7353 = vrot.lane.b32.xlu1 %v7280_v55, %s10231_s18  ;;  %v6964_v32 = vmul.f32 %v10091_v19, %v11902_v1  ;;  %10102 = vpow2.f32 %v6863_v6  ;;  %v12421_v53 = vadd.f32 %v7053_v20, %v14254_v4  ;;  %v6857_v48 = vmul.f32 1.442695, %v6773_v44 }
 0x4a6   : > { %7363 = vrot.lane.b32.xlu0 %v7285_v13, %s10231_s18  ;;  %v12413_v30 = vmul.f32 0.5, %v6963_v47  ;;  %v10093_v14 = vpop.eup %10092  ;;  %v7286_v55 = vadd.f32 %v12401_v51, %v12118_v11  ;;  %v6859_v6 = vmul.f32 1.442695, %v6774_v39  ;;  %v6678_v13 = vpop.permute.xlu0 %6677  ;;  %v7054_v20 = vmul.f32 %v11902_v1, %v11673_v45 }
 0x4a7   : > { %14255 = vst [vmem:[#allocation98_spill] sm:$0xff] %v12421_v53  ;;  %v12425_v19 = vmul.f32 0.5, %v6964_v32  ;;  %v10095_v58 = vpop.eup %10094  ;;  %v6969_v10 = vmul.f32 %v10093_v14, %v11902_v1  ;;  %10104 = vpow2.f32 %v6857_v48  ;;  %v6779_v44 = vmin.f32 %v6678_v13, 4.1351666  ;;  %v6680_v4 = vpop.permute.xlu1 %6679 }
 0x4a8   : > { %14253 = vst [vmem:[#allocation97_spill] sm:$0xff] %v12413_v30  ;;  %v7283_v47 = vadd.f32 %v12413_v30, %v12124_v7  ;;  %v6970_v32 = vmul.f32 %v10095_v58, %v11902_v1  ;;  %10106 = vpow2.f32 %v6859_v6  ;;  %v6780_v39 = vmin.f32 %v6680_v4, 4.1351666 }
 0x4a9   : > { %14256 = vst [vmem:[#allocation99_spill] sm:$0xff] %v12425_v19  ;;  %7365 = vrot.lane.b32.xlu1 %v7286_v55, %s10231_s18  ;;  %v12437_v51 = vmul.f32 0.5, %v6969_v10  ;;  %v14258_v48 = vsel %vm11731_vm2, %v11721_v17, 72.0  ;;  %v6869_v45 = vmul.f32 1.442695, %v6779_v44  ;;  %v7284_v55 = vadd.f32 %v12425_v19, %v12134_v21 }
 0x4aa   : > { %7359 = vrot.lane.b32.xlu0 %v7283_v47, %s10231_s18  ;;  %v10097_v29 = vpop.eup %10096  ;;  %v12445_v13 = vadd.f32 %v7051_v12, %v14258_v48  ;;  %v12449_v58 = vmul.f32 0.5, %v6970_v32  ;;  %v6871_v47 = vmul.f32 1.442695, %v6780_v39  ;;  %v6674_v10 = vpop.permute.xlu0 %6673  ;;  %v7052_v12 = vmul.f32 %v11902_v1, %v11683_v3 }
 0x4ab   : > { %14257 = vst [vmem:[#allocation100_spill] sm:$0xff] %v12437_v51  ;;  %v10099_v6 = vpop.eup %10098  ;;  %v7289_v4 = vadd.f32 %v12437_v51, %v12140_v5  ;;  %v6967_v14 = vmul.f32 %v10097_v29, %v11902_v1  ;;  %10108 = vpow2.f32 %v6869_v45  ;;  %v6777_v44 = vmin.f32 %v6674_v10, 4.1351666  ;;  %v6676_v48 = vpop.permute.xlu1 %6675 }
 0x4ac   : > { %14259 = vst [vmem:[#allocation101_spill] sm:$0xff] %v12445_v13  ;;  %14260 = vst [vmem:[#allocation102_spill] sm:$0xff] %v12449_v58  ;;  %v6968_v32 = vmul.f32 %v10099_v6, %v11902_v1  ;;  %10110 = vpow2.f32 %v6871_v47  ;;  %v6778_v39 = vmin.f32 %v6676_v48, 4.1351666  ;;  %v14262_v45 = vsel %vm11731_vm2, %v11727_v22, 72.0 }
 0x4ad   : > { %7361 = vrot.lane.b32.xlu1 %v7284_v55, %s10231_s18  ;;  %v12461_v19 = vmul.f32 0.5, %v6967_v14  ;;  %v12469_v10 = vadd.f32 %v7054_v20, %v14262_v45  ;;  %v6865_v3 = vmul.f32 1.442695, %v6777_v44  ;;  %v7290_v55 = vadd.f32 %v12449_v58, %v12176_v16 }
 0x4ae   : > { %7371 = vrot.lane.b32.xlu0 %v7289_v4, %s10231_s18  ;;  %v10101_v30 = vpop.eup %10100  ;;  %v12473_v6 = vmul.f32 0.5, %v6968_v32  ;;  %v6867_v4 = vmul.f32 1.442695, %v6778_v39  ;;  %v6686_v14 = vpop.permute.xlu0 %6685  ;;  %v14264_v20 = vsel %vm11731_vm2, %v11723_v8, 72.0  ;;  %v7055_v51 = vmul.f32 %v11902_v1, %v11705_v37 }
 0x4af   : > { %14261 = vst [vmem:[#allocation103_spill] sm:$0xff] %v12461_v19  ;;  %v10103_v47 = vpop.eup %10102  ;;  %v7287_v48 = vadd.f32 %v12461_v19, %v12164_v40  ;;  %v6973_v29 = vmul.f32 %v10101_v30, %v11902_v1  ;;  %v12484_v44 = vadd.f32 %v7052_v12, %v14264_v20  ;;  %10112 = vpow2.f32 %v6865_v3  ;;  %v6688_v45 = vpop.permute.xlu1 %6687 }
 0x4b0   : > { %14263 = vst [vmem:[#allocation104_spill] sm:$0xff] %v12473_v6  ;;  %v6783_v32 = vmin.f32 %v6686_v14, 4.1351666  ;;  %v6974_v39 = vmul.f32 %v10103_v47, %v11902_v1  ;;  %10114 = vpow2.f32 %v6867_v4  ;;  %v6784_v58 = vmin.f32 %v6688_v45, 4.1351666 }
 0x4b1   : > { %7373 = vrot.lane.b32.xlu1 %v7290_v55, %s10231_s18  ;;  %v12489_v30 = vmul.f32 0.5, %v6973_v29  ;;  %v10105_v19 = vpop.eup %10104  ;;  %v7057_v12 = vmul.f32 %v11902_v1, %v11690_v24  ;;  %v7288_v14 = vadd.f32 %v12473_v6, %v12186_v52 }
 0x4b2   : > { %7367 = vrot.lane.b32.xlu0 %v7287_v48, %s10231_s18  ;;  %v6877_v3 = vmul.f32 1.442695, %v6783_v32  ;;  %v12497_v55 = vmul.f32 0.5, %v6974_v39  ;;  %v10107_v47 = vpop.eup %10106  ;;  %v6879_v4 = vmul.f32 1.442695, %v6784_v58  ;;  %v6682_v20 = vpop.permute.xlu0 %6681  ;;  %v6971_v48 = vmul.f32 %v10105_v19, %v11902_v1 }
 0x4b3   : > { %14265 = vst [vmem:[#allocation105_spill] sm:$0xff] %v12489_v30  ;;  %v7293_v29 = vadd.f32 %v12489_v30, %v12192_v15  ;;  %v6781_v32 = vmin.f32 %v6682_v20, 4.1351666  ;;  %v6684_v24 = vpop.permute.xlu1 %6683  ;;  %v6972_v39 = vmul.f32 %v10107_v47, %v11902_v1  ;;  %v14270_v15 = vld [vmem:[#allocation50_spill] sm:$0xff] }
 0x4b4   : > { %14266 = vst [vmem:[#allocation106_spill] sm:$0xff] %v12497_v55  ;;  %10116 = vpow2.f32 %v6877_v3  ;;  %v6782_v58 = vmin.f32 %v6684_v24, 4.1351666  ;;  %v12509_v6 = vmul.f32 0.5, %v6971_v48  ;;  %v14268_v3 = vsel %vm11731_vm2, %v11725_v0, 80.0 }
 0x4b5   : > { %7369 = vrot.lane.b32.xlu1 %v7288_v14, %s10231_s18  ;;  %10118 = vpow2.f32 %v6879_v4  ;;  %v10109_v45 = vpop.eup %10108  ;;  %v12517_v20 = vadd.f32 %v7057_v12, %v14268_v3  ;;  %v6873_v37 = vmul.f32 1.442695, %v6781_v32  ;;  %v7294_v14 = vadd.f32 %v12497_v55, %v12204_v42 }
 0x4b6   : > { %7379 = vrot.lane.b32.xlu0 %v7293_v29, %s10231_s18  ;;  %14267 = vst [vmem:[#allocation107_spill] sm:$0xff] %v12509_v6  ;;  %v12521_v47 = vmul.f32 0.5, %v6972_v39  ;;  %v10111_v24 = vpop.eup %10110  ;;  %v6875_v4 = vmul.f32 1.442695, %v6782_v58  ;;  %v6694_v29 = vpop.permute.xlu0 %6693  ;;  %v7291_v48 = vadd.f32 %v12509_v6, %v12198_v62  ;;  %v6977_v19 = vmul.f32 %v10109_v45, %v11902_v1  ;;  %v14275_v62 = vld [vmem:[#allocation53_spill] sm:$0xff] }
 0x4b7   : > { %v7058_v12 = vmul.f32 %v11902_v1, %v14270_v15  ;;  %10120 = vpow2.f32 %v6873_v37  ;;  %v6787_v32 = vmin.f32 %v6694_v29, 4.1351666  ;;  %v6696_v3 = vpop.permute.xlu1 %6695  ;;  %v6978_v39 = vmul.f32 %v10111_v24, %v11902_v1 }
 0x4b8   : > { %14269 = vst [vmem:[#allocation108_spill] sm:$0xff] %v12521_v47  ;;  %10122 = vpow2.f32 %v6875_v4  ;;  %v6788_v58 = vmin.f32 %v6696_v3, 4.1351666  ;;  %v12533_v55 = vmul.f32 0.5, %v6977_v19  ;;  %v14272_v37 = vsel %vm11731_vm2, %v11721_v17, 80.0 }
 0x4b9   : > { %7381 = vrot.lane.b32.xlu1 %v7294_v14, %s10231_s18  ;;  %v10113_v30 = vpop.eup %10112  ;;  %v12541_v29 = vadd.f32 %v7055_v51, %v14272_v37  ;;  %v6885_v15 = vmul.f32 1.442695, %v6787_v32  ;;  %v7292_v14 = vadd.f32 %v12521_v47, %v12210_v49  ;;  %v12545_v24 = vmul.f32 0.5, %v6978_v39 }
 0x4ba   : > { %7375 = vrot.lane.b32.xlu0 %v7291_v48, %s10231_s18  ;;  %14271 = vst [vmem:[#allocation109_spill] sm:$0xff] %v12533_v55  ;;  %v10115_v4 = vpop.eup %10114  ;;  %v6887_v48 = vmul.f32 1.442695, %v6788_v58  ;;  %v6690_v19 = vpop.permute.xlu0 %6689  ;;  %v7297_v3 = vadd.f32 %v12533_v55, %v12217_v27  ;;  %v6975_v45 = vmul.f32 %v10113_v30, %v11902_v1  ;;  %v7056_v51 = vmul.f32 %v11902_v1, %v14275_v62  ;;  %v14285_v27 = vld [vmem:[#allocation56_spill] sm:$0xff] }
 0x4bb   : > { %14273 = vst [vmem:[#allocation110_spill] sm:$0xff] %v12541_v29  ;;  %14274 = vst [vmem:[#allocation111_spill] sm:$0xff] %v12545_v24  ;;  %10124 = vpow2.f32 %v6885_v15  ;;  %v6785_v32 = vmin.f32 %v6690_v19, 4.1351666  ;;  %v6692_v37 = vpop.permute.xlu1 %6691  ;;  %v6976_v39 = vmul.f32 %v10115_v4, %v11902_v1  ;;  %v14277_v15 = vsel %vm11731_vm2, %v11727_v22, 80.0 }
 0x4bc   : > { %10126 = vpow2.f32 %v6887_v48  ;;  %v6786_v58 = vmin.f32 %v6692_v37, 4.1351666  ;;  %v12557_v47 = vmul.f32 0.5, %v6975_v45  ;;  %v12565_v19 = vadd.f32 %v7058_v12, %v14277_v15  ;;  %v14280_v37 = vld [vmem:[#allocation78_spill] sm:$0xff] }
 0x4bd   : > { %7377 = vrot.lane.b32.xlu1 %v7292_v14, %s10231_s18  ;;  %v6881_v62 = vmul.f32 1.442695, %v6785_v32  ;;  %v7298_v14 = vadd.f32 %v12545_v24, %v12230_v59  ;;  %v12569_v4 = vmul.f32 0.5, %v6976_v39  ;;  %v14281_v12 = vsel %vm11731_vm2, %v11723_v8, 80.0 }
 0x4be   : > { %7387 = vrot.lane.b32.xlu0 %v7297_v3, %s10231_s18  ;;  %14276 = vst [vmem:[#allocation112_spill] sm:$0xff] %v12557_v47  ;;  %v10117_v6 = vpop.eup %10116  ;;  %14278 = vst [vmem:[#allocation113_spill] sm:$0xff] %v12565_v19  ;;  %v6883_v3 = vmul.f32 1.442695, %v6786_v58  ;;  %v6702_v45 = vpop.permute.xlu0 %6701  ;;  %v7295_v55 = vadd.f32 %v12557_v47, %v14280_v37  ;;  %v12580_v32 = vadd.f32 %v7056_v51, %v14281_v12  ;;  %v14283_v37 = vld [vmem:[#allocation54_spill] sm:$0xff] }
 0x4bf   : > { %14279 = vst [vmem:[#allocation114_spill] sm:$0xff] %v12569_v4  ;;  %v10119_v48 = vpop.eup %10118  ;;  %v6981_v30 = vmul.f32 %v10117_v6, %v11902_v1  ;;  %10128 = vpow2.f32 %v6881_v62  ;;  %v6791_v39 = vmin.f32 %v6702_v45, 4.1351666  ;;  %v6704_v15 = vpop.permute.xlu1 %6703  ;;  %v7061_v51 = vmul.f32 %v11902_v1, %v14283_v37 }
 0x4c0   : > { %v6982_v58 = vmul.f32 %v10119_v48, %v11902_v1  ;;  %10130 = vpow2.f32 %v6883_v3  ;;  %v6792_v24 = vmin.f32 %v6704_v15, 4.1351666  ;;  %v7296_v45 = vadd.f32 %v12569_v4, %v12236_v43 }
 0x4c1   : > { %7389 = vrot.lane.b32.xlu1 %v7298_v14, %s10231_s18  ;;  %v12585_v6 = vmul.f32 0.5, %v6981_v30  ;;  %v10121_v47 = vpop.eup %10120  ;;  %v6893_v62 = vmul.f32 1.442695, %v6791_v39  ;;  %v7059_v37 = vmul.f32 %v11902_v1, %v14285_v27 }
 0x4c2   : > { %7383 = vrot.lane.b32.xlu0 %v7295_v55, %s10231_s18  ;;  %v12593_v14 = vmul.f32 0.5, %v6982_v58  ;;  %v10123_v48 = vpop.eup %10122  ;;  %v6895_v3 = vmul.f32 1.442695, %v6792_v24  ;;  %v6698_v12 = vpop.permute.xlu0 %6697  ;;  %v6979_v30 = vmul.f32 %v10121_v47, %v11902_v1 }
 0x4c3   : > { %14282 = vst [vmem:[#allocation115_spill] sm:$0xff] %v12585_v6  ;;  %v7301_v55 = vadd.f32 %v12585_v6, %v12263_v50  ;;  %10132 = vpow2.f32 %v6893_v62  ;;  %v6789_v39 = vmin.f32 %v6698_v12, 4.1351666  ;;  %v6700_v59 = vpop.permute.xlu1 %6699  ;;  %v6980_v58 = vmul.f32 %v10123_v48, %v11902_v1  ;;  %v14290_v50 = vld [vmem:[#allocation55_spill] sm:$0xff] }
 0x4c4   : > { %14284 = vst [vmem:[#allocation116_spill] sm:$0xff] %v12593_v14  ;;  %10134 = vpow2.f32 %v6895_v3  ;;  %v6790_v24 = vmin.f32 %v6700_v59, 4.1351666  ;;  %v12605_v4 = vmul.f32 0.5, %v6979_v30  ;;  %v14287_v62 = vsel %vm11731_vm2, %v11725_v0, 88.0 }
 0x4c5   : > { %7385 = vrot.lane.b32.xlu1 %v7296_v45, %s10231_s18  ;;  %v10125_v15 = vpop.eup %10124  ;;  %v12613_v12 = vadd.f32 %v7061_v51, %v14287_v62  ;;  %v6889_v27 = vmul.f32 1.442695, %v6789_v39  ;;  %v7302_v45 = vadd.f32 %v12593_v14, %v12291_v33  ;;  %v12617_v48 = vmul.f32 0.5, %v6980_v58 }
 0x4c6   : > { %7395 = vrot.lane.b32.xlu0 %v7301_v55, %s10231_s18  ;;  %14286 = vst [vmem:[#allocation117_spill] sm:$0xff] %v12605_v4  ;;  %v10127_v59 = vpop.eup %10126  ;;  %v6891_v3 = vmul.f32 1.442695, %v6790_v24  ;;  %v6710_v55 = vpop.permute.xlu0 %6709  ;;  %v7299_v30 = vadd.f32 %v12605_v4, %v12280_v25  ;;  %v6985_v47 = vmul.f32 %v10125_v15, %v11902_v1  ;;  %v7062_v51 = vmul.f32 %v11902_v1, %v14290_v50 }
 0x4c7   : > { %14288 = vst [vmem:[#allocation118_spill] sm:$0xff] %v12613_v12  ;;  %14289 = vst [vmem:[#allocation119_spill] sm:$0xff] %v12617_v48  ;;  %10136 = vpow2.f32 %v6889_v27  ;;  %v6795_v39 = vmin.f32 %v6710_v55, 4.1351666  ;;  %v6712_v62 = vpop.permute.xlu1 %6711  ;;  %v6986_v58 = vmul.f32 %v10127_v59, %v11902_v1  ;;  %v14292_v27 = vsel %vm11731_vm2, %v11721_v17, 88.0 }
 0x4c8   : > { %10138 = vpow2.f32 %v6891_v3  ;;  %v6796_v24 = vmin.f32 %v6712_v62, 4.1351666  ;;  %v12629_v14 = vmul.f32 0.5, %v6985_v47  ;;  %v12637_v55 = vadd.f32 %v7059_v37, %v14292_v27  ;;  %v12651_v37 = vld [vmem:[%s13847_s5] ss:$0 sm:$0xff] }
 0x4c9   : > { %7397 = vrot.lane.b32.xlu1 %v7302_v45, %s10231_s18  ;;  %v10129_v6 = vpop.eup %10128  ;;  %v6901_v50 = vmul.f32 1.442695, %v6795_v39  ;;  %v7300_v45 = vadd.f32 %v12617_v48, %v12299_v46  ;;  %v12641_v59 = vmul.f32 0.5, %v6986_v58  ;;  %v14295_v39 = vld [vmem:[#allocation57_spill] sm:$0xff] }
 0x4ca   : > { %7391 = vrot.lane.b32.xlu0 %v7299_v30, %s10231_s18  ;;  %14291 = vst [vmem:[#allocation120_spill] sm:$0xff] %v12629_v14  ;;  %14293 = vst [vmem:[#allocation121_spill] sm:$0xff] %v12637_v55  ;;  %v10131_v3 = vpop.eup %10130  ;;  %v6903_v30 = vmul.f32 1.442695, %v6796_v24  ;;  %v6706_v47 = vpop.permute.xlu0 %6705  ;;  %v7305_v62 = vadd.f32 %v12629_v14, %v12338_v54  ;;  %v6983_v15 = vmul.f32 %v10129_v6, %v11902_v1  ;;  %v14303_v54 = vld [vmem:[#allocation60_spill] sm:$0xff] }
 0x4cb   : > { %14294 = vst [vmem:[#allocation122_spill] sm:$0xff] %v12641_v59  ;;  %v7060_v58 = vmul.f32 %v12651_v37, %v14295_v39  ;;  %10140 = vpow2.f32 %v6901_v50  ;;  %v6793_v27 = vmin.f32 %v6706_v47, 4.1351666  ;;  %v6708_v24 = vpop.permute.xlu1 %6707  ;;  %v6984_v48 = vmul.f32 %v12651_v37, %v10131_v3 }
 0x4cc   : > { %10142 = vpow2.f32 %v6903_v30  ;;  %v6794_v1 = vmin.f32 %v6708_v24, 4.1351666  ;;  %v12658_v6 = vmul.f32 0.5, %v6983_v15  ;;  %v14297_v50 = vsel %vm11731_vm2, %v11727_v22, 88.0 }
 0x4cd   : > { %7393 = vrot.lane.b32.xlu1 %v7300_v45, %s10231_s18  ;;  %v10133_v14 = vpop.eup %10132  ;;  %v12666_v47 = vadd.f32 %v7062_v51, %v14297_v50  ;;  %v6897_v39 = vmul.f32 1.442695, %v6793_v27  ;;  %v7306_v45 = vadd.f32 %v12641_v59, %v12377_v34  ;;  %v12670_v3 = vmul.f32 0.5, %v6984_v48 }
 0x4ce   : > { %7403 = vrot.lane.b32.xlu0 %v7305_v62, %s10231_s18  ;;  %14296 = vst [vmem:[#allocation123_spill] sm:$0xff] %v12658_v6  ;;  %v10135_v30 = vpop.eup %10134  ;;  %v6899_v62 = vmul.f32 1.442695, %v6794_v1  ;;  %v6718_v15 = vpop.permute.xlu0 %6717  ;;  %v7303_v24 = vadd.f32 %v12658_v6, %v12349_v60  ;;  %v6989_v4 = vmul.f32 %v12651_v37, %v10133_v14  ;;  %v14299_v51 = vsel %vm11731_vm2, %v11723_v8, 88.0  ;;  %v14301_v60 = vld [vmem:[#allocation58_spill] sm:$0xff] }
 0x4cf   : > { %14298 = vst [vmem:[#allocation124_spill] sm:$0xff] %v12670_v3  ;;  %v12681_v27 = vadd.f32 %v7060_v58, %v14299_v51  ;;  %10144 = vpow2.f32 %v6897_v39  ;;  %v6799_v48 = vmin.f32 %v6718_v15, 4.1351666  ;;  %v6720_v50 = vpop.permute.xlu1 %6719  ;;  %v6990_v1 = vmul.f32 %v12651_v37, %v10135_v30 }
 0x4d0   : > { %10146 = vpow2.f32 %v6899_v62  ;;  %v6800_v59 = vmin.f32 %v6720_v50, 4.1351666  ;;  %v12686_v14 = vmul.f32 0.5, %v6989_v4  ;;  %v7065_v58 = vmul.f32 %v12651_v37, %v14301_v60 }
 0x4d1   : > { %7405 = vrot.lane.b32.xlu1 %v7306_v45, %s10231_s18  ;;  %v10137_v6 = vpop.eup %10136  ;;  %v6909_v39 = vmul.f32 1.442695, %v6799_v48  ;;  %v7304_v15 = vadd.f32 %v12670_v3, %v12388_v26  ;;  %v12694_v45 = vmul.f32 0.5, %v6990_v1  ;;  %v7063_v60 = vmul.f32 %v12651_v37, %v14303_v54 }
 0x4d2   : > { %7399 = vrot.lane.b32.xlu0 %v7303_v24, %s10231_s18  ;;  %14300 = vst [vmem:[#allocation125_spill] sm:$0xff] %v12686_v14  ;;  %v10139_v30 = vpop.eup %10138  ;;  %v6911_v62 = vmul.f32 1.442695, %v6800_v59  ;;  %v6714_v51 = vpop.permute.xlu0 %6713  ;;  %v7309_v4 = vadd.f32 %v12686_v14, %v12421_v53  ;;  %v6987_v24 = vmul.f32 %v12651_v37, %v10137_v6  ;;  %v14307_v53 = vld [vmem:[#allocation59_spill] sm:$0xff] }
 0x4d3   : > { %14302 = vst [vmem:[#allocation126_spill] sm:$0xff] %v12694_v45  ;;  %10148 = vpow2.f32 %v6909_v39  ;;  %v6797_v48 = vmin.f32 %v6714_v51, 4.1351666  ;;  %v6716_v34 = vpop.permute.xlu1 %6715  ;;  %v6988_v1 = vmul.f32 %v12651_v37, %v10139_v30  ;;  %v14305_v39 = vsel %vm11731_vm2, %v11725_v0, 96.0 }
 0x4d4   : > { %10150 = vpow2.f32 %v6911_v62  ;;  %v6798_v59 = vmin.f32 %v6716_v34, 4.1351666  ;;  %v12706_v3 = vmul.f32 0.5, %v6987_v24  ;;  %v12714_v51 = vadd.f32 %v7065_v58, %v14305_v39 }
 0x4d5   : > { %7401 = vrot.lane.b32.xlu1 %v7304_v15, %s10231_s18  ;;  %v10141_v50 = vpop.eup %10140  ;;  %v6905_v54 = vmul.f32 1.442695, %v6797_v48  ;;  %v7310_v15 = vadd.f32 %v12694_v45, %v12469_v10  ;;  %v12718_v30 = vmul.f32 0.5, %v6988_v1  ;;  %v7066_v58 = vmul.f32 %v12651_v37, %v14307_v53 }
 0x4d6   : > { %7411 = vrot.lane.b32.xlu0 %v7309_v4, %s10231_s18  ;;  %14304 = vst [vmem:[#allocation127_spill] sm:$0xff] %v12706_v3  ;;  %v10143_v34 = vpop.eup %10142  ;;  %v6907_v62 = vmul.f32 1.442695, %v6798_v59  ;;  %v6726_v4 = vpop.permute.xlu0 %6725  ;;  %v7307_v24 = vadd.f32 %v12706_v3, %v12445_v13  ;;  %v6993_v6 = vmul.f32 %v12651_v37, %v10141_v50  ;;  %v14312_v13 = vld [vmem:[#allocation61_spill] sm:$0xff] }
 0x4d7   : > { %14306 = vst [vmem:[#allocation128_spill] sm:$0xff] %v12718_v30  ;;  %10152 = vpow2.f32 %v6905_v54  ;;  %v6803_v48 = vmin.f32 %v6726_v4, 4.1351666  ;;  %v6728_v39 = vpop.permute.xlu1 %6727  ;;  %v6994_v1 = vmul.f32 %v12651_v37, %v10143_v34  ;;  %v14309_v54 = vsel %vm11731_vm2, %v11721_v17, 96.0 }
 0x4d8   : > { %10154 = vpow2.f32 %v6907_v62  ;;  %v6804_v59 = vmin.f32 %v6728_v39, 4.1351666  ;;  %v12730_v45 = vmul.f32 0.5, %v6993_v6  ;;  %v12738_v4 = vadd.f32 %v7063_v60, %v14309_v54 }
 0x4d9   : > { %7413 = vrot.lane.b32.xlu1 %v7310_v15, %s10231_s18  ;;  %v10145_v14 = vpop.eup %10144  ;;  %v6917_v53 = vmul.f32 1.442695, %v6803_v48  ;;  %v7308_v15 = vadd.f32 %v12718_v30, %v12484_v44  ;;  %v12742_v34 = vmul.f32 0.5, %v6994_v1  ;;  %v7064_v60 = vmul.f32 %v12651_v37, %v14312_v13 }
 0x4da   : > { %7407 = vrot.lane.b32.xlu0 %v7307_v24, %s10231_s18  ;;  %14308 = vst [vmem:[#allocation129_spill] sm:$0xff] %v12730_v45  ;;  %14310 = vst [vmem:[#allocation130_spill] sm:$0xff] %v12738_v4  ;;  %v10147_v62 = vpop.eup %10146  ;;  %v6919_v24 = vmul.f32 1.442695, %v6804_v59  ;;  %v6722_v6 = vpop.permute.xlu0 %6721  ;;  %v7313_v39 = vadd.f32 %v12730_v45, %v12517_v20  ;;  %v6991_v50 = vmul.f32 %v12651_v37, %v10145_v14  ;;  %v14321_v45 = vld [vmem:[#allocation64_spill] sm:$0xff] }
 0x4db   : > { %14311 = vst [vmem:[#allocation131_spill] sm:$0xff] %v12742_v34  ;;  %10156 = vpow2.f32 %v6917_v53  ;;  %v6801_v48 = vmin.f32 %v6722_v6, 4.1351666  ;;  %v6724_v54 = vpop.permute.xlu1 %6723  ;;  %v6992_v1 = vmul.f32 %v12651_v37, %v10147_v62  ;;  %v14314_v53 = vsel %vm11731_vm2, %v11727_v22, 96.0 }
 0x4dc   : > { %10158 = vpow2.f32 %v6919_v24  ;;  %v6802_v59 = vmin.f32 %v6724_v54, 4.1351666  ;;  %v12754_v30 = vmul.f32 0.5, %v6991_v50  ;;  %v12762_v6 = vadd.f32 %v7066_v58, %v14314_v53 }
 0x4dd   : > { %7409 = vrot.lane.b32.xlu1 %v7308_v15, %s10231_s18  ;;  %v10149_v3 = vpop.eup %10148  ;;  %v6913_v13 = vmul.f32 1.442695, %v6801_v48  ;;  %v7314_v15 = vadd.f32 %v12742_v34, %v12565_v19  ;;  %v12766_v62 = vmul.f32 0.5, %v6992_v1  ;;  %v14316_v58 = vsel %vm11731_vm2, %v11723_v8, 96.0 }
 0x4de   : > { %7419 = vrot.lane.b32.xlu0 %v7313_v39, %s10231_s18  ;;  %14313 = vst [vmem:[#allocation132_spill] sm:$0xff] %v12754_v30  ;;  %v10151_v24 = vpop.eup %10150  ;;  %v6915_v39 = vmul.f32 1.442695, %v6802_v59  ;;  %v6734_v50 = vpop.permute.xlu0 %6733  ;;  %v7311_v54 = vadd.f32 %v12754_v30, %v12541_v29  ;;  %v6997_v14 = vmul.f32 %v12651_v37, %v10149_v3  ;;  %v12777_v48 = vadd.f32 %v7064_v60, %v14316_v58  ;;  %v14319_v29 = vld [vmem:[#allocation62_spill] sm:$0xff] }
 0x4df   : > { %14315 = vst [vmem:[#allocation133_spill] sm:$0xff] %v12766_v62  ;;  %10160 = vpow2.f32 %v6913_v13  ;;  %v6807_v1 = vmin.f32 %v6734_v50, 4.1351666  ;;  %v6736_v53 = vpop.permute.xlu1 %6735  ;;  %v6998_v59 = vmul.f32 %v12651_v37, %v10151_v24  ;;  %v7069_v60 = vmul.f32 %v12651_v37, %v14319_v29 }
 0x4e0   : > { %14317 = vst [vmem:[#allocation134_spill] sm:$0xff] %v12777_v48  ;;  %10162 = vpow2.f32 %v6915_v39  ;;  %v6808_v34 = vmin.f32 %v6736_v53, 4.1351666  ;;  %v12782_v3 = vmul.f32 0.5, %v6997_v14  ;;  %v7312_v50 = vadd.f32 %v12766_v62, %v12580_v32 }
 0x4e1   : > { %7421 = vrot.lane.b32.xlu1 %v7314_v15, %s10231_s18  ;;  %v10153_v30 = vpop.eup %10152  ;;  %v6925_v13 = vmul.f32 1.442695, %v6807_v1  ;;  %v12790_v15 = vmul.f32 0.5, %v6998_v59  ;;  %v7067_v29 = vmul.f32 %v12651_v37, %v14321_v45 }
 0x4e2   : > { %7415 = vrot.lane.b32.xlu0 %v7311_v54, %s10231_s18  ;;  %14318 = vst [vmem:[#allocation135_spill] sm:$0xff] %v12782_v3  ;;  %v10155_v24 = vpop.eup %10154  ;;  %v6927_v39 = vmul.f32 1.442695, %v6808_v34  ;;  %v6730_v58 = vpop.permute.xlu0 %6729  ;;  %v7317_v14 = vadd.f32 %v12782_v3, %v12613_v12  ;;  %v6995_v54 = vmul.f32 %v12651_v37, %v10153_v30  ;;  %v14325_v12 = vld [vmem:[#allocation63_spill] sm:$0xff] }
 0x4e3   : > { %14320 = vst [vmem:[#allocation136_spill] sm:$0xff] %v12790_v15  ;;  %10164 = vpow2.f32 %v6925_v13  ;;  %v6805_v1 = vmin.f32 %v6730_v58, 4.1351666  ;;  %v6732_v19 = vpop.permute.xlu1 %6731  ;;  %v6996_v59 = vmul.f32 %v12651_v37, %v10155_v24  ;;  %v14323_v13 = vsel %vm11731_vm2, %v11725_v0, 104.0 }
 0x4e4   : > { %10166 = vpow2.f32 %v6927_v39  ;;  %v6806_v34 = vmin.f32 %v6732_v19, 4.1351666  ;;  %v12802_v62 = vmul.f32 0.5, %v6995_v54  ;;  %v12810_v58 = vadd.f32 %v7069_v60, %v14323_v13 }
 0x4e5   : > { %7417 = vrot.lane.b32.xlu1 %v7312_v50, %s10231_s18  ;;  %v10157_v53 = vpop.eup %10156  ;;  %v6921_v45 = vmul.f32 1.442695, %v6805_v1  ;;  %v7318_v50 = vadd.f32 %v12790_v15, %v12666_v47  ;;  %v12814_v24 = vmul.f32 0.5, %v6996_v59  ;;  %v7070_v60 = vmul.f32 %v12651_v37, %v14325_v12 }
 0x4e6   : > { %7427 = vrot.lane.b32.xlu0 %v7317_v14, %s10231_s18  ;;  %14322 = vst [vmem:[#allocation137_spill] sm:$0xff] %v12802_v62  ;;  %v10159_v19 = vpop.eup %10158  ;;  %v6923_v39 = vmul.f32 1.442695, %v6806_v34  ;;  %v6742_v14 = vpop.permute.xlu0 %6741  ;;  %v7315_v54 = vadd.f32 %v12802_v62, %v12637_v55  ;;  %v7001_v30 = vmul.f32 %v12651_v37, %v10157_v53  ;;  %v14330_v55 = vld [vmem:[#allocation65_spill] sm:$0xff] }
 0x4e7   : > { %14324 = vst [vmem:[#allocation138_spill] sm:$0xff] %v12814_v24  ;;  %10168 = vpow2.f32 %v6921_v45  ;;  %v6811_v1 = vmin.f32 %v6742_v14, 4.1351666  ;;  %v6744_v13 = vpop.permute.xlu1 %6743  ;;  %v7002_v59 = vmul.f32 %v12651_v37, %v10159_v19  ;;  %v14327_v45 = vsel %vm11731_vm2, %v11721_v17, 104.0 }
 0x4e8   : > { %10170 = vpow2.f32 %v6923_v39  ;;  %v6812_v34 = vmin.f32 %v6744_v13, 4.1351666  ;;  %v12826_v15 = vmul.f32 0.5, %v7001_v30  ;;  %v12834_v14 = vadd.f32 %v7067_v29, %v14327_v45 }
 0x4e9   : > { %7429 = vrot.lane.b32.xlu1 %v7318_v50, %s10231_s18  ;;  %v10161_v3 = vpop.eup %10160  ;;  %v6933_v12 = vmul.f32 1.442695, %v6811_v1  ;;  %v7316_v50 = vadd.f32 %v12814_v24, %v12681_v27  ;;  %v12838_v19 = vmul.f32 0.5, %v7002_v59  ;;  %v7068_v29 = vmul.f32 %v12651_v37, %v14330_v55 }
 0x4ea   : > { %7423 = vrot.lane.b32.xlu0 %v7315_v54, %s10231_s18  ;;  %14326 = vst [vmem:[#allocation139_spill] sm:$0xff] %v12826_v15  ;;  %14328 = vst [vmem:[#allocation140_spill] sm:$0xff] %v12834_v14  ;;  %v10163_v39 = vpop.eup %10162  ;;  %v6935_v54 = vmul.f32 1.442695, %v6812_v34  ;;  %v6738_v30 = vpop.permute.xlu0 %6737  ;;  %v7321_v13 = vadd.f32 %v12826_v15, %v12714_v51  ;;  %v6999_v53 = vmul.f32 %v12651_v37, %v10161_v3  ;;  %v14339_v15 = vld [vmem:[#allocation67_spill] sm:$0xff] }
 0x4eb   : > { %14329 = vst [vmem:[#allocation141_spill] sm:$0xff] %v12838_v19  ;;  %10172 = vpow2.f32 %v6933_v12  ;;  %v6809_v1 = vmin.f32 %v6738_v30, 4.1351666  ;;  %v6740_v45 = vpop.permute.xlu1 %6739  ;;  %v7000_v59 = vmul.f32 %v12651_v37, %v10163_v39  ;;  %v14332_v12 = vsel %vm11731_vm2, %v11727_v22, 104.0 }
 0x4ec   : > { %10174 = vpow2.f32 %v6935_v54  ;;  %v6810_v34 = vmin.f32 %v6740_v45, 4.1351666  ;;  %v12850_v24 = vmul.f32 0.5, %v6999_v53  ;;  %v12858_v30 = vadd.f32 %v7070_v60, %v14332_v12 }
 0x4ed   : > { %7425 = vrot.lane.b32.xlu1 %v7316_v50, %s10231_s18  ;;  %v10165_v62 = vpop.eup %10164  ;;  %v6929_v55 = vmul.f32 1.442695, %v6809_v1  ;;  %v7322_v50 = vadd.f32 %v12838_v19, %v12762_v6  ;;  %v12862_v39 = vmul.f32 0.5, %v7000_v59  ;;  %v14334_v60 = vsel %vm11731_vm2, %v11723_v8, 104.0 }
 0x4ee   : > { %7435 = vrot.lane.b32.xlu0 %v7321_v13, %s10231_s18  ;;  %14331 = vst [vmem:[#allocation142_spill] sm:$0xff] %v12850_v24  ;;  %v10167_v54 = vpop.eup %10166  ;;  %v6931_v13 = vmul.f32 1.442695, %v6810_v34  ;;  %v6750_v53 = vpop.permute.xlu0 %6749  ;;  %v7319_v45 = vadd.f32 %v12850_v24, %v12738_v4  ;;  %v7005_v3 = vmul.f32 %v12651_v37, %v10165_v62  ;;  %v12873_v1 = vadd.f32 %v7068_v29, %v14334_v60  ;;  %v14337_v4 = vld [vmem:[#allocation66_spill] sm:$0xff] }
 0x4ef   : > { %14333 = vst [vmem:[#allocation143_spill] sm:$0xff] %v12862_v39  ;;  %10176 = vpow2.f32 %v6929_v55  ;;  %v6815_v59 = vmin.f32 %v6750_v53, 4.1351666  ;;  %v6752_v12 = vpop.permute.xlu1 %6751  ;;  %v7006_v34 = vmul.f32 %v12651_v37, %v10167_v54  ;;  %v7073_v29 = vmul.f32 %v12651_v37, %v14337_v4 }
 0x4f0   : > { %14335 = vst [vmem:[#allocation144_spill] sm:$0xff] %v12873_v1  ;;  %10178 = vpow2.f32 %v6931_v13  ;;  %v6816_v19 = vmin.f32 %v6752_v12, 4.1351666  ;;  %v12878_v62 = vmul.f32 0.5, %v7005_v3  ;;  %v7320_v53 = vadd.f32 %v12862_v39, %v12777_v48 }
 0x4f1   : > { %7437 = vrot.lane.b32.xlu1 %v7322_v50, %s10231_s18  ;;  %v10169_v24 = vpop.eup %10168  ;;  %v6941_v55 = vmul.f32 1.442695, %v6815_v59  ;;  %v12886_v50 = vmul.f32 0.5, %v7006_v34  ;;  %v7074_v4 = vmul.f32 %v12651_v37, %v14339_v15 }
 0x4f2   : > { %7431 = vrot.lane.b32.xlu0 %v7319_v45, %s10231_s18  ;;  %14336 = vst [vmem:[#allocation145_spill] sm:$0xff] %v12878_v62  ;;  %v10171_v54 = vpop.eup %10170  ;;  %v6943_v13 = vmul.f32 1.442695, %v6816_v19  ;;  %v6746_v60 = vpop.permute.xlu0 %6745  ;;  %v7325_v3 = vadd.f32 %v12878_v62, %v12810_v58  ;;  %v7003_v45 = vmul.f32 %v12651_v37, %v10169_v24  ;;  %v14341_v62 = vld [vmem:[#allocation69_spill] sm:$0xff]  ;;  %v14343_v24 = vsel %vm11731_vm2, %v11725_v0, 112.0 }
 0x4f3   : > { %14338 = vst [vmem:[#allocation146_spill] sm:$0xff] %v12886_v50  ;;  %10180 = vpow2.f32 %v6941_v55  ;;  %v6813_v59 = vmin.f32 %v6746_v60, 4.1351666  ;;  %v6748_v34 = vpop.permute.xlu1 %6747  ;;  %v7004_v39 = vmul.f32 %v12651_v37, %v10171_v54  ;;  %v7071_v15 = vmul.f32 %v12651_v37, %v14341_v62 }
 0x4f4   : > { %10182 = vpow2.f32 %v6943_v13  ;;  %v6814_v19 = vmin.f32 %v6748_v34, 4.1351666  ;;  %v12898_v48 = vmul.f32 0.5, %v7003_v45  ;;  %v14347_v34 = vld [vmem:[#allocation70_spill] sm:$0xff] }
 0x4f5   : > { %7433 = vrot.lane.b32.xlu1 %v7320_v53, %s10231_s18  ;;  %v10173_v12 = vpop.eup %10172  ;;  %v6937_v55 = vmul.f32 1.442695, %v6813_v59  ;;  %v7326_v53 = vadd.f32 %v12886_v50, %v12858_v30  ;;  %v12906_v60 = vmul.f32 0.5, %v7004_v39  ;;  %v12917_v59 = vadd.f32 %v7073_v29, %v14343_v24 }
 0x4f6   : > { %7443 = vrot.lane.b32.xlu0 %v7325_v3, %s10231_s18  ;;  %14340 = vst [vmem:[#allocation147_spill] sm:$0xff] %v12898_v48  ;;  %v10175_v54 = vpop.eup %10174  ;;  %v6939_v13 = vmul.f32 1.442695, %v6814_v19  ;;  %v7323_v3 = vadd.f32 %v12898_v48, %v12834_v14  ;;  %v7009_v45 = vmul.f32 %v12651_v37, %v10173_v12  ;;  %v14345_v12 = vsel %vm11731_vm2, %v11727_v22, 112.0 }
 0x4f7   : > { %14342 = vst [vmem:[#allocation148_spill] sm:$0xff] %v12906_v60  ;;  %14344 = vst [vmem:[#allocation149_spill] sm:$0xff] %v12917_v59  ;;  %10184 = vpow2.f32 %v6937_v55  ;;  %v7010_v39 = vmul.f32 %v12651_v37, %v10175_v54  ;;  %v12927_v62 = vadd.f32 %v7074_v4, %v14345_v12  ;;  %v7072_v48 = vmul.f32 %v12651_v37, %v14347_v34 }
 0x4f8   : > { %10186 = vpow2.f32 %v6939_v13  ;;  %v12932_v29 = vmul.f32 0.5, %v7009_v45  ;;  %v7324_v55 = vadd.f32 %v12906_v60, %v12873_v1  ;;  %v6623_v45 = vsel %vm11731_vm2, %v11725_v0, 120.0  ;;  %v14353_v0 = vld [vmem:[#allocation71_spill] sm:$0xff] }
 0x4f9   : > { %7445 = vrot.lane.b32.xlu1 %v7326_v53, %s10231_s18  ;;  %14346 = vst [vmem:[#allocation150_spill] sm:$0xff] %v12927_v62  ;;  %v10177_v24 = vpop.eup %10176  ;;  %v14349_v53 = vld [vmem:[#allocation51_spill] sm:$0xff]  ;;  %v12938_v19 = vmul.f32 0.5, %v7010_v39  ;;  %v14351_v60 = vsel %vm11731_vm2, %v11721_v17, 112.0 }
 0x4fa   : > { %7439 = vrot.lane.b32.xlu0 %v7323_v3, %s10231_s18  ;;  %14348 = vst [vmem:[#allocation151_spill] sm:$0xff] %v12932_v29  ;;  %vm6488_vm3 = vcmp.ge.s32.totalorder %v14349_v53, 0  ;;  %v6491_v54 = vand.u32 3, %v14349_v53  ;;  %v10179_v4 = vpop.eup %10178  ;;  %v7329_v12 = vadd.f32 %v12932_v29, %v12917_v59  ;;  %vm6489_vm4 = vcmp.lt.s32.totalorder %v14349_v53, 12  ;;  %v14355_v29 = vld [vmem:[#allocation72_spill] sm:$0xff] }
 0x4fb   : > { %14350 = vst [vmem:[#allocation51_spill] sm:$0xff] %v12938_v19  ;;  %v7007_v13 = vmul.f32 %v12651_v37, %v10177_v24  ;;  %v7008_v39 = vmul.f32 %v12651_v37, %v10179_v4  ;;  %v12957_v1 = vadd.f32 %v7071_v15, %v14351_v60  ;;  %v14352_v24 = vsel %vm11731_vm2, %v11723_v8, 112.0  ;;  %vm12974_vm5 = vmand %vm6488_vm3, %vm6489_vm4 }
 0x4fc   : > { %v12963_v3 = vadd.f32 %v7072_v48, %v14352_v24  ;;  %v7078_v59 = vmul.f32 %v12651_v37, %v14355_v29  ;;  %vm12978_vm6 = vcmp.lt.s32.totalorder %v6491_v54, 2  ;;  %v6624_v29 = vsel %vm11731_vm2, %v11727_v22, 120.0 }
 0x4fd   : > { %7441 = vrot.lane.b32.xlu1 %v7324_v55, %s10231_s18  ;;  %v7077_v55 = vmul.f32 %v12651_v37, %v14353_v0  ;;  %v12968_v4 = vmul.f32 0.5, %v7007_v13  ;;  %v10181_v34 = vpop.eup %10180  ;;  %v12984_v13 = vmul.f32 0.5, %v7008_v39  ;;  %v6621_v22 = vsel %vm11731_vm2, %v11721_v17, 120.0  ;;  %vm13009_vm7 = vmand %vm12974_vm5, %vm12978_vm6 }
 0x4fe   : > { %7451 = vrot.lane.b32.xlu0 %v7329_v12, %s10231_s18  ;;  %v7330_v12 = vadd.f32 %v12938_v19, %v12927_v62  ;;  %v10183_v24 = vpop.eup %10182  ;;  %v7013_v0 = vmul.f32 %v12651_v37, %v10181_v34  ;;  %v14361_v62 = vld [vmem:[#allocation73_spill] sm:$0xff] }
 0x4ff   : > { %14354 = vst [vmem:[#allocation152_spill] sm:$0xff] %v12968_v4  ;;  %v7340_v60 = vpop.permute.xlu0 %7339  ;;  %14360 = vst [vmem:[#allocation153_spill] sm:$0xff] %v12984_v13  ;;  %v7327_v53 = vadd.f32 %v12968_v4, %v12957_v1  ;;  %v7014_v14 = vmul.f32 %v12651_v37, %v10183_v24  ;;  %v12998_v19 = vadd.f32 %v7077_v55, %v6623_v45  ;;  %v14364_v24 = vld [vmem:[#allocation74_spill] sm:$0xff] }
 0x500   : > { %v7075_v50 = vmul.f32 %v12651_v37, %v14361_v62  ;;  %v13016_v55 = vadd.f32 %v7078_v59, %v6624_v29  ;;  %v7076_v17 = vmul.f32 %v12651_v37, %v14364_v24  ;;  %v7328_v48 = vadd.f32 %v12984_v13, %v12963_v3  ;;  %v14365_v59 = vld [vmem:[#allocation80_spill] sm:$0xff]  ;;  %v14377_v13 = vld [vmem:[#allocation86_spill] sm:$0xff] }
 0x501   : > { %7453 = vrot.lane.b32.xlu1 %v7330_v12, %s10231_s18  ;;  %v13014_v12 = vmul.f32 0.5, %v7013_v0  ;;  %v10185_v45 = vpop.eup %10184  ;;  %v13022_v15 = vmul.f32 0.5, %v7014_v14  ;;  %v14366_v29 = vsub.f32 %v12000_v18, %v14365_v59  ;;  %v14369_v59 = vld [vmem:[#allocation81_spill] sm:$0xff]  ;;  %v14378_v14 = vsub.f32 %v12042_v31, %v14377_v13 }
 0x502   : > { %7447 = vrot.lane.b32.xlu0 %v7327_v53, %s10231_s18  ;;  %v7342_v39 = vpop.permute.xlu1 %7341  ;;  %v10187_v62 = vpop.eup %10186  ;;  %v6622_v53 = vsel %vm11731_vm2, %v11723_v8, 120.0  ;;  %v7011_v0 = vmul.f32 %v12651_v37, %v10185_v45  ;;  %v13039_v36 = vadd.f32 %v7075_v50, %v6621_v22  ;;  %v14368_v22 = vld [vmem:[#allocation68_spill] sm:$0xff] }
 0x503   : > { %v7336_v54 = vpop.permute.xlu0 %7335  ;;  %v7467_v24 = vsel %vm13009_vm7, %v14366_v29, %v7340_v60  ;;  %v7012_v4 = vmul.f32 %v12651_v37, %v10187_v62  ;;  %v13044_v18 = vadd.f32 %v7076_v17, %v6622_v53  ;;  %v14367_v37 = vsub.f32 %v12010_v23, %v12257_v57  ;;  %v14371_v57 = vld [vmem:[#allocation83_spill] sm:$0xff] }
 0x504   : > { %v13042_v8 = vmul.f32 0.5, %v7011_v0  ;;  %v7333_v29 = vadd.f32 %v13014_v12, %v12998_v19 }
 0x505   : > { %7449 = vrot.lane.b32.xlu1 %v7328_v48, %s10231_s18  ;;  %v13046_v45 = vmul.f32 0.5, %v7012_v4  ;;  %v7468_v62 = vsel %vm13009_vm7, %v14367_v37, %v7342_v39  ;;  %v14372_v39 = vsub.f32 %v12022_v38, %v14371_v57  ;;  %v7334_v37 = vadd.f32 %v13022_v15, %v13016_v55 }
 0x506   : > { %7533 = vrot.lane.b32.xlu0 %v7467_v24, %s10232_s21  ;;  %v7267_v50 = vsub.f32 %v13039_v36, %v13042_v8  ;;  %v14370_v24 = vsub.f32 %v14368_v22, %v14369_v59  ;;  %v7331_v22 = vadd.f32 %v13042_v8, %v13039_v36 }
 0x507   : > { %v7338_v60 = vpop.permute.xlu1 %7337  ;;  %v7268_v4 = vsub.f32 %v13044_v18, %v13046_v45 }
 0x508   : > { %v7348_v48 = vpop.permute.xlu0 %7347  ;;  %v7465_v17 = vsel %vm13009_vm7, %v14370_v24, %v7336_v54  ;;  %v7466_v53 = vsel %vm13009_vm7, %v14372_v39, %v7338_v60  ;;  %v7332_v60 = vadd.f32 %v13046_v45, %v13044_v18  ;;  %v14373_v24 = vld [vmem:[#allocation84_spill] sm:$0xff] }
 0x509   : > { %7535 = vrot.lane.b32.xlu1 %v7468_v62, %s10232_s21 }
 0x50a   : > { %7529 = vrot.lane.b32.xlu0 %v7465_v17, %s10232_s21  ;;  %v14374_v17 = vsub.f32 %v12030_v35, %v14373_v24 }
 0x50b   : > { %v7350_v23 = vpop.permute.xlu1 %7349 }
 0x50c   : > { %v7344_v0 = vpop.permute.xlu0 %7343  ;;  %v7471_v57 = vsel %vm13009_vm7, %v14374_v17, %v7348_v48 }
 0x50d   : > { %7531 = vrot.lane.b32.xlu1 %v7466_v53, %s10232_s21  ;;  %v14375_v53 = vld [vmem:[#allocation85_spill] sm:$0xff]  ;;  %v7469_v35 = vsel %vm13009_vm7, %v14378_v14, %v7344_v0  ;;  %v14383_v14 = vld [vmem:[#allocation91_spill] sm:$0xff] }
 0x50e   : > { %7459 = vrot.lane.b32.xlu0 %v7333_v29, %s10231_s18  ;;  %v14376_v29 = vsub.f32 %v12036_v9, %v14375_v53  ;;  %v14384_v0 = vsub.f32 %v12093_v2, %v14383_v14  ;;  %v14395_v14 = vld [vmem:[#allocation99_spill] sm:$0xff] }
 0x50f   : > { %v7346_v54 = vpop.permute.xlu1 %7345 }
 0x510   : > { %v7356_v62 = vpop.permute.xlu0 %7355 }
 0x511   : > { %7461 = vrot.lane.b32.xlu1 %v7334_v37, %s10231_s18  ;;  %v7472_v37 = vsel %vm13009_vm7, %v14376_v29, %v7350_v23  ;;  %v14381_v23 = vld [vmem:[#allocation89_spill] sm:$0xff] }
 0x512   : > { %7455 = vrot.lane.b32.xlu0 %v7331_v22, %s10231_s18 }
 0x513   : > { %v7358_v38 = vpop.permute.xlu1 %7357 }
 0x514   : > { %v7352_v59 = vpop.permute.xlu0 %7351 }
 0x515   : > { %7457 = vrot.lane.b32.xlu1 %v7332_v60, %s10231_s18  ;;  %v14379_v60 = vld [vmem:[#allocation87_spill] sm:$0xff] }
 0x516   : > { %7541 = vrot.lane.b32.xlu0 %v7471_v57, %s10232_s21  ;;  %v14380_v24 = vsub.f32 %v12048_v63, %v14379_v60  ;;  %v14382_v57 = vsub.f32 %v12066_v41, %v14381_v23  ;;  %v7476_v63 = vsel %vm13009_vm7, %v14384_v0, %v7358_v38  ;;  %v14389_v38 = vld [vmem:[#allocation95_spill] sm:$0xff]  ;;  %v14396_v0 = vsub.f32 %v12134_v21, %v14395_v14 }
 0x517   : > { %v7354_v39 = vpop.permute.xlu1 %7353 }
 0x518   : > { %v7364_v22 = vpop.permute.xlu0 %7363  ;;  %v7470_v9 = vsel %vm13009_vm7, %v14380_v24, %v7346_v54  ;;  %v7475_v31 = vsel %vm13009_vm7, %v14382_v57, %v7356_v62  ;;  %v14385_v54 = vld [vmem:[#allocation92_spill] sm:$0xff]  ;;  %v14390_v24 = vsub.f32 %v12108_v28, %v14389_v38 }
 0x519   : > { %7543 = vrot.lane.b32.xlu1 %v7472_v37, %s10232_s21  ;;  %v14386_v29 = vsub.f32 %v12078_v61, %v14385_v54  ;;  %v14387_v37 = vld [vmem:[#allocation93_spill] sm:$0xff] }
 0x51a   : > { %7537 = vrot.lane.b32.xlu0 %v7469_v35, %s10232_s21  ;;  %v14388_v35 = vsub.f32 %v12099_v56, %v14387_v37  ;;  %v7479_v61 = vsel %vm13009_vm7, %v14390_v24, %v7364_v22 }
 0x51b   : > { %v7366_v48 = vpop.permute.xlu1 %7365  ;;  %v7473_v41 = vsel %vm13009_vm7, %v14386_v29, %v7352_v59  ;;  %v14399_v29 = vld [vmem:[#allocation102_spill] sm:$0xff] }
 0x51c   : > { %v7360_v17 = vpop.permute.xlu0 %7359  ;;  %v7474_v2 = vsel %vm13009_vm7, %v14388_v35, %v7354_v39  ;;  %v14393_v39 = vld [vmem:[#allocation97_spill] sm:$0xff] }
 0x51d   : > { %7539 = vrot.lane.b32.xlu1 %v7470_v9, %s10232_s21  ;;  %v14391_v9 = vld [vmem:[#allocation96_spill] sm:$0xff] }
 0x51e   : > { %7549 = vrot.lane.b32.xlu0 %v7475_v31, %s10232_s21  ;;  %v14392_v23 = vsub.f32 %v12118_v11, %v14391_v9  ;;  %v14394_v31 = vsub.f32 %v12124_v7, %v14393_v39 }
 0x51f   : > { %v7362_v13 = vpop.permute.xlu1 %7361 }
 0x520   : > { %v7372_v53 = vpop.permute.xlu0 %7371  ;;  %v7480_v56 = vsel %vm13009_vm7, %v14392_v23, %v7366_v48  ;;  %v7477_v28 = vsel %vm13009_vm7, %v14394_v31, %v7360_v17  ;;  %v7478_v11 = vsel %vm13009_vm7, %v14396_v0, %v7362_v13  ;;  %v14397_v48 = vld [vmem:[#allocation100_spill] sm:$0xff]  ;;  %v14401_v13 = vld [vmem:[#allocation103_spill] sm:$0xff]  ;;  %v14408_v23 = vld [vmem:[#allocation106_spill] sm:$0xff] }
 0x521   : > { %7551 = vrot.lane.b32.xlu1 %v7476_v63, %s10232_s21  ;;  %v14398_v54 = vsub.f32 %v12140_v5, %v14397_v48  ;;  %v14402_v35 = vsub.f32 %v12164_v40, %v14401_v13  ;;  %v14411_v31 = vld [vmem:[#allocation107_spill] sm:$0xff]  ;;  %v14413_v0 = vld [vmem:[#allocation108_spill] sm:$0xff] }
 0x522   : > { %7545 = vrot.lane.b32.xlu0 %v7473_v41, %s10232_s21  ;;  %v14400_v41 = vsub.f32 %v12176_v16, %v14399_v29 }
 0x523   : > { %v7374_v62 = vpop.permute.xlu1 %7373  ;;  %v7483_v7 = vsel %vm13009_vm7, %v14398_v54, %v7372_v53  ;;  %v14416_v54 = vld [vmem:[#allocation109_spill] sm:$0xff] }
 0x524   : > { %v7368_v60 = vpop.permute.xlu0 %7367  ;;  %v7484_v21 = vsel %vm13009_vm7, %v14400_v41, %v7374_v62  ;;  %v14405_v62 = vld [vmem:[#allocation75_spill] sm:$0xff] }
 0x525   : > { %7547 = vrot.lane.b32.xlu1 %v7474_v2, %s10232_s21  ;;  %v7481_v5 = vsel %vm13009_vm7, %v14402_v35, %v7368_v60  ;;  %v14403_v2 = vld [vmem:[#allocation104_spill] sm:$0xff]  ;;  %v14418_v41 = vld [vmem:[#allocation79_spill] sm:$0xff] }
 0x526   : > { %7557 = vrot.lane.b32.xlu0 %v7479_v61, %s10232_s21  ;;  %v14404_v38 = vsub.f32 %v12186_v52, %v14403_v2  ;;  %v14406_v61 = vld [vmem:[#allocation105_spill] sm:$0xff] }
 0x527   : > { %v7370_v59 = vpop.permute.xlu1 %7369  ;;  %v14407_v9 = vsub.f32 %v14405_v62, %v14406_v61 }
 0x528   : > { %v7380_v57 = vpop.permute.xlu0 %7379  ;;  %v7482_v16 = vsel %vm13009_vm7, %v14404_v38, %v7370_v59  ;;  %v14410_v59 = vld [vmem:[#allocation76_spill] sm:$0xff] }
 0x529   : > { %7559 = vrot.lane.b32.xlu1 %v7480_v56, %s10232_s21  ;;  %v7487_v40 = vsel %vm13009_vm7, %v14407_v9, %v7380_v57  ;;  %v14409_v56 = vsub.f32 %v12204_v42, %v14408_v23 }
 0x52a   : > { %7553 = vrot.lane.b32.xlu0 %v7477_v28, %s10232_s21  ;;  %v14412_v28 = vsub.f32 %v14410_v59, %v14411_v31 }
 0x52b   : > { %v7382_v22 = vpop.permute.xlu1 %7381 }
 0x52c   : > { %v7376_v63 = vpop.permute.xlu0 %7375  ;;  %v7488_v52 = vsel %vm13009_vm7, %v14409_v56, %v7382_v22  ;;  %v14415_v22 = vld [vmem:[#allocation77_spill] sm:$0xff] }
 0x52d   : > { %7555 = vrot.lane.b32.xlu1 %v7478_v11, %s10232_s21  ;;  %v7485_v14 = vsel %vm13009_vm7, %v14412_v28, %v7376_v63  ;;  %v14414_v11 = vsub.f32 %v12210_v49, %v14413_v0  ;;  %v14433_v0 = vld [vmem:[#allocation119_spill] sm:$0xff] }
 0x52e   : > { %7565 = vrot.lane.b32.xlu0 %v7483_v7, %s10232_s21  ;;  %v14417_v7 = vsub.f32 %v14415_v22, %v14416_v54  ;;  %v14436_v22 = vld [vmem:[#allocation120_spill] sm:$0xff] }
 0x52f   : > { %v7378_v17 = vpop.permute.xlu1 %7377 }
 0x530   : > { %v7388_v37 = vpop.permute.xlu0 %7387  ;;  %v7486_v42 = vsel %vm13009_vm7, %v14414_v11, %v7378_v17  ;;  %v14421_v17 = vld [vmem:[#allocation78_spill] sm:$0xff]  ;;  %v14434_v11 = vsub.f32 %v12299_v46, %v14433_v0 }
 0x531   : > { %7567 = vrot.lane.b32.xlu1 %v7484_v21, %s10232_s21  ;;  %v7491_v29 = vsel %vm13009_vm7, %v14417_v7, %v7388_v37  ;;  %v14419_v21 = vld [vmem:[#allocation111_spill] sm:$0xff]  ;;  %v14438_v7 = vld [vmem:[#allocation94_spill] sm:$0xff] }
 0x532   : > { %7561 = vrot.lane.b32.xlu0 %v7481_v5, %s10232_s21  ;;  %v14420_v13 = vsub.f32 %v14418_v41, %v14419_v21  ;;  %v14422_v5 = vld [vmem:[#allocation112_spill] sm:$0xff] }
 0x533   : > { %v7390_v53 = vpop.permute.xlu1 %7389  ;;  %v14423_v2 = vsub.f32 %v14421_v17, %v14422_v5  ;;  %v14444_v5 = vld [vmem:[#allocation124_spill] sm:$0xff] }
 0x534   : > { %v7384_v24 = vpop.permute.xlu0 %7383  ;;  %v7492_v49 = vsel %vm13009_vm7, %v14420_v13, %v7390_v53  ;;  %v14426_v53 = vld [vmem:[#allocation82_spill] sm:$0xff]  ;;  %v14442_v13 = vld [vmem:[#allocation123_spill] sm:$0xff] }
 0x535   : > { %7563 = vrot.lane.b32.xlu1 %v7482_v16, %s10232_s21  ;;  %v7489_v38 = vsel %vm13009_vm7, %v14423_v2, %v7384_v24  ;;  %v14424_v16 = vld [vmem:[#allocation114_spill] sm:$0xff]  ;;  %v14445_v2 = vsub.f32 %v12388_v26, %v14444_v5 }
 0x536   : > { %7573 = vrot.lane.b32.xlu0 %v7487_v40, %s10232_s21  ;;  %v14425_v62 = vsub.f32 %v12236_v43, %v14424_v16  ;;  %v14427_v40 = vld [vmem:[#allocation115_spill] sm:$0xff] }
 0x537   : > { %v7386_v60 = vpop.permute.xlu1 %7385  ;;  %v14428_v23 = vsub.f32 %v14426_v53, %v14427_v40  ;;  %v14449_v40 = vld [vmem:[#allocation126_spill] sm:$0xff] }
 0x538   : > { %v7396_v39 = vpop.permute.xlu0 %7395  ;;  %v7490_v61 = vsel %vm13009_vm7, %v14425_v62, %v7386_v60  ;;  %v14431_v60 = vld [vmem:[#allocation117_spill] sm:$0xff] }
 0x539   : > { %7575 = vrot.lane.b32.xlu1 %v7488_v52, %s10232_s21  ;;  %v7495_v56 = vsel %vm13009_vm7, %v14428_v23, %v7396_v39  ;;  %v14429_v52 = vld [vmem:[#allocation116_spill] sm:$0xff]  ;;  %v14432_v28 = vsub.f32 %v12280_v25, %v14431_v60  ;;  %v14447_v62 = vld [vmem:[#allocation125_spill] sm:$0xff]  ;;  %v14450_v23 = vsub.f32 %v12469_v10, %v14449_v40  ;;  %v14474_v40 = vld [vmem:[#allocation138_spill] sm:$0xff] }
 0x53a   : > { %7569 = vrot.lane.b32.xlu0 %v7485_v14, %s10232_s21  ;;  %v14430_v59 = vsub.f32 %v12291_v33, %v14429_v52  ;;  %v14452_v52 = vld [vmem:[#allocation127_spill] sm:$0xff]  ;;  %v14454_v60 = vld [vmem:[#allocation128_spill] sm:$0xff] }
 0x53b   : > { %v7398_v57 = vpop.permute.xlu1 %7397 }
 0x53c   : > { %v7392_v48 = vpop.permute.xlu0 %7391  ;;  %v7496_v43 = vsel %vm13009_vm7, %v14430_v59, %v7398_v57  ;;  %v14435_v57 = vld [vmem:[#allocation88_spill] sm:$0xff] }
 0x53d   : > { %7571 = vrot.lane.b32.xlu1 %v7486_v42, %s10232_s21  ;;  %v7493_v14 = vsel %vm13009_vm7, %v14432_v28, %v7392_v48  ;;  %v14437_v54 = vsub.f32 %v14435_v57, %v14436_v22  ;;  %v14455_v28 = vsub.f32 %v12484_v44, %v14454_v60  ;;  %v14459_v57 = vld [vmem:[#allocation131_spill] sm:$0xff] }
 0x53e   : > { %7581 = vrot.lane.b32.xlu0 %v7491_v29, %s10232_s21  ;;  %v14439_v29 = vld [vmem:[#allocation122_spill] sm:$0xff] }
 0x53f   : > { %v7394_v63 = vpop.permute.xlu1 %7393  ;;  %v14440_v41 = vsub.f32 %v14438_v7, %v14439_v29 }
 0x540   : > { %v7404_v35 = vpop.permute.xlu0 %7403  ;;  %v7494_v33 = vsel %vm13009_vm7, %v14434_v11, %v7394_v63  ;;  %v14441_v63 = vld [vmem:[#allocation90_spill] sm:$0xff] }
 0x541   : > { %7583 = vrot.lane.b32.xlu1 %v7492_v49, %s10232_s21  ;;  %v7499_v25 = vsel %vm13009_vm7, %v14437_v54, %v7404_v35  ;;  %v14443_v49 = vsub.f32 %v14441_v63, %v14442_v13  ;;  %v14466_v13 = vld [vmem:[#allocation118_spill] sm:$0xff] }
 0x542   : > { %7577 = vrot.lane.b32.xlu0 %v7489_v38, %s10232_s21 }
 0x543   : > { %v7406_v37 = vpop.permute.xlu1 %7405 }
 0x544   : > { %v7400_v9 = vpop.permute.xlu0 %7399  ;;  %v7500_v46 = vsel %vm13009_vm7, %v14440_v41, %v7406_v37  ;;  %v14446_v37 = vld [vmem:[#allocation98_spill] sm:$0xff]  ;;  %v14464_v41 = vld [vmem:[#allocation133_spill] sm:$0xff] }
 0x545   : > { %7579 = vrot.lane.b32.xlu1 %v7490_v61, %s10232_s21  ;;  %v7497_v17 = vsel %vm13009_vm7, %v14443_v49, %v7400_v9  ;;  %v14448_v61 = vsub.f32 %v14446_v37, %v14447_v62  ;;  %v14467_v49 = vld [vmem:[#allocation135_spill] sm:$0xff]  ;;  %v14471_v37 = vld [vmem:[#allocation121_spill] sm:$0xff] }
 0x546   : > { %7589 = vrot.lane.b32.xlu0 %v7495_v56, %s10232_s21  ;;  %v14472_v62 = vld [vmem:[#allocation137_spill] sm:$0xff] }
 0x547   : > { %v7402_v24 = vpop.permute.xlu1 %7401 }
 0x548   : > { %v7412_v31 = vpop.permute.xlu0 %7411  ;;  %v7498_v38 = vsel %vm13009_vm7, %v14445_v2, %v7402_v24  ;;  %v14451_v24 = vld [vmem:[#allocation101_spill] sm:$0xff]  ;;  %v14469_v2 = vld [vmem:[#allocation136_spill] sm:$0xff] }
 0x549   : > { %7591 = vrot.lane.b32.xlu1 %v7496_v43, %s10232_s21  ;;  %v7503_v53 = vsel %vm13009_vm7, %v14448_v61, %v7412_v31  ;;  %v14453_v59 = vsub.f32 %v14451_v24, %v14452_v52  ;;  %v14473_v61 = vsub.f32 %v14471_v37, %v14472_v62  ;;  %v14500_v37 = vld [vmem:[#allocation149_spill] sm:$0xff]  ;;  %v14501_v62 = vld [vmem:[#allocation151_spill] sm:$0xff] }
 0x54a   : > { %7585 = vrot.lane.b32.xlu0 %v7493_v14, %s10232_s21 }
 0x54b   : > { %v7414_v39 = vpop.permute.xlu1 %7413 }
 0x54c   : > { %v7408_v42 = vpop.permute.xlu0 %7407  ;;  %v7504_v26 = vsel %vm13009_vm7, %v14450_v23, %v7414_v39  ;;  %v14456_v39 = vld [vmem:[#allocation129_spill] sm:$0xff]  ;;  %v14475_v23 = vsub.f32 %v12681_v27, %v14474_v40 }
 0x54d   : > { %7587 = vrot.lane.b32.xlu1 %v7494_v33, %s10232_s21  ;;  %v7501_v43 = vsel %vm13009_vm7, %v14453_v59, %v7408_v42  ;;  %v14457_v0 = vsub.f32 %v12517_v20, %v14456_v39  ;;  %v14458_v42 = vld [vmem:[#allocation113_spill] sm:$0xff] }
 0x54e   : > { %7597 = vrot.lane.b32.xlu0 %v7499_v25, %s10232_s21  ;;  %v14460_v22 = vsub.f32 %v14458_v42, %v14459_v57  ;;  %v14461_v25 = vld [vmem:[#allocation110_spill] sm:$0xff] }
 0x54f   : > { %v7410_v48 = vpop.permute.xlu1 %7409 }
 0x550   : > { %v7420_v21 = vpop.permute.xlu0 %7419  ;;  %v7502_v10 = vsel %vm13009_vm7, %v14455_v28, %v7410_v48  ;;  %v14462_v48 = vld [vmem:[#allocation132_spill] sm:$0xff]  ;;  %v14480_v28 = vld [vmem:[#allocation130_spill] sm:$0xff] }
 0x551   : > { %7599 = vrot.lane.b32.xlu1 %v7500_v46, %s10232_s21  ;;  %v7507_v11 = vsel %vm13009_vm7, %v14457_v0, %v7420_v21  ;;  %v14463_v7 = vsub.f32 %v14461_v25, %v14462_v48  ;;  %v14465_v46 = vsub.f32 %v12580_v32, %v14464_v41  ;;  %v14483_v0 = vld [vmem:[#allocation48_spill] sm:$0xff] }
 0x552   : > { %7593 = vrot.lane.b32.xlu0 %v7497_v17, %s10232_s21  ;;  %v14468_v17 = vsub.f32 %v14466_v13, %v14467_v49  ;;  %vm7658_vm8 = vcmp.ge.s32.totalorder %v14483_v0, 15  ;;  %vm7659_vm9 = vcmp.lt.s32.totalorder %v14483_v0, 27  ;;  %vm7657_vm11 = vcmp.lt.s32.totalorder %v14483_v0, 15  ;;  %v14493_v41 = vld [vmem:[#allocation140_spill] sm:$0xff] }
 0x553   : > { %v7422_v35 = vpop.permute.xlu1 %7421  ;;  %vm13378_vm10 = vmand %vm7658_vm8, %vm7659_vm9  ;;  %v14496_v49 = vld [vmem:[#allocation12_spill] sm:$0xff] }
 0x554   : > { %v7416_v16 = vpop.permute.xlu0 %7415  ;;  %v7508_v44 = vsel %vm13009_vm7, %v14460_v22, %v7422_v35  ;;  %v14487_v22 = vld [vmem:[#allocation145_spill] sm:$0xff] }
 0x555   : > { %7595 = vrot.lane.b32.xlu1 %v7498_v38, %s10232_s21  ;;  %v7505_v20 = vsel %vm13009_vm7, %v14463_v7, %v7416_v16  ;;  %v14470_v38 = vsub.f32 %v12666_v47, %v14469_v2  ;;  %v14491_v7 = vld [vmem:[#allocation146_spill] sm:$0xff] }
 0x556   : > { %7605 = vrot.lane.b32.xlu0 %v7503_v53, %s10232_s21 }
 0x557   : > { %v7418_v9 = vpop.permute.xlu1 %7417 }
 0x558   : > { %v7428_v56 = vpop.permute.xlu0 %7427  ;;  %v7506_v21 = vsel %vm13009_vm7, %v14465_v46, %v7418_v9  ;;  %v14494_v46 = vld [vmem:[#allocation147_spill] sm:$0xff] }
 0x559   : > { %7607 = vrot.lane.b32.xlu1 %v7504_v26, %s10232_s21  ;;  %v7511_v35 = vsel %vm13009_vm7, %v14468_v17, %v7428_v56  ;;  %v14476_v56 = vld [vmem:[#allocation139_spill] sm:$0xff] }
 0x55a   : > { %7601 = vrot.lane.b32.xlu0 %v7501_v43, %s10232_s21  ;;  %v14477_v24 = vsub.f32 %v12714_v51, %v14476_v56  ;;  %v14478_v43 = vld [vmem:[#allocation141_spill] sm:$0xff] }
 0x55b   : > { %v7430_v31 = vpop.permute.xlu1 %7429 }
 0x55c   : > { %v7424_v14 = vpop.permute.xlu0 %7423  ;;  %v7512_v32 = vsel %vm13009_vm7, %v14470_v38, %v7430_v31  ;;  %v14479_v31 = vsub.f32 %v12762_v6, %v14478_v43  ;;  %v14484_v6 = vld [vmem:[#allocation134_spill] sm:$0xff] }
 0x55d   : > { %7603 = vrot.lane.b32.xlu1 %v7502_v10, %s10232_s21  ;;  %v7509_v53 = vsel %vm13009_vm7, %v14473_v61, %v7424_v14  ;;  %v14481_v10 = vld [vmem:[#allocation142_spill] sm:$0xff]  ;;  %v14502_v61 = vsub.f32 %v14500_v37, %v14501_v62 }
 0x55e   : > { %7613 = vrot.lane.b32.xlu0 %v7507_v11, %s10232_s21  ;;  %v14482_v14 = vsub.f32 %v14480_v28, %v14481_v10  ;;  %v14485_v11 = vld [vmem:[#allocation143_spill] sm:$0xff] }
 0x55f   : > { %v7426_v33 = vpop.permute.xlu1 %7425 }
 0x560   : > { %v7436_v54 = vpop.permute.xlu0 %7435  ;;  %v7510_v47 = vsel %vm13009_vm7, %v14475_v23, %v7426_v33  ;;  %v14486_v33 = vsub.f32 %v14484_v6, %v14485_v11  ;;  %v14511_v6 = vld [vmem:[#allocation153_spill] sm:$0xff] }
 0x561   : > { %7615 = vrot.lane.b32.xlu1 %v7508_v44, %s10232_s21  ;;  %v7515_v52 = vsel %vm13009_vm7, %v14477_v24, %v7436_v54  ;;  %v14488_v44 = vsub.f32 %v12810_v58, %v14487_v22  ;;  %v14505_v24 = vld [vmem:[#allocation150_spill] sm:$0xff]  ;;  %v14512_v11 = vsub.f32 %v12963_v3, %v14511_v6 }
 0x562   : > { %7609 = vrot.lane.b32.xlu0 %v7505_v20, %s10232_s21  ;;  %v14492_v20 = vsub.f32 %v12858_v30, %v14491_v7 }
 0x563   : > { %v7438_v29 = vpop.permute.xlu1 %7437 }
 0x564   : > { %v7432_v63 = vpop.permute.xlu0 %7431  ;;  %v7516_v27 = vsel %vm13009_vm7, %v14479_v31, %v7438_v29 }
 0x565   : > { %7611 = vrot.lane.b32.xlu1 %v7506_v21, %s10232_s21  ;;  %v7513_v51 = vsel %vm13009_vm7, %v14482_v14, %v7432_v63  ;;  %v14495_v21 = vsub.f32 %v14493_v41, %v14494_v46  ;;  %v14510_v14 = vld [vmem:[#allocation15_spill] sm:$0xff]  ;;  %v14518_v41 = vld [vmem:[#allocation10_spill] sm:$0xff] }
 0x566   : > { %7621 = vrot.lane.b32.xlu0 %v7511_v35, %s10232_s21  ;;  %v14497_v35 = vld [vmem:[#allocation144_spill] sm:$0xff] }
 0x567   : > { %v7434_v5 = vpop.permute.xlu1 %7433 }
 0x568   : > { %v7444_v16 = vpop.permute.xlu0 %7443  ;;  %v7514_v42 = vsel %vm13009_vm7, %v14486_v33, %v7434_v5  ;;  %v14498_v5 = vld [vmem:[#allocation148_spill] sm:$0xff] }
 0x569   : > { %7623 = vrot.lane.b32.xlu1 %v7512_v32, %s10232_s21  ;;  %v7519_v54 = vsel %vm13009_vm7, %v14488_v44, %v7444_v16  ;;  %v14499_v2 = vsub.f32 %v14497_v35, %v14498_v5  ;;  %v14513_v44 = vsub.f32 %v12998_v19, %v13014_v12  ;;  %v14515_v19 = vsub.f32 %v13016_v55, %v13022_v15  ;;  %v14520_v35 = vld [vmem:[#allocation11_spill] sm:$0xff] }
 0x56a   : > { %7617 = vrot.lane.b32.xlu0 %v7509_v53, %s10232_s21 }
 0x56b   : > { %v7446_v9 = vpop.permute.xlu1 %7445 }
 0x56c   : > { %v7440_v26 = vpop.permute.xlu0 %7439  ;;  %v7520_v58 = vsel %vm13009_vm7, %v14492_v20, %v7446_v9  ;;  %v14503_v9 = vld [vmem:[#allocation14_spill] sm:$0xff] }
 0x56d   : > { %7619 = vrot.lane.b32.xlu1 %v7510_v47, %s10232_s21  ;;  %v7517_v63 = vsel %vm13009_vm7, %v14495_v21, %v7440_v26  ;;  %v14504_v47 = vld [vmem:[#allocation13_spill] sm:$0xff] }
 0x56e   : > { %7629 = vrot.lane.b32.xlu0 %v7515_v52, %s10232_s21  ;;  %v14506_v52 = vld [vmem:[#allocation51_spill] sm:$0xff] }
 0x56f   : > { %v7442_v59 = vpop.permute.xlu1 %7441 }
 0x570   : > { %v7452_v60 = vpop.permute.xlu0 %7451  ;;  %v7518_v38 = vsel %vm13009_vm7, %v14499_v2, %v7442_v59  ;;  %v14507_v59 = vsub.f32 %v14505_v24, %v14506_v52  ;;  %v14524_v24 = vld [vmem:[#allocation20_spill] sm:$0xff] }
 0x571   : > { %7631 = vrot.lane.b32.xlu1 %v7516_v27, %s10232_s21  ;;  %v7523_v53 = vsel %vm13009_vm7, %v14502_v61, %v7452_v60  ;;  %v14508_v60 = vld [vmem:[#allocation152_spill] sm:$0xff]  ;;  %v14522_v61 = vld [vmem:[#allocation18_spill] sm:$0xff] }
 0x572   : > { %7625 = vrot.lane.b32.xlu0 %v7513_v51, %s10232_s21  ;;  %v14509_v28 = vsub.f32 %v12957_v1, %v14508_v60 }
 0x573   : > { %v7454_v39 = vpop.permute.xlu1 %7453 }
 0x574   : > { %v7448_v57 = vpop.permute.xlu0 %7447  ;;  %v7524_v43 = vsel %vm13009_vm7, %v14507_v59, %v7454_v39 }
 0x575   : > { %7627 = vrot.lane.b32.xlu1 %v7514_v42, %s10232_s21  ;;  %v7521_v10 = vsel %vm13009_vm7, %v14509_v28, %v7448_v57 }
 0x576   : > { %7637 = vrot.lane.b32.xlu0 %v7519_v54, %s10232_s21 }
 0x577   : > { %v7450_v48 = vpop.permute.xlu1 %7449 }
 0x578   : > { %v7534_v29 = vpop.permute.xlu0 %7533  ;;  %v7522_v1 = vsel %vm13009_vm7, %v14512_v11, %v7450_v48  ;;  %v14516_v48 = vld [vmem:[#allocation8_spill] sm:$0xff] }
 0x579   : > { %v7665_v13 = vsel %vm13378_vm10, %v7534_v29, 0.0  ;;  %7639 = vrot.lane.b32.xlu1 %v7520_v58, %s10232_s21  ;;  %v14517_v58 = vld [vmem:[#allocation9_spill] sm:$0xff] }
 0x57a   : > { %v7731_v30 = vsel %vm7657_vm11, %v14496_v49, %v7665_v13  ;;  %7633 = vrot.lane.b32.xlu0 %v7517_v63, %s10232_s21  ;;  %v14519_v63 = vld [vmem:[#allocation16_spill] sm:$0xff] }
 0x57b   : > { %7795 = vst [vmem:[%s10289_s7 + $0x10] sm:$0xff] %v7731_v30  ;;  %v7536_v17 = vpop.permute.xlu1 %7535 }
 0x57c   : > { %v7666_v32 = vsel %vm13378_vm10, %v7536_v17, 0.0  ;;  %v7530_v16 = vpop.permute.xlu0 %7529 }
 0x57d   : > { %v7732_v40 = vsel %vm7657_vm11, %v14503_v9, %v7666_v32  ;;  %v7663_v23 = vsel %vm13378_vm10, %v7530_v16, 0.0  ;;  %7635 = vrot.lane.b32.xlu1 %v7518_v38, %s10232_s21  ;;  %v14521_v38 = vld [vmem:[#allocation17_spill] sm:$0xff] }
 0x57e   : > { %7796 = vst [vmem:[%s10289_s7 + $0x18] sm:$0xff] %v7732_v40  ;;  %v7729_v26 = vsel %vm7657_vm11, %v14504_v47, %v7663_v23  ;;  %7645 = vrot.lane.b32.xlu0 %v7523_v53, %s10232_s21  ;;  %v14523_v40 = vld [vmem:[#allocation19_spill] sm:$0xff] }
 0x57f   : > { %7793 = vst [vmem:[%s10289_s7] sm:$0xff] %v7729_v26  ;;  %v7532_v56 = vpop.permute.xlu1 %7531 }
 0x580   : > { %v7664_v31 = vsel %vm13378_vm10, %v7532_v56, 0.0  ;;  %v7460_v27 = vpop.permute.xlu0 %7459 }
 0x581   : > { %v7730_v51 = vsel %vm7657_vm11, %v14510_v14, %v7664_v31  ;;  %7647 = vrot.lane.b32.xlu1 %v7524_v43, %s10232_s21  ;;  %v7527_v36 = vsel %vm13009_vm7, %v14513_v44, %v7460_v27  ;;  %v14525_v43 = vld [vmem:[#allocation22_spill] sm:$0xff] }
 0x582   : > { %7794 = vst [vmem:[%s10289_s7 + $0x8] sm:$0xff] %v7730_v51  ;;  %7641 = vrot.lane.b32.xlu0 %v7521_v10, %s10232_s21  ;;  %v14526_v10 = vld [vmem:[#allocation23_spill] sm:$0xff] }
 0x583   : > { %v7462_v39 = vpop.permute.xlu1 %7461 }
 0x584   : > { %v7456_v33 = vpop.permute.xlu0 %7455  ;;  %v7528_v12 = vsel %vm13009_vm7, %v14515_v19, %v7462_v39  ;;  %v14527_v39 = vld [vmem:[#allocation24_spill] sm:$0xff] }
 0x585   : > { %v7525_v42 = vsel %vm13009_vm7, %v7267_v50, %v7456_v33  ;;  %7643 = vrot.lane.b32.xlu1 %v7522_v1, %s10232_s21  ;;  %v14514_v50 = vld [vmem:[#allocation21_spill] sm:$0xff] }
 0x586   : > { %7649 = vrot.lane.b32.xlu0 %v7525_v42, %s10232_s21  ;;  %v14528_v42 = vld [vmem:[#allocation25_spill] sm:$0xff] }
 0x587   : > { %v7458_v57 = vpop.permute.xlu1 %7457 }
 0x588   : > { %v7526_v3 = vsel %vm13009_vm7, %v7268_v4, %v7458_v57  ;;  %v7542_v22 = vpop.permute.xlu0 %7541 }
 0x589   : > { %v7669_v8 = vsel %vm13378_vm10, %v7542_v22, 0.0  ;;  %7651 = vrot.lane.b32.xlu1 %v7526_v3, %s10232_s21  ;;  %v14529_v22 = vld [vmem:[#allocation26_spill] sm:$0xff] }
 0x58a   : > { %v7735_v18 = vsel %vm7657_vm11, %v14514_v50, %v7669_v8  ;;  %7653 = vrot.lane.b32.xlu0 %v7527_v36, %s10232_s21 }
 0x58b   : > { %7799 = vst [vmem:[%s10289_s7 + $0x30] sm:$0xff] %v7735_v18  ;;  %v7544_v45 = vpop.permute.xlu1 %7543  ;;  %v14530_v18 = vld [vmem:[#allocation27_spill] sm:$0xff] }
 0x58c   : > { %v7670_v4 = vsel %vm13378_vm10, %v7544_v45, 0.0  ;;  %v7538_v54 = vpop.permute.xlu0 %7537 }
 0x58d   : > { %v7736_v7 = vsel %vm7657_vm11, %v14516_v48, %v7670_v4  ;;  %v7667_v20 = vsel %vm13378_vm10, %v7538_v54, 0.0  ;;  %7655 = vrot.lane.b32.xlu1 %v7528_v12, %s10232_s21  ;;  %v14531_v12 = vld [vmem:[#allocation28_spill] sm:$0xff] }
 0x58e   : > { %7800 = vst [vmem:[%s10289_s7 + $0x38] sm:$0xff] %v7736_v7  ;;  %v7733_v34 = vsel %vm7657_vm11, %v14517_v58, %v7667_v20  ;;  %v14532_v20 = vld [vmem:[#allocation29_spill] sm:$0xff] }
 0x58f   : > { %7797 = vst [vmem:[%s10289_s7 + $0x20] sm:$0xff] %v7733_v34  ;;  %v7540_v55 = vpop.permute.xlu1 %7539 }
 0x590   : > { %v7668_v15 = vsel %vm13378_vm10, %v7540_v55, 0.0  ;;  %v7550_v29 = vpop.permute.xlu0 %7549  ;;  %v14533_v55 = vld [vmem:[#allocation30_spill] sm:$0xff] }
 0x591   : > { %v7734_v46 = vsel %vm7657_vm11, %v14518_v41, %v7668_v15  ;;  %v7673_v21 = vsel %vm13378_vm10, %v7550_v29, 0.0 }
 0x592   : > { %7798 = vst [vmem:[%s10289_s7 + $0x28] sm:$0xff] %v7734_v46  ;;  %v7739_v13 = vsel %vm7657_vm11, %v14519_v63, %v7673_v21  ;;  %v14534_v21 = vld [vmem:[#allocation31_spill] sm:$0xff] }
 0x593   : > { %7803 = vst [vmem:[%s10289_s7 + $0x50] sm:$0xff] %v7739_v13  ;;  %v7552_v49 = vpop.permute.xlu1 %7551 }
 0x594   : > { %v7674_v30 = vsel %vm13378_vm10, %v7552_v49, 0.0  ;;  %v7546_v17 = vpop.permute.xlu0 %7545  ;;  %v14535_v49 = vld [vmem:[#allocation32_spill] sm:$0xff] }
 0x595   : > { %v7740_v5 = vsel %vm7657_vm11, %v14520_v35, %v7674_v30  ;;  %v7671_v2 = vsel %vm13378_vm10, %v7546_v17, 0.0 }
 0x596   : > { %7804 = vst [vmem:[%s10289_s7 + $0x58] sm:$0xff] %v7740_v5  ;;  %v7737_v32 = vsel %vm7657_vm11, %v14521_v38, %v7671_v2  ;;  %v14536_v2 = vld [vmem:[#allocation33_spill] sm:$0xff] }
 0x597   : > { %7801 = vst [vmem:[%s10289_s7 + $0x40] sm:$0xff] %v7737_v32  ;;  %v7548_v16 = vpop.permute.xlu1 %7547 }
 0x598   : > { %v7672_v37 = vsel %vm13378_vm10, %v7548_v16, 0.0  ;;  %v7558_v62 = vpop.permute.xlu0 %7557  ;;  %v14537_v16 = vld [vmem:[#allocation34_spill] sm:$0xff] }
 0x599   : > { %v7738_v53 = vsel %vm7657_vm11, %v14522_v61, %v7672_v37  ;;  %v7677_v9 = vsel %vm13378_vm10, %v7558_v62, 0.0 }
 0x59a   : > { %7802 = vst [vmem:[%s10289_s7 + $0x48] sm:$0xff] %v7738_v53  ;;  %v7743_v23 = vsel %vm7657_vm11, %v14523_v40, %v7677_v9  ;;  %v14538_v9 = vld [vmem:[#allocation35_spill] sm:$0xff] }
 0x59b   : > { %7807 = vst [vmem:[%s10289_s7 + $0x70] sm:$0xff] %v7743_v23  ;;  %v7560_v47 = vpop.permute.xlu1 %7559 }
 0x59c   : > { %v7678_v26 = vsel %vm13378_vm10, %v7560_v47, 0.0  ;;  %v7554_v56 = vpop.permute.xlu0 %7553  ;;  %v14539_v47 = vld [vmem:[#allocation36_spill] sm:$0xff] }
 0x59d   : > { %v7744_v52 = vsel %vm7657_vm11, %v14524_v24, %v7678_v26  ;;  %v7675_v59 = vsel %vm13378_vm10, %v7554_v56, 0.0 }
 0x59e   : > { %7808 = vst [vmem:[%s10289_s7 + $0x78] sm:$0xff] %v7744_v52  ;;  %v7741_v31 = vsel %vm7657_vm11, %v14525_v43, %v7675_v59  ;;  %v14540_v59 = vld [vmem:[#allocation37_spill] sm:$0xff] }
 0x59f   : > { %7805 = vst [vmem:[%s10289_s7 + $0x60] sm:$0xff] %v7741_v31  ;;  %v7556_v27 = vpop.permute.xlu1 %7555 }
 0x5a0   : > { %v7676_v60 = vsel %vm13378_vm10, %v7556_v27, 0.0  ;;  %v7566_v28 = vpop.permute.xlu0 %7565  ;;  %v14541_v27 = vld [vmem:[#allocation38_spill] sm:$0xff] }
 0x5a1   : > { %v7742_v14 = vsel %vm7657_vm11, %v14526_v10, %v7676_v60  ;;  %v7681_v51 = vsel %vm13378_vm10, %v7566_v28, 0.0 }
 0x5a2   : > { %7806 = vst [vmem:[%s10289_s7 + $0x68] sm:$0xff] %v7742_v14  ;;  %v7747_v6 = vsel %vm7657_vm11, %v14527_v39, %v7681_v51  ;;  %v14542_v51 = vld [vmem:[#allocation39_spill] sm:$0xff] }
 0x5a3   : > { %7811 = vst [vmem:[%s10289_s7 + $0x90] sm:$0xff] %v7747_v6  ;;  %v7568_v11 = vpop.permute.xlu1 %7567 }
 0x5a4   : > { %v7682_v1 = vsel %vm13378_vm10, %v7568_v11, 0.0  ;;  %v7562_v33 = vpop.permute.xlu0 %7561  ;;  %v14543_v11 = vld [vmem:[#allocation40_spill] sm:$0xff] }
 0x5a5   : > { %v7748_v57 = vsel %vm7657_vm11, %v14528_v42, %v7682_v1  ;;  %v7679_v3 = vsel %vm13378_vm10, %v7562_v33, 0.0 }
 0x5a6   : > { %7812 = vst [vmem:[%s10289_s7 + $0x98] sm:$0xff] %v7748_v57  ;;  %v7745_v44 = vsel %vm7657_vm11, %v14529_v22, %v7679_v3  ;;  %v14544_v3 = vld [vmem:[#allocation41_spill] sm:$0xff] }
 0x5a7   : > { %7809 = vst [vmem:[%s10289_s7 + $0x80] sm:$0xff] %v7745_v44  ;;  %v7564_v36 = vpop.permute.xlu1 %7563 }
 0x5a8   : > { %v7680_v8 = vsel %vm13378_vm10, %v7564_v36, 0.0  ;;  %v7574_v50 = vpop.permute.xlu0 %7573  ;;  %v14545_v36 = vld [vmem:[#allocation42_spill] sm:$0xff] }
 0x5a9   : > { %v7746_v45 = vsel %vm7657_vm11, %v14530_v18, %v7680_v8  ;;  %v7685_v19 = vsel %vm13378_vm10, %v7574_v50, 0.0 }
 0x5aa   : > { %7810 = vst [vmem:[%s10289_s7 + $0x88] sm:$0xff] %v7746_v45  ;;  %v7751_v4 = vsel %vm7657_vm11, %v14531_v12, %v7685_v19  ;;  %v14546_v19 = vld [vmem:[#allocation43_spill] sm:$0xff] }
 0x5ab   : > { %7815 = vst [vmem:[%s10289_s7 + $0xb0] sm:$0xff] %v7751_v4  ;;  %v7576_v54 = vpop.permute.xlu1 %7575 }
 0x5ac   : > { %v7686_v48 = vsel %vm13378_vm10, %v7576_v54, 0.0  ;;  %v7570_v7 = vpop.permute.xlu0 %7569  ;;  %v14547_v54 = vld [vmem:[#allocation44_spill] sm:$0xff] }
 0x5ad   : > { %v7752_v58 = vsel %vm7657_vm11, %v14532_v20, %v7686_v48  ;;  %v7683_v34 = vsel %vm13378_vm10, %v7570_v7, 0.0 }
 0x5ae   : > { %7816 = vst [vmem:[%s10289_s7 + $0xb8] sm:$0xff] %v7752_v58  ;;  %v7749_v15 = vsel %vm7657_vm11, %v14533_v55, %v7683_v34  ;;  %v14548_v34 = vld [vmem:[#allocation45_spill] sm:$0xff] }
 0x5af   : > { %7813 = vst [vmem:[%s10289_s7 + $0xa0] sm:$0xff] %v7749_v15  ;;  %v7572_v29 = vpop.permute.xlu1 %7571 }
 0x5b0   : > { %v7684_v41 = vsel %vm13378_vm10, %v7572_v29, 0.0  ;;  %v7582_v46 = vpop.permute.xlu0 %7581  ;;  %v14549_v29 = vld [vmem:[#allocation46_spill] sm:$0xff] }
 0x5b1   : > { %v7750_v63 = vsel %vm7657_vm11, %v14534_v21, %v7684_v41  ;;  %v7689_v13 = vsel %vm13378_vm10, %v7582_v46, 0.0 }
 0x5b2   : > { %7814 = vst [vmem:[%s10289_s7 + $0xa8] sm:$0xff] %v7750_v63  ;;  %v7755_v30 = vsel %vm7657_vm11, %v14535_v49, %v7689_v13  ;;  %v14550_v13 = vld [vmem:[#allocation47_spill] sm:$0xff] }
 0x5b3   : > { %7819 = vst [vmem:[%s10289_s7 + $0xd0] sm:$0xff] %v7755_v30  ;;  %v7584_v17 = vpop.permute.xlu1 %7583 }
 0x5b4   : > { %v7690_v35 = vsel %vm13378_vm10, %v7584_v17, 0.0  ;;  %v7578_v5 = vpop.permute.xlu0 %7577  ;;  %v14551_v17 = vld [vmem:[#allocation49_spill] sm:$0xff] }
 0x5b5   : > { %v7756_v38 = vsel %vm7657_vm11, %v14536_v2, %v7690_v35  ;;  %v7687_v32 = vsel %vm13378_vm10, %v7578_v5, 0.0 }
 0x5b6   : > { %7820 = vst [vmem:[%s10289_s7 + $0xd8] sm:$0xff] %v7756_v38  ;;  %v7753_v37 = vsel %vm7657_vm11, %v14537_v16, %v7687_v32  ;;  %v14552_v32 = vld [vmem:[#allocation50_spill] sm:$0xff] }
 0x5b7   : > { %7817 = vst [vmem:[%s10289_s7 + $0xc0] sm:$0xff] %v7753_v37  ;;  %v7580_v62 = vpop.permute.xlu1 %7579 }
 0x5b8   : > { %v7688_v61 = vsel %vm13378_vm10, %v7580_v62, 0.0  ;;  %v7590_v53 = vpop.permute.xlu0 %7589  ;;  %v14553_v62 = vld [vmem:[#allocation52_spill] sm:$0xff] }
 0x5b9   : > { %v7754_v40 = vsel %vm7657_vm11, %v14538_v9, %v7688_v61  ;;  %v7693_v23 = vsel %vm13378_vm10, %v7590_v53, 0.0 }
 0x5ba   : > { %7818 = vst [vmem:[%s10289_s7 + $0xc8] sm:$0xff] %v7754_v40  ;;  %v7759_v26 = vsel %vm7657_vm11, %v14539_v47, %v7693_v23  ;;  %v14554_v23 = vld [vmem:[#allocation53_spill] sm:$0xff] }
 0x5bb   : > { %7823 = vst [vmem:[%s10289_s7 + $0xf0] sm:$0xff] %v7759_v26  ;;  %v7592_v56 = vpop.permute.xlu1 %7591 }
 0x5bc   : > { %v7694_v24 = vsel %vm13378_vm10, %v7592_v56, 0.0  ;;  %v7586_v52 = vpop.permute.xlu0 %7585  ;;  %v14555_v56 = vld [vmem:[#allocation54_spill] sm:$0xff] }
 0x5bd   : > { %v7760_v43 = vsel %vm7657_vm11, %v14540_v59, %v7694_v24  ;;  %v7691_v31 = vsel %vm13378_vm10, %v7586_v52, 0.0 }
 0x5be   : > { %7824 = vst [vmem:[%s10289_s7 + $0xf8] sm:$0xff] %v7760_v43  ;;  %v7757_v60 = vsel %vm7657_vm11, %v14541_v27, %v7691_v31  ;;  %v14556_v31 = vld [vmem:[#allocation55_spill] sm:$0xff] }
 0x5bf   : > { %7821 = vst [vmem:[%s10289_s7 + $0xe0] sm:$0xff] %v7757_v60  ;;  %v7588_v28 = vpop.permute.xlu1 %7587 }
 0x5c0   : > { %v7692_v10 = vsel %vm13378_vm10, %v7588_v28, 0.0  ;;  %v7598_v14 = vpop.permute.xlu0 %7597  ;;  %v14557_v28 = vld [vmem:[#allocation56_spill] sm:$0xff] }
 0x5c1   : > { %v7758_v39 = vsel %vm7657_vm11, %v14542_v51, %v7692_v10  ;;  %v7697_v6 = vsel %vm13378_vm10, %v7598_v14, 0.0 }
 0x5c2   : > { %7822 = vst [vmem:[%s10289_s7 + $0xe8] sm:$0xff] %v7758_v39  ;;  %v7763_v1 = vsel %vm7657_vm11, %v14543_v11, %v7697_v6  ;;  %v14558_v6 = vld [vmem:[#allocation57_spill] sm:$0xff] }
 0x5c3   : > { %7827 = vst [vmem:[%s10289_s7 + $0x110] sm:$0xff] %v7763_v1  ;;  %v7600_v33 = vpop.permute.xlu1 %7599 }
 0x5c4   : > { %v7698_v42 = vsel %vm13378_vm10, %v7600_v33, 0.0  ;;  %v7594_v57 = vpop.permute.xlu0 %7593  ;;  %v14559_v33 = vld [vmem:[#allocation58_spill] sm:$0xff] }
 0x5c5   : > { %v7764_v22 = vsel %vm7657_vm11, %v14544_v3, %v7698_v42  ;;  %v7695_v44 = vsel %vm13378_vm10, %v7594_v57, 0.0 }
 0x5c6   : > { %7828 = vst [vmem:[%s10289_s7 + $0x118] sm:$0xff] %v7764_v22  ;;  %v7761_v8 = vsel %vm7657_vm11, %v14545_v36, %v7695_v44  ;;  %v14560_v44 = vld [vmem:[#allocation59_spill] sm:$0xff] }
 0x5c7   : > { %7825 = vst [vmem:[%s10289_s7 + $0x100] sm:$0xff] %v7761_v8  ;;  %v7596_v50 = vpop.permute.xlu1 %7595 }
 0x5c8   : > { %v7696_v18 = vsel %vm13378_vm10, %v7596_v50, 0.0  ;;  %v7606_v45 = vpop.permute.xlu0 %7605  ;;  %v14561_v50 = vld [vmem:[#allocation60_spill] sm:$0xff] }
 0x5c9   : > { %v7762_v12 = vsel %vm7657_vm11, %v14546_v19, %v7696_v18  ;;  %v7701_v4 = vsel %vm13378_vm10, %v7606_v45, 0.0 }
 0x5ca   : > { %7826 = vst [vmem:[%s10289_s7 + $0x108] sm:$0xff] %v7762_v12  ;;  %v7767_v48 = vsel %vm7657_vm11, %v14547_v54, %v7701_v4  ;;  %v14562_v4 = vld [vmem:[#allocation61_spill] sm:$0xff] }
 0x5cb   : > { %7831 = vst [vmem:[%s10289_s7 + $0x130] sm:$0xff] %v7767_v48  ;;  %v7608_v7 = vpop.permute.xlu1 %7607 }
 0x5cc   : > { %v7702_v20 = vsel %vm13378_vm10, %v7608_v7, 0.0  ;;  %v7602_v58 = vpop.permute.xlu0 %7601  ;;  %v14563_v7 = vld [vmem:[#allocation62_spill] sm:$0xff] }
 0x5cd   : > { %v7768_v55 = vsel %vm7657_vm11, %v14548_v34, %v7702_v20  ;;  %v7699_v15 = vsel %vm13378_vm10, %v7602_v58, 0.0 }
 0x5ce   : > { %7832 = vst [vmem:[%s10289_s7 + $0x138] sm:$0xff] %v7768_v55  ;;  %v7765_v41 = vsel %vm7657_vm11, %v14549_v29, %v7699_v15  ;;  %v14564_v15 = vld [vmem:[#allocation63_spill] sm:$0xff] }
 0x5cf   : > { %7829 = vst [vmem:[%s10289_s7 + $0x120] sm:$0xff] %v7765_v41  ;;  %v7604_v46 = vpop.permute.xlu1 %7603 }
 0x5d0   : > { %v7700_v21 = vsel %vm13378_vm10, %v7604_v46, 0.0  ;;  %v7614_v63 = vpop.permute.xlu0 %7613  ;;  %v14565_v46 = vld [vmem:[#allocation64_spill] sm:$0xff] }
 0x5d1   : > { %v7766_v49 = vsel %vm7657_vm11, %v14550_v13, %v7700_v21  ;;  %v7705_v30 = vsel %vm13378_vm10, %v7614_v63, 0.0 }
 0x5d2   : > { %7830 = vst [vmem:[%s10289_s7 + $0x128] sm:$0xff] %v7766_v49  ;;  %v7771_v35 = vsel %vm7657_vm11, %v14551_v17, %v7705_v30  ;;  %v14566_v30 = vld [vmem:[#allocation65_spill] sm:$0xff] }
 0x5d3   : > { %7835 = vst [vmem:[%s10289_s7 + $0x150] sm:$0xff] %v7771_v35  ;;  %v7616_v5 = vpop.permute.xlu1 %7615 }
 0x5d4   : > { %v7706_v2 = vsel %vm13378_vm10, %v7616_v5, 0.0  ;;  %v7610_v38 = vpop.permute.xlu0 %7609  ;;  %v14567_v5 = vld [vmem:[#allocation66_spill] sm:$0xff] }
 0x5d5   : > { %v7772_v16 = vsel %vm7657_vm11, %v14552_v32, %v7706_v2  ;;  %v7703_v37 = vsel %vm13378_vm10, %v7610_v38, 0.0 }
 0x5d6   : > { %7836 = vst [vmem:[%s10289_s7 + $0x158] sm:$0xff] %v7772_v16  ;;  %v7769_v61 = vsel %vm7657_vm11, %v14553_v62, %v7703_v37  ;;  %v14568_v37 = vld [vmem:[#allocation67_spill] sm:$0xff] }
 0x5d7   : > { %7833 = vst [vmem:[%s10289_s7 + $0x140] sm:$0xff] %v7769_v61  ;;  %v7612_v53 = vpop.permute.xlu1 %7611 }
 0x5d8   : > { %v7704_v9 = vsel %vm13378_vm10, %v7612_v53, 0.0  ;;  %v7622_v40 = vpop.permute.xlu0 %7621  ;;  %v14569_v53 = vld [vmem:[#allocation69_spill] sm:$0xff] }
 0x5d9   : > { %v7770_v47 = vsel %vm7657_vm11, %v14554_v23, %v7704_v9  ;;  %v7709_v26 = vsel %vm13378_vm10, %v7622_v40, 0.0 }
 0x5da   : > { %7834 = vst [vmem:[%s10289_s7 + $0x148] sm:$0xff] %v7770_v47  ;;  %v7775_v24 = vsel %vm7657_vm11, %v14555_v56, %v7709_v26  ;;  %v14570_v26 = vld [vmem:[#allocation70_spill] sm:$0xff] }
 0x5db   : > { %7839 = vst [vmem:[%s10289_s7 + $0x170] sm:$0xff] %v7775_v24  ;;  %v7624_v52 = vpop.permute.xlu1 %7623 }
 0x5dc   : > { %v7710_v59 = vsel %vm13378_vm10, %v7624_v52, 0.0  ;;  %v7618_v43 = vpop.permute.xlu0 %7617  ;;  %v14571_v52 = vld [vmem:[#allocation73_spill] sm:$0xff] }
 0x5dd   : > { %v7776_v27 = vsel %vm7657_vm11, %v14556_v31, %v7710_v59  ;;  %v7707_v60 = vsel %vm13378_vm10, %v7618_v43, 0.0 }
 0x5de   : > { %7840 = vst [vmem:[%s10289_s7 + $0x178] sm:$0xff] %v7776_v27  ;;  %v7773_v10 = vsel %vm7657_vm11, %v14557_v28, %v7707_v60  ;;  %v14572_v60 = vld [vmem:[#allocation74_spill] sm:$0xff] }
 0x5df   : > { %7837 = vst [vmem:[%s10289_s7 + $0x160] sm:$0xff] %v7773_v10  ;;  %v7620_v14 = vpop.permute.xlu1 %7619 }
 0x5e0   : > { %v7708_v51 = vsel %vm13378_vm10, %v7620_v14, 0.0  ;;  %v7630_v39 = vpop.permute.xlu0 %7629  ;;  %v14573_v14 = vld [vmem:[#allocation71_spill] sm:$0xff] }
 0x5e1   : > { %v7774_v11 = vsel %vm7657_vm11, %v14558_v6, %v7708_v51  ;;  %v7713_v1 = vsel %vm13378_vm10, %v7630_v39, 0.0 }
 0x5e2   : > { %7838 = vst [vmem:[%s10289_s7 + $0x168] sm:$0xff] %v7774_v11  ;;  %v7779_v42 = vsel %vm7657_vm11, %v14559_v33, %v7713_v1  ;;  %v14574_v11 = vld [vmem:[#allocation72_spill] sm:$0xff] }
 0x5e3   : > { %7843 = vst [vmem:[%s10289_s7 + $0x190] sm:$0xff] %v7779_v42  ;;  %v7632_v57 = vpop.permute.xlu1 %7631 }
 0x5e4   : > { %v7714_v3 = vsel %vm13378_vm10, %v7632_v57, 0.0  ;;  %v7626_v22 = vpop.permute.xlu0 %7625 }
 0x5e5   : > { %v7780_v36 = vsel %vm7657_vm11, %v14560_v44, %v7714_v3  ;;  %v7711_v8 = vsel %vm13378_vm10, %v7626_v22, 0.0 }
 0x5e6   : > { %7844 = vst [vmem:[%s10289_s7 + $0x198] sm:$0xff] %v7780_v36  ;;  %v7777_v18 = vsel %vm7657_vm11, %v14561_v50, %v7711_v8 }
 0x5e7   : > { %7841 = vst [vmem:[%s10289_s7 + $0x180] sm:$0xff] %v7777_v18  ;;  %v7628_v45 = vpop.permute.xlu1 %7627 }
 0x5e8   : > { %v7712_v19 = vsel %vm13378_vm10, %v7628_v45, 0.0  ;;  %v7638_v12 = vpop.permute.xlu0 %7637 }
 0x5e9   : > { %v7778_v54 = vsel %vm7657_vm11, %v14562_v4, %v7712_v19  ;;  %v7717_v48 = vsel %vm13378_vm10, %v7638_v12, 0.0 }
 0x5ea   : > { %7842 = vst [vmem:[%s10289_s7 + $0x188] sm:$0xff] %v7778_v54  ;;  %v7783_v20 = vsel %vm7657_vm11, %v14563_v7, %v7717_v48 }
 0x5eb   : > { %7847 = vst [vmem:[%s10289_s7 + $0x1b0] sm:$0xff] %v7783_v20  ;;  %v7640_v58 = vpop.permute.xlu1 %7639 }
 0x5ec   : > { %v7718_v34 = vsel %vm13378_vm10, %v7640_v58, 0.0  ;;  %v7634_v55 = vpop.permute.xlu0 %7633 }
 0x5ed   : > { %v7784_v29 = vsel %vm7657_vm11, %v14564_v15, %v7718_v34  ;;  %v7715_v41 = vsel %vm13378_vm10, %v7634_v55, 0.0 }
 0x5ee   : > { %7848 = vst [vmem:[%s10289_s7 + $0x1b8] sm:$0xff] %v7784_v29  ;;  %v7781_v21 = vsel %vm7657_vm11, %v14565_v46, %v7715_v41 }
 0x5ef   : > { %7845 = vst [vmem:[%s10289_s7 + $0x1a0] sm:$0xff] %v7781_v21  ;;  %v7636_v63 = vpop.permute.xlu1 %7635 }
 0x5f0   : > { %v7716_v13 = vsel %vm13378_vm10, %v7636_v63, 0.0  ;;  %v7646_v49 = vpop.permute.xlu0 %7645 }
 0x5f1   : > { %v7782_v17 = vsel %vm7657_vm11, %v14566_v30, %v7716_v13  ;;  %v7721_v35 = vsel %vm13378_vm10, %v7646_v49, 0.0 }
 0x5f2   : > { %7846 = vst [vmem:[%s10289_s7 + $0x1a8] sm:$0xff] %v7782_v17  ;;  %v7787_v2 = vsel %vm7657_vm11, %v14567_v5, %v7721_v35 }
 0x5f3   : > { %7851 = vst [vmem:[%s10289_s7 + $0x1d0] sm:$0xff] %v7787_v2  ;;  %v7648_v38 = vpop.permute.xlu1 %7647 }
 0x5f4   : > { %v7722_v32 = vsel %vm13378_vm10, %v7648_v38, 0.0  ;;  %v7642_v16 = vpop.permute.xlu0 %7641 }
 0x5f5   : > { %v7788_v62 = vsel %vm7657_vm11, %v14568_v37, %v7722_v32  ;;  %v7719_v61 = vsel %vm13378_vm10, %v7642_v16, 0.0 }
 0x5f6   : > { %7852 = vst [vmem:[%s10289_s7 + $0x1d8] sm:$0xff] %v7788_v62  ;;  %v7785_v9 = vsel %vm7657_vm11, %v14569_v53, %v7719_v61 }
 0x5f7   : > { %7849 = vst [vmem:[%s10289_s7 + $0x1c0] sm:$0xff] %v7785_v9  ;;  %v7644_v40 = vpop.permute.xlu1 %7643 }
 0x5f8   : > { %v7720_v23 = vsel %vm13378_vm10, %v7644_v40, 0.0  ;;  %v7650_v47 = vpop.permute.xlu0 %7649 }
 0x5f9   : > { %v7786_v56 = vsel %vm7657_vm11, %v14570_v26, %v7720_v23  ;;  %v7723_v24 = vsel %vm13378_vm10, %v7650_v47, 0.0 }
 0x5fa   : > { %7850 = vst [vmem:[%s10289_s7 + $0x1c8] sm:$0xff] %v7786_v56  ;;  %v7789_v59 = vsel %vm7657_vm11, %v14571_v52, %v7723_v24 }
 0x5fb   : > { %7853 = vst [vmem:[%s10289_s7 + $0x1e0] sm:$0xff] %v7789_v59  ;;  %v7652_v43 = vpop.permute.xlu1 %7651 }
 0x5fc   : > { %v7724_v31 = vsel %vm13378_vm10, %v7652_v43, 0.0  ;;  %v7654_v27 = vpop.permute.xlu0 %7653 }
 0x5fd   : > { %v7790_v28 = vsel %vm7657_vm11, %v14572_v60, %v7724_v31  ;;  %v7725_v10 = vsel %vm13378_vm10, %v7654_v27, 0.0 }
 0x5fe   : > { %7854 = vst [vmem:[%s10289_s7 + $0x1e8] sm:$0xff] %v7790_v28  ;;  %v7791_v51 = vsel %vm7657_vm11, %v14573_v14, %v7725_v10 }
 0x5ff   : > { %7855 = vst [vmem:[%s10289_s7 + $0x1f0] sm:$0xff] %v7791_v51  ;;  %v7656_v39 = vpop.permute.xlu1 %7655 }
 0x600   : > { %v7726_v6 = vsel %vm13378_vm10, %v7656_v39, 0.0 }
 0x601   : > { %v7792_v1 = vsel %vm7657_vm11, %v14574_v11, %v7726_v6 }
 0x602   : > { %7856 = vst [vmem:[%s10289_s7 + $0x1f8] sm:$0xff] %v7792_v1 }
 0x603 PF: > { %s16_s23 = sadd.s32 1, %s10228_s23   ;;  %s14575_s21 = smov %s10224_s22 }
 0x604   : > { %p13_p5 = scmp.ge.s32.totalorder %s16_s23, 4   ;;  %s14576_s22 = smov %s14578_s24 }
 0x606   :  { %15 = sbr.rel (!%p13_p5) target bundleno = 2 (0x2), region = 176 }
 0x60d   :  { %7889 = vsyncmov [#allocation3] }
 0x610   :  { %s7890_s25 = vpop.sfrf %7889 }
 0x611   :  { %p8238_p6 = scmp.ne.s32.totalorder %s7890_s25, 0 }
 0x613   :  { %7894 = shalt.err (%p8238_p6)  }
 0x614   :  { %7896 = vsyncmov [#allocation3 + $0x1] }
 0x617   :  { %s7897_s26 = vpop.sfrf %7896 }
 0x618   :  { %p8239_p7 = scmp.ne.s32.totalorder %s7897_s26, 0 }
 0x61a   :  { %7901 = shalt.err (%p8239_p7)  }

</bundles_post_ra>
